<compile_context>
chip_gen: v7x
topology: tpu7x:2x2x1
jax: 0.10.0
libtpu: 0.0.40
codegen_flags: <defaults>
</compile_context>

<pallas_src>
import jax
import jax.numpy as jnp
from jax.experimental import pallas as pl
from jax.experimental.pallas import tpu as pltpu

MP_FEA_SIZE = 16        # mp_fea_size
METAPATH_FEA_HID = 32   # args.metapath_fea_hid
HIDDEN_SIZE = 32        # hidden_size (nvec2svec hidden width)
EPS = 1e-5              # torch.nn.LayerNorm default eps

assert METAPATH_FEA_HID == HIDDEN_SIZE, "single-slab packing assumes equal widths"
_F = MP_FEA_SIZE
_H = METAPATH_FEA_HID

# Row layout of the packed parameter slab, shape (_F + 10, _H) f32:
_R_B1 = _F           # encoder Linear(F,H) bias
_R_G1 = _F + 1       # encoder LayerNorm gamma
_R_BE1 = _F + 2      # encoder LayerNorm beta
_R_W2 = _F + 3       # encoder Linear(H,1) weight, stored as a (1,H) row
_R_W3 = _F + 4       # nvec2svec Linear(1,H) weight, stored as a (1,H) row
_R_B3 = _F + 5       # nvec2svec Linear(1,H) bias
_R_G2 = _F + 6       # nvec2svec LayerNorm gamma
_R_BE2 = _F + 7      # nvec2svec LayerNorm beta
_R_W4 = _F + 8       # nvec2svec Linear(H,1) weight, stored as a (1,H) row
_R_SC = _F + 9       # scalar row: [b2, b4, 0, ...]
N_PARAM_ROWS = _F + 10


def _round_up(n, m):
    return ((n + m - 1) // m) * m


def _layer_norm(h, gamma, beta):
    mu = jnp.mean(h, axis=-1, keepdims=True)
    var = jnp.mean((h - mu) ** 2, axis=-1, keepdims=True)   # biased var (torch LN)
    return (h - mu) * jax.lax.rsqrt(var + EPS) * gamma + beta


def _gelu(x):
    # exact erf-based GELU (torch.nn.GELU default)
    return 0.5 * x * (1.0 + jax.lax.erf(x * 0.7071067811865476))


def meta_path_mlp_kernel(x_ref, p_ref, o_ref):
    x = x_ref[...]                                   # (TB, F), f32

    # static views into the resident parameter slab (no extra DMA descriptors)
    w1 = p_ref[0:_F, :]                              # (F, H)
    b1 = p_ref[_R_B1:_R_B1 + 1, :]                   # (1, H)
    g1 = p_ref[_R_G1:_R_G1 + 1, :]
    be1 = p_ref[_R_BE1:_R_BE1 + 1, :]
    w2 = p_ref[_R_W2:_R_W2 + 1, :]                   # (1, H)  Linear(H,1) weight row
    w3 = p_ref[_R_W3:_R_W3 + 1, :]                   # (1, H)  Linear(1,H) weight row
    b3 = p_ref[_R_B3:_R_B3 + 1, :]
    g2 = p_ref[_R_G2:_R_G2 + 1, :]
    be2 = p_ref[_R_BE2:_R_BE2 + 1, :]
    w4 = p_ref[_R_W4:_R_W4 + 1, :]                   # (1, H)  Linear(H,1) weight row
    sc = p_ref[_R_SC:_R_SC + 1, :]                   # (1, H)  [b2, b4, 0, ...]
    b2 = sc[:, 0:1]                                  # (1, 1)
    b4 = sc[:, 1:2]                                  # (1, 1)

    # --- metapath_fea_encoder: Linear -> Dropout(noop) -> LayerNorm -> GELU -> Linear -> Sigmoid
    h = jnp.dot(x, w1, preferred_element_type=jnp.float32) + b1     # (TB, H), MXU
    h = _layer_norm(h, g1, be1)
    h = _gelu(h)
    out1 = jnp.sum(h * w2, axis=-1, keepdims=True) + b2             # (TB, 1)
    s = jax.nn.sigmoid(out1)

    # --- nvec2svec: Linear(1,H) -> LayerNorm -> GELU -> Linear(H,1)
    h2 = s * w3 + b3                                                # (TB, H) broadcast
    h2 = _layer_norm(h2, g2, be2)
    h2 = _gelu(h2)
    # Final Linear(H,1) as a (1,H) x (TB,H)^T contraction -> lane-dense (1, TB) row.
    out_row = jax.lax.dot_general(
        w4, h2, (((1,), (1,)), ((), ())),
        preferred_element_type=jnp.float32) + b4                    # (1, TB)

    o_ref[...] = out_row.astype(o_ref.dtype)


def init_params(key):
    """Per-tensor parameters in the same layout as the PyTorch module."""
    ks = jax.random.split(key, 12)
    f32 = jnp.float32
    w1 = jax.random.normal(ks[0], (_F, _H), f32) * 0.3
    b1 = jax.random.normal(ks[1], (1, _H), f32) * 0.1
    g1 = 1.0 + 0.1 * jax.random.normal(ks[2], (1, _H), f32)
    be1 = jax.random.normal(ks[3], (1, _H), f32) * 0.1
    w2 = jax.random.normal(ks[4], (1, _H), f32) * 0.3     # Linear(H,1) weight as row
    b2 = jax.random.normal(ks[5], (1, 1), f32) * 0.1
    w3 = jax.random.normal(ks[6], (1, _H), f32) * 0.3     # Linear(1,H) weight as row
    b3 = jax.random.normal(ks[7], (1, _H), f32) * 0.1
    g2 = 1.0 + 0.1 * jax.random.normal(ks[8], (1, _H), f32)
    be2 = jax.random.normal(ks[9], (1, _H), f32) * 0.1
    w4 = jax.random.normal(ks[10], (1, _H), f32) * 0.3    # Linear(H,1) weight as row
    b4 = jax.random.normal(ks[11], (1, 1), f32) * 0.1
    return (w1, b1, g1, be1, w2, b2, w3, b3, g2, be2, w4, b4)


def pack_params(params):
    """Pack the 12 parameter tensors into one (F+10, H) f32 slab (one DMA)."""
    (w1, b1, g1, be1, w2, b2, w3, b3, g2, be2, w4, b4) = params
    scal = jnp.zeros((1, _H), jnp.float32)
    scal = scal.at[0, 0].set(b2[0, 0]).at[0, 1].set(b4[0, 0])
    slab = jnp.concatenate(
        [w1, b1, g1, be1, w2, w3, b3, g2, be2, w4, scal], axis=0).astype(jnp.float32)
    assert slab.shape == (N_PARAM_ROWS, _H)
    return slab


def meta_path_mlp_reference(x, params):
    """Pure-JAX reference of the PyTorch forward (eval mode)."""
    (w1, b1, g1, be1, w2, b2, w3, b3, g2, be2, w4, b4) = params
    h = jnp.dot(x, w1, precision=jax.lax.Precision.HIGHEST) + b1
    h = _layer_norm(h, g1, be1)
    h = _gelu(h)
    s = jax.nn.sigmoid(jnp.sum(h * w2, axis=-1, keepdims=True) + b2)
    h2 = s * w3 + b3
    h2 = _layer_norm(h2, g2, be2)
    h2 = _gelu(h2)
    return jnp.sum(h2 * w4, axis=-1, keepdims=True) + b4


def meta_path_mlp(metapath_feature_count, packed_params, *, block_rows=512):
    """Forward of Meta_Path_MLP. adj / node_type_ids / metapath_feature are unused
    by the PyTorch forward and therefore omitted."""
    assert block_rows % 128 == 0
    x = metapath_feature_count.astype(jnp.float32)
    b = x.shape[0]
    assert x.shape[1] == MP_FEA_SIZE
    assert packed_params.shape == (N_PARAM_ROWS, _H)

    # Tile: large lane/sublane-aligned row blocks; pad batch so the grid divides.
    tb = min(block_rows, _round_up(b, 8))
    b_pad = _round_up(b, tb)
    if b_pad != b:
        x = jnp.pad(x, ((0, b_pad - b), (0, 0)))
    n_blocks = b_pad // tb

    out_row = pl.pallas_call(
        meta_path_mlp_kernel,
        out_shape=jax.ShapeDtypeStruct((1, b_pad), jnp.float32),
        grid=(n_blocks,),
        in_specs=[
            pl.BlockSpec((tb, MP_FEA_SIZE), lambda i: (i, 0)),     # x row tile
            pl.BlockSpec((N_PARAM_ROWS, _H), lambda i: (0, 0)),    # resident params
        ],
        out_specs=pl.BlockSpec((1, tb), lambda i: (0, i)),         # lane-dense row
        compiler_params=pltpu.CompilerParams(
            dimension_semantics=("parallel",)),
    )(x, packed_params)

    return out_row[0, :b].reshape(b, 1)


if __name__ == "__main__":
    key = jax.random.PRNGKey(0)
    k_x, k_p = jax.random.split(key)

    batch = 1000   # not a multiple of the tile -> exercises padding + 4-step grid
    metapath_feature_count = jax.random.normal(k_x, (batch, MP_FEA_SIZE), jnp.float32)
    params = init_params(k_p)
    slab = pack_params(params)

    out = meta_path_mlp(metapath_feature_count, slab, block_rows=256)
    jax.block_until_ready(out)
    assert out.shape == (batch, 1)

    # Correctness check against the pure-JAX reference (tolerance covers possible
    # MXU f32 pass-count differences between the Pallas matmul and the XLA matmul).
    ref = meta_path_mlp_reference(metapath_feature_count, params)
    max_err = float(jnp.max(jnp.abs(out - ref)))
    assert max_err < 2e-2, f"kernel/reference mismatch: max abs err {max_err}"

    print("KERNEL_OK")
</pallas_src>

<mosaic_0001>
module attributes {stable_mosaic.version = 11 : i64} {
  func.func @meta_path_mlp_kernel(%arg0: i32, %arg1: memref<256x16xf32, #tpu.memory_space<vmem>>, %arg2: memref<26x32xf32, #tpu.memory_space<vmem>>, %arg3: memref<1x256xf32, #tpu.memory_space<vmem>>) attributes {dimension_semantics = [#tpu.dimension_semantics<parallel>], iteration_bounds = array<i64: 4>, scalar_prefetch = 0 : i64, scratch_operands = 0 : i64, tpu.core_type = #tpu.core_type<tc>, window_params = [{transform_indices = @transform_0, window_bounds = array<i64: 256, 16>}, {pipeline_mode = #tpu.pipeline_mode<synchronous>, transform_indices = @transform_1, window_bounds = array<i64: 26, 32>}, {transform_indices = @transform_2, window_bounds = array<i64: 1, 256>}]} {
    %c0 = arith.constant 0 : index
    %c0_0 = arith.constant 0 : index
    %0 = vector.load %arg1[%c0, %c0_0] : memref<256x16xf32, #tpu.memory_space<vmem>>, vector<256x16xf32>
    %c0_1 = arith.constant 0 : index
    %c0_2 = arith.constant 0 : index
    %1 = vector.load %arg2[%c0_1, %c0_2] : memref<26x32xf32, #tpu.memory_space<vmem>>, vector<16x32xf32>
    %c16 = arith.constant 16 : index
    %c0_3 = arith.constant 0 : index
    %2 = vector.load %arg2[%c16, %c0_3] : memref<26x32xf32, #tpu.memory_space<vmem>>, vector<1x32xf32>
    %c17 = arith.constant 17 : index
    %c0_4 = arith.constant 0 : index
    %3 = vector.load %arg2[%c17, %c0_4] : memref<26x32xf32, #tpu.memory_space<vmem>>, vector<1x32xf32>
    %c18 = arith.constant 18 : index
    %c0_5 = arith.constant 0 : index
    %4 = vector.load %arg2[%c18, %c0_5] : memref<26x32xf32, #tpu.memory_space<vmem>>, vector<1x32xf32>
    %c19 = arith.constant 19 : index
    %c0_6 = arith.constant 0 : index
    %5 = vector.load %arg2[%c19, %c0_6] : memref<26x32xf32, #tpu.memory_space<vmem>>, vector<1x32xf32>
    %c20 = arith.constant 20 : index
    %c0_7 = arith.constant 0 : index
    %6 = vector.load %arg2[%c20, %c0_7] : memref<26x32xf32, #tpu.memory_space<vmem>>, vector<1x32xf32>
    %c21 = arith.constant 21 : index
    %c0_8 = arith.constant 0 : index
    %7 = vector.load %arg2[%c21, %c0_8] : memref<26x32xf32, #tpu.memory_space<vmem>>, vector<1x32xf32>
    %c22 = arith.constant 22 : index
    %c0_9 = arith.constant 0 : index
    %8 = vector.load %arg2[%c22, %c0_9] : memref<26x32xf32, #tpu.memory_space<vmem>>, vector<1x32xf32>
    %c23 = arith.constant 23 : index
    %c0_10 = arith.constant 0 : index
    %9 = vector.load %arg2[%c23, %c0_10] : memref<26x32xf32, #tpu.memory_space<vmem>>, vector<1x32xf32>
    %c24 = arith.constant 24 : index
    %c0_11 = arith.constant 0 : index
    %10 = vector.load %arg2[%c24, %c0_11] : memref<26x32xf32, #tpu.memory_space<vmem>>, vector<1x32xf32>
    %c25 = arith.constant 25 : index
    %c0_12 = arith.constant 0 : index
    %11 = vector.load %arg2[%c25, %c0_12] : memref<26x32xf32, #tpu.memory_space<vmem>>, vector<1x32xf32>
    %12 = vector.extract_strided_slice %11 {offsets = [0, 0], sizes = [1, 1], strides = [1, 1]} : vector<1x32xf32> to vector<1x1xf32>
    %13 = vector.extract_strided_slice %11 {offsets = [0, 1], sizes = [1, 1], strides = [1, 1]} : vector<1x32xf32> to vector<1x1xf32>
    %cst = arith.constant dense<0.000000e+00> : vector<256x32xf32>
    %14 = tpu.matmul %0, %1, %cst {dimension_numbers = #tpu.dot_dimension_numbers<[1], [0], [0], [1], [0, 0, 1, 1], [], []>} : vector<256x16xf32>, vector<16x32xf32>, vector<256x32xf32> -> vector<256x32xf32>
    %15 = vector.broadcast %2 : vector<1x32xf32> to vector<256x32xf32>
    %16 = arith.addf %14, %15 : vector<256x32xf32>
    %cst_13 = arith.constant dense<0.000000e+00> : vector<256xf32>
    %17 = vector.multi_reduction <add>, %16, %cst_13 [1] : vector<256x32xf32> to vector<256xf32>
    %18 = vector.shape_cast %17 : vector<256xf32> to vector<256x1xf32>
    %cst_14 = arith.constant 3.200000e+01 : f32
    %19 = vector.broadcast %cst_14 : f32 to vector<256x1xf32>
    %20 = arith.divf %18, %19 : vector<256x1xf32>
    %21 = vector.broadcast %20 : vector<256x1xf32> to vector<256x32xf32>
    %22 = arith.subf %16, %21 : vector<256x32xf32>
    %23 = arith.mulf %22, %22 : vector<256x32xf32>
    %cst_15 = arith.constant dense<0.000000e+00> : vector<256xf32>
    %24 = vector.multi_reduction <add>, %23, %cst_15 [1] : vector<256x32xf32> to vector<256xf32>
    %25 = vector.shape_cast %24 : vector<256xf32> to vector<256x1xf32>
    %cst_16 = arith.constant 3.200000e+01 : f32
    %26 = vector.broadcast %cst_16 : f32 to vector<256x1xf32>
    %27 = arith.divf %25, %26 : vector<256x1xf32>
    %28 = vector.broadcast %20 : vector<256x1xf32> to vector<256x32xf32>
    %29 = arith.subf %16, %28 : vector<256x32xf32>
    %cst_17 = arith.constant 9.99999974E-6 : f32
    %30 = vector.broadcast %cst_17 : f32 to vector<256x1xf32>
    %31 = arith.addf %27, %30 : vector<256x1xf32>
    %32 = math.rsqrt %31 : vector<256x1xf32>
    %33 = vector.broadcast %32 : vector<256x1xf32> to vector<256x32xf32>
    %34 = arith.mulf %29, %33 : vector<256x32xf32>
    %35 = vector.broadcast %3 : vector<1x32xf32> to vector<256x32xf32>
    %36 = arith.mulf %34, %35 : vector<256x32xf32>
    %37 = vector.broadcast %4 : vector<1x32xf32> to vector<256x32xf32>
    %38 = arith.addf %36, %37 : vector<256x32xf32>
    %cst_18 = arith.constant 5.000000e-01 : f32
    %39 = vector.broadcast %cst_18 : f32 to vector<256x32xf32>
    %40 = arith.mulf %39, %38 : vector<256x32xf32>
    %cst_19 = arith.constant 0.707106769 : f32
    %41 = vector.broadcast %cst_19 : f32 to vector<256x32xf32>
    %42 = arith.mulf %38, %41 : vector<256x32xf32>
    %43 = math.erf %42 : vector<256x32xf32>
    %cst_20 = arith.constant 1.000000e+00 : f32
    %44 = vector.broadcast %cst_20 : f32 to vector<256x32xf32>
    %45 = arith.addf %44, %43 : vector<256x32xf32>
    %46 = arith.mulf %40, %45 : vector<256x32xf32>
    %47 = vector.broadcast %5 : vector<1x32xf32> to vector<256x32xf32>
    %48 = arith.mulf %46, %47 : vector<256x32xf32>
    %cst_21 = arith.constant dense<0.000000e+00> : vector<256xf32>
    %49 = vector.multi_reduction <add>, %48, %cst_21 [1] : vector<256x32xf32> to vector<256xf32>
    %50 = vector.shape_cast %49 : vector<256xf32> to vector<256x1xf32>
    %51 = vector.broadcast %12 : vector<1x1xf32> to vector<256x1xf32>
    %52 = arith.addf %50, %51 : vector<256x1xf32>
    %53 = arith.negf %52 : vector<256x1xf32>
    %54 = math.exp %53 : vector<256x1xf32>
    %cst_22 = arith.constant 1.000000e+00 : f32
    %55 = vector.broadcast %cst_22 : f32 to vector<256x1xf32>
    %56 = arith.addf %55, %54 : vector<256x1xf32>
    %57 = arith.divf %55, %56 : vector<256x1xf32>
    %58 = vector.broadcast %57 : vector<256x1xf32> to vector<256x32xf32>
    %59 = vector.broadcast %6 : vector<1x32xf32> to vector<256x32xf32>
    %60 = arith.mulf %58, %59 : vector<256x32xf32>
    %61 = vector.broadcast %7 : vector<1x32xf32> to vector<256x32xf32>
    %62 = arith.addf %60, %61 : vector<256x32xf32>
    %cst_23 = arith.constant dense<0.000000e+00> : vector<256xf32>
    %63 = vector.multi_reduction <add>, %62, %cst_23 [1] : vector<256x32xf32> to vector<256xf32>
    %64 = vector.shape_cast %63 : vector<256xf32> to vector<256x1xf32>
    %cst_24 = arith.constant 3.200000e+01 : f32
    %65 = vector.broadcast %cst_24 : f32 to vector<256x1xf32>
    %66 = arith.divf %64, %65 : vector<256x1xf32>
    %67 = vector.broadcast %66 : vector<256x1xf32> to vector<256x32xf32>
    %68 = arith.subf %62, %67 : vector<256x32xf32>
    %69 = arith.mulf %68, %68 : vector<256x32xf32>
    %cst_25 = arith.constant dense<0.000000e+00> : vector<256xf32>
    %70 = vector.multi_reduction <add>, %69, %cst_25 [1] : vector<256x32xf32> to vector<256xf32>
    %71 = vector.shape_cast %70 : vector<256xf32> to vector<256x1xf32>
    %cst_26 = arith.constant 3.200000e+01 : f32
    %72 = vector.broadcast %cst_26 : f32 to vector<256x1xf32>
    %73 = arith.divf %71, %72 : vector<256x1xf32>
    %74 = vector.broadcast %66 : vector<256x1xf32> to vector<256x32xf32>
    %75 = arith.subf %62, %74 : vector<256x32xf32>
    %cst_27 = arith.constant 9.99999974E-6 : f32
    %76 = vector.broadcast %cst_27 : f32 to vector<256x1xf32>
    %77 = arith.addf %73, %76 : vector<256x1xf32>
    %78 = math.rsqrt %77 : vector<256x1xf32>
    %79 = vector.broadcast %78 : vector<256x1xf32> to vector<256x32xf32>
    %80 = arith.mulf %75, %79 : vector<256x32xf32>
    %81 = vector.broadcast %8 : vector<1x32xf32> to vector<256x32xf32>
    %82 = arith.mulf %80, %81 : vector<256x32xf32>
    %83 = vector.broadcast %9 : vector<1x32xf32> to vector<256x32xf32>
    %84 = arith.addf %82, %83 : vector<256x32xf32>
    %cst_28 = arith.constant 5.000000e-01 : f32
    %85 = vector.broadcast %cst_28 : f32 to vector<256x32xf32>
    %86 = arith.mulf %85, %84 : vector<256x32xf32>
    %cst_29 = arith.constant 0.707106769 : f32
    %87 = vector.broadcast %cst_29 : f32 to vector<256x32xf32>
    %88 = arith.mulf %84, %87 : vector<256x32xf32>
    %89 = math.erf %88 : vector<256x32xf32>
    %cst_30 = arith.constant 1.000000e+00 : f32
    %90 = vector.broadcast %cst_30 : f32 to vector<256x32xf32>
    %91 = arith.addf %90, %89 : vector<256x32xf32>
    %92 = arith.mulf %86, %91 : vector<256x32xf32>
    %cst_31 = arith.constant dense<0.000000e+00> : vector<1x256xf32>
    %93 = tpu.matmul %10, %92, %cst_31 {dimension_numbers = #tpu.dot_dimension_numbers<[1], [1], [0], [0], [0, 0, 1, 0], [], []>} : vector<1x32xf32>, vector<256x32xf32>, vector<1x256xf32> -> vector<1x256xf32>
    %94 = vector.broadcast %13 : vector<1x1xf32> to vector<1x256xf32>
    %95 = arith.addf %93, %94 : vector<1x256xf32>
    %c0_32 = arith.constant 0 : index
    %c0_33 = arith.constant 0 : index
    %96 = vector.load %arg3[%c0_32, %c0_33] : memref<1x256xf32, #tpu.memory_space<vmem>>, vector<1x256xf32>
    tpu.vector_store %arg3[%c0_32, %c0_33], %95 {strides = array<i32>} : memref<1x256xf32, #tpu.memory_space<vmem>>, vector<1x256xf32>,
    return
  }
  func.func @transform_0(%arg0: i32) -> (i32, i32) {
    %c0_i32 = arith.constant 0 : i32
    %c0_i32_0 = arith.constant 0 : i32
    return %arg0, %c0_i32 : i32, i32
  }
  func.func @transform_1(%arg0: i32) -> (i32, i32) {
    %c0_i32 = arith.constant 0 : i32
    %c0_i32_0 = arith.constant 0 : i32
    %c0_i32_1 = arith.constant 0 : i32
    return %c0_i32, %c0_i32_0 : i32, i32
  }
  func.func @transform_2(%arg0: i32) -> (i32, i32) {
    %c0_i32 = arith.constant 0 : i32
    %c0_i32_0 = arith.constant 0 : i32
    return %c0_i32, %arg0 : i32, i32
  }
}

</mosaic_0001>

<bundles_post_ra>
// kernel: tpu_custom_call.1
= control target key start
LH: loop header
LB: loop body
LE: loop exit
PB: predicated region body
PF: predicated region fallthrough
CT: control target
= control target key end

     0   :  { %7 = vsyncpa [#allocation3], 0  ;;  %s4942_s0 = inlined_call_operand.vmem [shape: f32[1024,16], index: 0, kind: input, shape index: {}]   ;;  %s4943_s1 = inlined_call_operand.vmem [shape: f32[26,32], index: 1, kind: input, shape index: {}]   ;;  %s4944_s2 = inlined_call_operand.hbm [shape: f32[1,1024], index: 2, kind: output, shape index: {}]  }
   0x1   :  { %9 = vsyncpa [#allocation3 + $0x1], 0  ;;  %s3481_s9 = smov 0   ;;  %s3483_s10 = smov 0  }
   0x2   :  { %s3485_s11 = smov 0   ;;  %s3487_s12 = smov 0  }
   0x3 LB: > { %s2676_s13 = sadd.s32 4294967295, %s3460_s12   ;;  %s2677_s14 = sadd.s32 4294967294, %s3460_s12   ;;  %s3460_s12 = sphi %s3487_s12, %s4952_s12   ;;  %s3456_s11 = sphi %s3485_s11, %s4951_s11   ;;  %s3452_s10 = sphi %s3483_s10, %s4950_s10   ;;  %s3448_s9 = sphi %s3481_s9, %s4949_s9  }
   0x4   : > { %s3504_s15 = sadd.s32 1, %s3460_s12   ;;  %s69_s16 = sadd.s32 1, %s3456_s11 }
   0x5   : > { %s66_s17 = ssub.s32 %s3460_s12, %s3504_s15  ;;  %p79_p0 = scmp.ne.s32.totalorder %s3456_s11, %s3452_s10 }
   0x6   : > { %p67_p1 = scmp.eq.s32.totalorder %s66_s17, 0  ;;  %p80_p2 = scmp.eq.s32.totalorder %s2676_s13, 3 }
   0x7   : > { %p85_p3 = scmp.ne.s32.totalorder %s3452_s10, %s3448_s9  ;;  %p86_p4 = scmp.eq.s32.totalorder %s2677_s14, 3 }
   0x8   : > { %s3514_s18 = scalar_select %p67_p1, %s3456_s11, %s69_s16  }
   0x9   : > { %p3516_p5 = por %p80_p2, %p79_p0  ;;  %p3520_p6 = por %p86_p4, %p85_p3 }
   0xa   : > { %p2680_p7 = scmp.ge.s32.totalorder %s3460_s12, 1  ;;  %p116_p8 = scmp.lt.s32.totalorder %s3460_s12, 5 }
   0xc   : > { %p117_p9 = pnand %p2680_p7, %p116_p8 }
   0xd   : > { %v177_v0 = vld [vmem:[%s4943_s1] sm:$0xff] (!%p117_p9)  ;;  %v178_v1 = vld [vmem:[%s4943_s1 + $0x8] sm:$0xff] (!%p117_p9)  ;;  %s3532_s25 = sshll.u32 (!%p117_p9), %s2676_s13, 5  ;;  %vm193_vm0 = vcmask (!%p117_p9), 130048   ;;  %v3608_v35 = vld [vmem:[%s4943_s1 + $0x10] ss:$0 sm:$0xff] (!%p117_p9) }
   0xe   : > { %120 = sbr.rel (%p117_p9) target bundleno = 1609 (0x649), region = 28  ;;  %v2915_v2 = vpack.c.bf16 (!%p117_p9), %v178_v1, %v177_v0  ;;  %p139_p10 = scmp.lt.s32.totalorder (!%p117_p9), %s3532_s25, 127  ;;  %vm515_vm1 = vcmask (!%p117_p9), 261120  }
   0xf   : > { %vm4720_vm2 = vmpackc.low (!%p117_p9), %vm515_vm1, %vm515_vm1  ;;  %s135_s6 = sand.u32 (!%p117_p9), 1, %s3452_s10   ;;  %s4900_s17 = scalar_lea.hbm (!%p117_p9), %s4944_s2, %s3532_s25 }
  0x10   : > { %2916 = vmatprep.subr.bf16.mxu0 (!%p117_p9), %v2915_v2  ;;  %s2681_s7 = sshll.u32 (!%p117_p9), %s135_s6, 1  ;;  %s2604_s21 = scalar_lea.sflag (!%p117_p9), [#allocation3], %s135_s6 }
  0x11   : > { %2918 = vmatpush3.bf16.msra.mxu0 (!%p117_p9), %v2915_v2  ;;  %s137_s8 = scalar_lea.vmem (!%p117_p9), [#allocation2], %s2681_s7  ;;  %s3465_s23 = smov (!%p117_p9), [#allocation2]  }
  0x12   : > { %s2618_s13 = sshll.u32 (!%p117_p9), %s137_s8, 4  ;;  %s3402_s24 = sshll.u32 (!%p117_p9), %s3465_s23, 4  ;;  %s4902_s13 = int_to_ptr.vmem [resolvable:$true] %s2618_s13  ;;  %s3403_s24 = int_to_ptr.vmem [resolvable:$false] %s3402_s24 }
  0x13   : > { %s3398_s22 = scalar_lea.vmem (!%p117_p9), %s4902_s13, 32  ;;  %p3405_p0 = scmp.lt.s32.totalorder (!%p117_p9), %s4902_s13, %s3403_s24 }
  0x14   : > { %p3399_p11 = scmp.ne.s32.totalorder (!%p117_p9), %s4902_s13, %s3398_s22 }
  0x15   : > { %s140_s26 = scalar_select %p139_p10, %s3532_s25, 127 }
  0x16   : > { %p3400_p12 = pnand %p3399_p11, %p3516_p5 }
  0x17   : > { %s2683_s27 = sshll.u32 %s140_s26, 3  ;;  %s3404_s26 = scalar_lea.vmem %s3403_s24, 64 }
  0x18   : > { %s3539_s30 = scalar_lea.vmem %s4942_s0, %s2683_s27  ;;  %p3401_p13 = pneg %p3400_p12 }
  0x19   : > { %v145_v3 = vld [vmem:[%s3539_s30] sm:$0xff]  ;;  %v146_v4 = vld [vmem:[%s3539_s30 + $0x8] sm:$0xff]  ;;  %v147_v5 = vld [vmem:[%s3539_s30 + $0x10] sm:$0xff]  ;;  %p3406_p1 = scmp.lt.s32.totalorder %s3404_s26, %s3398_s22 }
  0x1a   : > { %2867 = vmatprep.mubr.msk.f32.mxu0 %vm193_vm0, %v145_v3  ;;  %v148_v6 = vld [vmem:[%s3539_s30 + $0x18] sm:$0xff]  ;;  %v149_v7 = vld [vmem:[%s3539_s30 + $0x20] sm:$0xff]  ;;  %v150_v8 = vld [vmem:[%s3539_s30 + $0x28] sm:$0xff] }
  0x1b   : > { %2868 = vmatmul.mubr.msk.f32.vlgmr.msra.gmra.mrb[0].mxu0 %vm193_vm0, %v146_v4  ;;  %v151_v9 = vld [vmem:[%s3539_s30 + $0x30] sm:$0xff]  ;;  %v152_v10 = vld [vmem:[%s3539_s30 + $0x38] sm:$0xff]  ;;  %v153_v11 = vld [vmem:[%s3539_s30 + $0x40] sm:$0xff]  ;;  %p3407_p2 = por %p3406_p1, %p3405_p0 }
  0x1c   : > { %2870 = vmatprep.mubr.msk.f32.mxu0 %vm193_vm0, %v147_v5  ;;  %v154_v12 = vld [vmem:[%s3539_s30 + $0x48] sm:$0xff]  ;;  %v155_v13 = vld [vmem:[%s3539_s30 + $0x50] sm:$0xff]  ;;  %v156_v14 = vld [vmem:[%s3539_s30 + $0x58] sm:$0xff] }
  0x1d   : > { %v157_v15 = vld [vmem:[%s3539_s30 + $0x60] sm:$0xff]  ;;  %v158_v16 = vld [vmem:[%s3539_s30 + $0x68] sm:$0xff]  ;;  %v159_v17 = vld [vmem:[%s3539_s30 + $0x70] sm:$0xff]  ;;  %p3408_p3 = pnand %p3407_p2, %p3401_p13 }
  0x1e   : > { %v160_v18 = vld [vmem:[%s3539_s30 + $0x78] sm:$0xff]  ;;  %v161_v19 = vld [vmem:[%s3539_s30 + $0x80] sm:$0xff]  ;;  %v162_v20 = vld [vmem:[%s3539_s30 + $0x88] sm:$0xff] }
  0x1f   : > { %2871 = vmatmul.mubr.msk.f32.gmra.mrb[2].mxu0 %vm193_vm0, %v148_v6  ;;  %v163_v21 = vld [vmem:[%s3539_s30 + $0x90] sm:$0xff]  ;;  %v164_v22 = vld [vmem:[%s3539_s30 + $0x98] sm:$0xff]  ;;  %v165_v23 = vld [vmem:[%s3539_s30 + $0xa0] sm:$0xff] }
  0x20   : > { %2873 = vmatprep.mubr.msk.f32.mxu0 %vm193_vm0, %v149_v7  ;;  %v166_v24 = vld [vmem:[%s3539_s30 + $0xa8] sm:$0xff]  ;;  %v167_v25 = vld [vmem:[%s3539_s30 + $0xb0] sm:$0xff]  ;;  %v168_v26 = vld [vmem:[%s3539_s30 + $0xb8] sm:$0xff] }
  0x21   : > { %v169_v27 = vld [vmem:[%s3539_s30 + $0xc0] sm:$0xff]  ;;  %v170_v28 = vld [vmem:[%s3539_s30 + $0xc8] sm:$0xff]  ;;  %v171_v29 = vld [vmem:[%s3539_s30 + $0xd0] sm:$0xff] }
  0x22   : > { %v172_v30 = vld [vmem:[%s3539_s30 + $0xd8] sm:$0xff]  ;;  %v173_v31 = vld [vmem:[%s3539_s30 + $0xe0] sm:$0xff]  ;;  %v174_v32 = vld [vmem:[%s3539_s30 + $0xe8] sm:$0xff] }
  0x23   : > { %2874 = vmatmul.mubr.msk.f32.gmra.mrb[4].mxu0 %vm193_vm0, %v150_v8  ;;  %v175_v33 = vld [vmem:[%s3539_s30 + $0xf0] sm:$0xff]  ;;  %v176_v34 = vld [vmem:[%s3539_s30 + $0xf8] sm:$0xff] }
  0x24   : > { %2876 = vmatprep.mubr.msk.f32.mxu0 %vm193_vm0, %v151_v9 }
  0x27   : > { %2877 = vmatmul.mubr.msk.f32.gmra.mrb[6].mxu0 %vm193_vm0, %v152_v10 }
  0x28   : > { %2879 = vmatprep.mubr.msk.f32.mxu0 %vm193_vm0, %v153_v11 }
  0x2b   : > { %2880 = vmatmul.mubr.msk.f32.gmra.mrb[8].mxu0 %vm193_vm0, %v154_v12 }
  0x2c   : > { %2882 = vmatprep.mubr.msk.f32.mxu0 %vm193_vm0, %v155_v13 }
  0x2f   : > { %2883 = vmatmul.mubr.msk.f32.gmra.mrb[10].mxu0 %vm193_vm0, %v156_v14 }
  0x30   : > { %2885 = vmatprep.mubr.msk.f32.mxu0 %vm193_vm0, %v157_v15 }
  0x33   : > { %2886 = vmatmul.mubr.msk.f32.gmra.mrb[12].mxu0 %vm193_vm0, %v158_v16 }
  0x34   : > { %2888 = vmatprep.mubr.msk.f32.mxu0 %vm193_vm0, %v159_v17 }
  0x37   : > { %2889 = vmatmul.mubr.msk.f32.gmra.mrb[14].mxu0 %vm193_vm0, %v160_v18 }
  0x38   : > { %2891 = vmatprep.mubr.msk.f32.mxu0 %vm193_vm0, %v161_v19 }
  0x3b   : > { %2892 = vmatmul.mubr.msk.f32.gmra.mrb[16].mxu0 %vm193_vm0, %v162_v20 }
  0x3c   : > { %2894 = vmatprep.mubr.msk.f32.mxu0 %vm193_vm0, %v163_v21 }
  0x3f   : > { %2895 = vmatmul.mubr.msk.f32.gmra.mrb[18].mxu0 %vm193_vm0, %v164_v22 }
  0x40   : > { %2897 = vmatprep.mubr.msk.f32.mxu0 %vm193_vm0, %v165_v23 }
  0x43   : > { %2898 = vmatmul.mubr.msk.f32.gmra.mrb[20].mxu0 %vm193_vm0, %v166_v24 }
  0x44   : > { %2900 = vmatprep.mubr.msk.f32.mxu0 %vm193_vm0, %v167_v25 }
  0x47   : > { %2901 = vmatmul.mubr.msk.f32.gmra.mrb[22].mxu0 %vm193_vm0, %v168_v26 }
  0x48   : > { %2903 = vmatprep.mubr.msk.f32.mxu0 %vm193_vm0, %v169_v27 }
  0x4b   : > { %2904 = vmatmul.mubr.msk.f32.gmra.mrb[24].mxu0 %vm193_vm0, %v170_v28 }
  0x4c   : > { %2906 = vmatprep.mubr.msk.f32.mxu0 %vm193_vm0, %v171_v29 }
  0x4f   : > { %2907 = vmatmul.mubr.msk.f32.gmra.mrb[26].mxu0 %vm193_vm0, %v172_v30 }
  0x50   : > { %2909 = vmatprep.mubr.msk.f32.mxu0 %vm193_vm0, %v173_v31 }
  0x53   : > { %2910 = vmatmul.mubr.msk.f32.gmra.mrb[28].mxu0 %vm193_vm0, %v174_v32 }
  0x54   : > { %2912 = vmatprep.mubr.msk.f32.mxu0 %vm193_vm0, %v175_v33 }
  0x57   : > { %2913 = vmatmul.mubr.msk.f32.gmra.mrb[30].mxu0 %vm193_vm0, %v176_v34 }
  0xee   : > { %v2869_v36 = vpop.f32.mrb[0].mxu0 }
  0xef   : > { %v356_v37 = vpop.f32.mrb[1].mxu0  ;;  %v3614_v39 = vadd.f32 %v2869_v36, %v3608_v35 }
  0xf0   : > { %v3611_v38 = vadd.f32 %v3608_v35, %v356_v37 }
  0xf1   : > { %v519_v44 = vsel %vm515_vm1, %v3614_v39, 0.0 }
  0xf2   : > { %v2872_v40 = vpop.f32.mrb[2].mxu0  ;;  %v516_v41 = vsel %vm515_vm1, %v3611_v38, 0.0 }
  0xf3   : > { %v366_v42 = vpop.f32.mrb[3].mxu0  ;;  %517 = vadd.xlane.f32.xlu1 %v516_v41  ;;  %v3662_v8 = vadd.f32 %v2872_v40, %v3608_v35 }
  0xf4   : > { %v3676_v16 = vadd.f32 %v3608_v35, %v366_v42 }
  0xf5   : > { %v525_v15 = vsel %vm515_vm1, %v3662_v8, 0.0 }
  0xf6   : > { %v2875_v43 = vpop.f32.mrb[4].mxu0  ;;  %v522_v22 = vsel %vm515_vm1, %v3676_v16, 0.0 }
  0xf7   : > { %v376_v45 = vpop.f32.mrb[5].mxu0  ;;  %520 = vadd.xlane.f32.xlu1 %v519_v44  ;;  %v3684_v21 = vadd.f32 %v2875_v43, %v3608_v35 }
  0xf8   : > { %v3699_v29 = vadd.f32 %v3608_v35, %v376_v45 }
  0xf9   : > { %v531_v28 = vsel %vm515_vm1, %v3684_v21, 0.0 }
  0xfa   : > { %v3620_v46 = vpop.f32.mrb[6].mxu0  ;;  %v528_v40 = vsel %vm515_vm1, %v3699_v29, 0.0 }
  0xfb   : > { %v3622_v47 = vpop.f32.mrb[7].mxu0  ;;  %v3714_v37 = vadd.f32 %v3620_v46, %v3608_v35 }
  0xfd   : > { %v537_v46 = vsel %vm515_vm1, %v3714_v37, 0.0 }
  0xfe   : > { %v3624_v48 = vpop.f32.mrb[8].mxu0 }
  0xff   : > { %v396_v49 = vpop.f32.mrb[9].mxu0 }
 0x100   : > { %v3627_v50 = vadd.f32 %v3608_v35, %v396_v49 }
 0x102   : > { %v2884_v51 = vpop.f32.mrb[10].mxu0 }
 0x103   : > { %v3630_v52 = vadd.f32 %v2884_v51, %v3608_v35  ;;  %v406_v53 = vpop.f32.mrb[11].mxu0  ;;  %v3733_v51 = vadd.f32 %v3608_v35, %v3622_v47 }
 0x104   : > { %v3633_v54 = vadd.f32 %v3608_v35, %v406_v53 }
 0x105   : > { %v534_v47 = vsel %vm515_vm1, %v3733_v51, 0.0 }
 0x106   : > { %v2887_v55 = vpop.f32.mrb[12].mxu0 }
 0x107   : > { %v3636_v56 = vadd.f32 %v2887_v55, %v3608_v35  ;;  %v416_v57 = vpop.f32.mrb[13].mxu0 }
 0x108   : > { %v3639_v58 = vadd.f32 %v3608_v35, %v416_v57 }
 0x10a   : > { %v2890_v59 = vpop.f32.mrb[14].mxu0 }
 0x10b   : > { %v3642_v60 = vadd.f32 %v2890_v59, %v3608_v35  ;;  %v426_v61 = vpop.f32.mrb[15].mxu0 }
 0x10c   : > { %v3645_v62 = vadd.f32 %v3608_v35, %v426_v61 }
 0x10e   : > { %v2893_v63 = vpop.f32.mrb[16].mxu0 }
 0x10f   : > { %v436_v0 = vpop.f32.mrb[17].mxu0  ;;  %v3651_v2 = vadd.f32 %v2893_v63, %v3608_v35  ;;  %v3745_v63 = vadd.f32 %v3624_v48, %v3608_v35 }
 0x110   : > { %v3648_v1 = vadd.f32 %v3608_v35, %v436_v0 }
 0x111   : > { %v567_v10 = vsel %vm515_vm1, %v3651_v2, 0.0 }
 0x112   : > { %v2896_v3 = vpop.f32.mrb[18].mxu0  ;;  %v564_v4 = vsel %vm515_vm1, %v3648_v1, 0.0 }
 0x113   : > { %v3656_v5 = vadd.f32 %v2896_v3, %v3608_v35  ;;  %565 = vadd.xlane.f32.xlu0 %v564_v4  ;;  %v446_v6 = vpop.f32.mrb[19].mxu0  ;;  %v543_v3 = vsel %vm515_vm1, %v3745_v63, 0.0 }
 0x114   : > { %v3659_v7 = vadd.f32 %v3608_v35, %v446_v6  ;;  %v549_v6 = vsel %vm515_vm1, %v3630_v52, 0.0 }
 0x115   : > { %v573_v9 = vsel %vm515_vm1, %v3656_v5, 0.0 }
 0x116   : > { %574 = vadd.xlane.f32.xlu1 %v573_v9  ;;  %v2899_v11 = vpop.f32.mrb[20].mxu0  ;;  %v570_v14 = vsel %vm515_vm1, %v3659_v7, 0.0 }
 0x117   : > { %568 = vadd.xlane.f32.xlu0 %v567_v10  ;;  %v3669_v12 = vadd.f32 %v2899_v11, %v3608_v35  ;;  %v456_v13 = vpop.f32.mrb[21].mxu0  ;;  %v546_v10 = vsel %vm515_vm1, %v3633_v54, 0.0 }
 0x118   : > { %v3681_v20 = vadd.f32 %v3608_v35, %v456_v13  ;;  %v555_v13 = vsel %vm515_vm1, %v3636_v56, 0.0 }
 0x119   : > { %v579_v18 = vsel %vm515_vm1, %v3669_v12, 0.0 }
 0x11a   : > { %526 = vadd.xlane.f32.xlu1 %v525_v15  ;;  %v2902_v17 = vpop.f32.mrb[22].mxu0  ;;  %v576_v26 = vsel %vm515_vm1, %v3681_v20, 0.0  ;;  %v552_v15 = vsel %vm515_vm1, %v3639_v58, 0.0 }
 0x11b   : > { %571 = vadd.xlane.f32.xlu0 %v570_v14  ;;  %v466_v19 = vpop.f32.mrb[23].mxu0  ;;  %v3689_v24 = vadd.f32 %v2902_v17, %v3608_v35 }
 0x11c   : > { %v3707_v34 = vadd.f32 %v3608_v35, %v466_v19  ;;  %v558_v19 = vsel %vm515_vm1, %v3645_v62, 0.0 }
 0x11d   : > { %v585_v31 = vsel %vm515_vm1, %v3689_v24, 0.0 }
 0x11e   : > { %580 = vadd.xlane.f32.xlu1 %v579_v18  ;;  %v2905_v23 = vpop.f32.mrb[24].mxu0  ;;  %v582_v45 = vsel %vm515_vm1, %v3707_v34, 0.0  ;;  %v561_v18 = vsel %vm515_vm1, %v3642_v60, 0.0 }
 0x11f   : > { %523 = vadd.xlane.f32.xlu0 %v522_v22  ;;  %v476_v25 = vpop.f32.mrb[25].mxu0  ;;  %v3719_v42 = vadd.f32 %v2905_v23, %v3608_v35 }
 0x120   : > { %v3694_v27 = vadd.f32 %v3608_v35, %v476_v25 }
 0x121   : > { %v591_v55 = vsel %vm515_vm1, %v3719_v42, 0.0 }
 0x122   : > { %532 = vadd.xlane.f32.xlu1 %v531_v28  ;;  %v2908_v30 = vpop.f32.mrb[26].mxu0  ;;  %v588_v0 = vsel %vm515_vm1, %v3694_v27, 0.0 }
 0x123   : > { %577 = vadd.xlane.f32.xlu0 %v576_v26  ;;  %v3704_v32 = vadd.f32 %v2908_v30, %v3608_v35  ;;  %v486_v33 = vpop.f32.mrb[27].mxu0 }
 0x124   : > { %v3710_v36 = vadd.f32 %v3608_v35, %v486_v33 }
 0x125   : > { %v597_v4 = vsel %vm515_vm1, %v3704_v32, 0.0 }
 0x126   : > { %586 = vadd.xlane.f32.xlu1 %v585_v31  ;;  %v2911_v41 = vpop.f32.mrb[28].mxu0  ;;  %v594_v48 = vsel %vm515_vm1, %v3710_v36, 0.0 }
 0x127   : > { %529 = vadd.xlane.f32.xlu0 %v528_v40  ;;  %v3722_v43 = vadd.f32 %v2911_v41, %v3608_v35  ;;  %v496_v44 = vpop.f32.mrb[29].mxu0 }
 0x128   : > { %v3727_v49 = vadd.f32 %v3608_v35, %v496_v44 }
 0x129   : > { %v603_v9 = vsel %vm515_vm1, %v3722_v43, 0.0 }
 0x12a   : > { %538 = vadd.xlane.f32.xlu1 %v537_v46  ;;  %v2914_v53 = vpop.f32.mrb[30].mxu0  ;;  %v600_v11 = vsel %vm515_vm1, %v3727_v49, 0.0 }
 0x12b   : > { %583 = vadd.xlane.f32.xlu0 %v582_v45  ;;  %v3738_v57 = vadd.f32 %v2914_v53, %v3608_v35  ;;  %v506_v59 = vpop.f32.mrb[31].mxu0 }
 0x12c   : > { %v3741_v61 = vadd.f32 %v3608_v35, %v506_v59  ;;  %v540_v35 = vsel %vm515_vm1, %v3627_v50, 0.0 }
 0x12d   : > { %v609_v14 = vsel %vm515_vm1, %v3738_v57, 0.0 }
 0x12e   : > { %592 = vadd.xlane.f32.xlu1 %v591_v55  ;;  %v606_v17 = vsel %vm515_vm1, %v3741_v61, 0.0 }
 0x12f   : > { %535 = vadd.xlane.f32.xlu0 %v534_v47 }
 0x132   : > { %544 = vadd.xlane.f32.xlu1 %v543_v3 }
 0x133   : > { %589 = vadd.xlane.f32.xlu0 %v588_v0 }
 0x136   : > { %598 = vadd.xlane.f32.xlu1 %v597_v4 }
 0x137   : > { %541 = vadd.xlane.f32.xlu0 %v540_v35 }
 0x13a   : > { %550 = vadd.xlane.f32.xlu1 %v549_v6 }
 0x13b   : > { %595 = vadd.xlane.f32.xlu0 %v594_v48 }
 0x13e   : > { %604 = vadd.xlane.f32.xlu1 %v603_v9 }
 0x13f   : > { %547 = vadd.xlane.f32.xlu0 %v546_v10 }
 0x142   : > { %556 = vadd.xlane.f32.xlu1 %v555_v13 }
 0x143   : > { %601 = vadd.xlane.f32.xlu0 %v600_v11 }
 0x146   : > { %610 = vadd.xlane.f32.xlu1 %v609_v14 }
 0x147   : > { %553 = vadd.xlane.f32.xlu0 %v552_v15 }
 0x14a   : > { %562 = vadd.xlane.f32.xlu1 %v561_v18 }
 0x14b   : > { %607 = vadd.xlane.f32.xlu0 %v606_v17 }
 0x14f   : > { %559 = vadd.xlane.f32.xlu0 %v558_v19 }
 0x180   : > { %v518_v22 = vpop.xlane.xlu1 %517 }
 0x181   : > { %v613_v23 = vmul.f32 0.03125, %v518_v22 }
 0x183   : > { %v3780_v30 = vsub.f32 %v3611_v38, %v613_v23 }
 0x184   : > { %v521_v25 = vpop.xlane.xlu1 %520 }
 0x185   : > { %v614_v31 = vmul.f32 0.03125, %v521_v25  ;;  %v677_v53 = vmul.f32 %v3780_v30, %v3780_v30 }
 0x187   : > { %v3788_v46 = vsub.f32 %v3614_v39, %v614_v31  ;;  %v709_v4 = vsel %vm515_vm1, %v677_v53, 0.0 }
 0x189   : > { %v678_v39 = vmul.f32 %v3788_v46, %v3788_v46 }
 0x18b   : > { %v712_v15 = vsel %vm515_vm1, %v678_v39, 0.0 }
 0x1a0   : > { %v566_v26 = vpop.xlane.xlu0 %565 }
 0x1a1   : > { %v629_v28 = vmul.f32 0.03125, %v566_v26 }
 0x1a3   : > { %v3783_v33 = vsub.f32 %v3648_v1, %v629_v28  ;;  %v575_v40 = vpop.xlane.xlu1 %574 }
 0x1a4   : > { %v569_v41 = vpop.xlane.xlu0 %568  ;;  %v632_v55 = vmul.f32 0.03125, %v575_v40 }
 0x1a5   : > { %v630_v44 = vmul.f32 0.03125, %v569_v41  ;;  %v693_v45 = vmul.f32 %v3783_v33, %v3783_v33 }
 0x1a6   : > { %v3802_v35 = vsub.f32 %v3656_v5, %v632_v55 }
 0x1a7   : > { %v3793_v38 = vsub.f32 %v3651_v2, %v630_v44  ;;  %v527_v59 = vpop.xlane.xlu1 %526  ;;  %v757_v1 = vsel %vm515_vm1, %v693_v45, 0.0 }
 0x1a8   : > { %v572_v47 = vpop.xlane.xlu0 %571  ;;  %758 = vadd.xlane.f32.xlu0 %v757_v1  ;;  %v616_v48 = vmul.f32 0.03125, %v527_v59  ;;  %v696_v19 = vmul.f32 %v3802_v35, %v3802_v35 }
 0x1a9   : > { %v631_v0 = vmul.f32 0.03125, %v572_v47  ;;  %v694_v3 = vmul.f32 %v3793_v38, %v3793_v38 }
 0x1aa   : > { %v3812_v5 = vsub.f32 %v3662_v8, %v616_v48  ;;  %v766_v40 = vsel %vm515_vm1, %v696_v19, 0.0 }
 0x1ab   : > { %v3805_v2 = vsub.f32 %v3659_v7, %v631_v0  ;;  %v581_v6 = vpop.xlane.xlu1 %580  ;;  %v760_v9 = vsel %vm515_vm1, %v694_v3, 0.0 }
 0x1ac   : > { %v524_v10 = vpop.xlane.xlu0 %523  ;;  %761 = vadd.xlane.f32.xlu1 %v760_v9  ;;  %710 = vadd.xlane.f32.xlu0 %v709_v4  ;;  %v634_v14 = vmul.f32 0.03125, %v581_v6  ;;  %v680_v41 = vmul.f32 %v3812_v5, %v3812_v5 }
 0x1ad   : > { %v615_v11 = vmul.f32 0.03125, %v524_v10  ;;  %v695_v13 = vmul.f32 %v3805_v2, %v3805_v2 }
 0x1ae   : > { %v3823_v26 = vsub.f32 %v3669_v12, %v634_v14  ;;  %v718_v0 = vsel %vm515_vm1, %v680_v41, 0.0 }
 0x1af   : > { %v3815_v17 = vsub.f32 %v3676_v16, %v615_v11  ;;  %v533_v7 = vpop.xlane.xlu1 %532  ;;  %v763_v18 = vsel %vm515_vm1, %v695_v13, 0.0 }
 0x1b0   : > { %v578_v22 = vpop.xlane.xlu0 %577  ;;  %764 = vadd.xlane.f32.xlu0 %v763_v18  ;;  %713 = vadd.xlane.f32.xlu1 %v712_v15  ;;  %v618_v8 = vmul.f32 0.03125, %v533_v7 }
 0x1b1   : > { %v633_v23 = vmul.f32 0.03125, %v578_v22  ;;  %v679_v25 = vmul.f32 %v3815_v17, %v3815_v17 }
 0x1b2   : > { %v3835_v53 = vsub.f32 %v3684_v21, %v618_v8 }
 0x1b3   : > { %v3826_v16 = vsub.f32 %v3681_v20, %v633_v23  ;;  %v587_v28 = vpop.xlane.xlu1 %586  ;;  %v715_v31 = vsel %vm515_vm1, %v679_v25, 0.0  ;;  %v698_v20 = vmul.f32 %v3823_v26, %v3823_v26 }
 0x1b4   : > { %v530_v44 = vpop.xlane.xlu0 %529  ;;  %716 = vadd.xlane.f32.xlu0 %v715_v31  ;;  %767 = vadd.xlane.f32.xlu1 %v766_v40  ;;  %v636_v55 = vmul.f32 0.03125, %v587_v28  ;;  %v682_v48 = vmul.f32 %v3835_v53, %v3835_v53 }
 0x1b5   : > { %v617_v45 = vmul.f32 0.03125, %v530_v44  ;;  %v697_v12 = vmul.f32 %v3826_v16, %v3826_v16  ;;  %v772_v39 = vsel %vm515_vm1, %v698_v20, 0.0 }
 0x1b6   : > { %v724_v18 = vsel %vm515_vm1, %v682_v48, 0.0 }
 0x1b7   : > { %v3840_v59 = vsub.f32 %v3699_v29, %v617_v45  ;;  %v539_v1 = vpop.xlane.xlu1 %538  ;;  %v769_v47 = vsel %vm515_vm1, %v697_v12, 0.0  ;;  %v3850_v29 = vsub.f32 %v3689_v24, %v636_v55 }
 0x1b8   : > { %v584_v3 = vpop.xlane.xlu0 %583  ;;  %770 = vadd.xlane.f32.xlu0 %v769_v47  ;;  %719 = vadd.xlane.f32.xlu1 %v718_v0  ;;  %v620_v6 = vmul.f32 0.03125, %v539_v1 }
 0x1b9   : > { %v635_v4 = vmul.f32 0.03125, %v584_v3  ;;  %v681_v21 = vmul.f32 %v3840_v59, %v3840_v59  ;;  %v700_v23 = vmul.f32 %v3850_v29, %v3850_v29 }
 0x1ba   : > { %v3860_v24 = vsub.f32 %v3714_v37, %v620_v6 }
 0x1bb   : > { %v3853_v9 = vsub.f32 %v3707_v34, %v635_v4  ;;  %v593_v10 = vpop.xlane.xlu1 %592  ;;  %v721_v11 = vsel %vm515_vm1, %v681_v21, 0.0  ;;  %v778_v44 = vsel %vm515_vm1, %v700_v23, 0.0 }
 0x1bc   : > { %v536_v13 = vpop.xlane.xlu0 %535  ;;  %722 = vadd.xlane.f32.xlu0 %v721_v11  ;;  %773 = vadd.xlane.f32.xlu1 %v772_v39  ;;  %v638_v7 = vmul.f32 0.03125, %v593_v10  ;;  %v684_v45 = vmul.f32 %v3860_v24, %v3860_v24 }
 0x1bd   : > { %v619_v14 = vmul.f32 0.03125, %v536_v13  ;;  %v699_v15 = vmul.f32 %v3853_v9, %v3853_v9 }
 0x1be   : > { %v3871_v31 = vsub.f32 %v3719_v42, %v638_v7  ;;  %v730_v4 = vsel %vm515_vm1, %v684_v45, 0.0 }
 0x1bf   : > { %v3863_v19 = vsub.f32 %v3733_v51, %v619_v14  ;;  %v545_v34 = vpop.xlane.xlu1 %544  ;;  %v775_v22 = vsel %vm515_vm1, %v699_v15, 0.0 }
 0x1c0   : > { %v590_v25 = vpop.xlane.xlu0 %589  ;;  %776 = vadd.xlane.f32.xlu0 %v775_v22  ;;  %725 = vadd.xlane.f32.xlu1 %v724_v18  ;;  %v622_v37 = vmul.f32 0.03125, %v545_v34 }
 0x1c1   : > { %v637_v8 = vmul.f32 0.03125, %v590_v25  ;;  %v683_v28 = vmul.f32 %v3863_v19, %v3863_v19 }
 0x1c2   : > { %v3883_v55 = vsub.f32 %v3745_v63, %v622_v37 }
 0x1c3   : > { %v3874_v51 = vsub.f32 %v3694_v27, %v637_v8  ;;  %v599_v40 = vpop.xlane.xlu1 %598  ;;  %v727_v41 = vsel %vm515_vm1, %v683_v28, 0.0  ;;  %v702_v27 = vmul.f32 %v3871_v31, %v3871_v31 }
 0x1c4   : > { %v542_v12 = vpop.xlane.xlu0 %541  ;;  %728 = vadd.xlane.f32.xlu0 %v727_v41  ;;  %779 = vadd.xlane.f32.xlu1 %v778_v44  ;;  %v640_v1 = vmul.f32 0.03125, %v599_v40  ;;  %v686_v6 = vmul.f32 %v3883_v55, %v3883_v55 }
 0x1c5   : > { %v621_v20 = vmul.f32 0.03125, %v542_v12  ;;  %v701_v42 = vmul.f32 %v3874_v51, %v3874_v51  ;;  %v784_v48 = vsel %vm515_vm1, %v702_v27, 0.0 }
 0x1c6   : > { %v736_v22 = vsel %vm515_vm1, %v686_v6, 0.0 }
 0x1c7   : > { %v3888_v47 = vsub.f32 %v3627_v50, %v621_v20  ;;  %v551_v0 = vpop.xlane.xlu1 %550  ;;  %v781_v3 = vsel %vm515_vm1, %v701_v42, 0.0  ;;  %v3898_v50 = vsub.f32 %v3704_v32, %v640_v1 }
 0x1c8   : > { %v596_v21 = vpop.xlane.xlu0 %595  ;;  %782 = vadd.xlane.f32.xlu0 %v781_v3  ;;  %731 = vadd.xlane.f32.xlu1 %v730_v4  ;;  %v624_v10 = vmul.f32 0.03125, %v551_v0 }
 0x1c9   : > { %v639_v39 = vmul.f32 0.03125, %v596_v21  ;;  %v685_v63 = vmul.f32 %v3888_v47, %v3888_v47  ;;  %v704_v8 = vmul.f32 %v3898_v50, %v3898_v50 }
 0x1ca   : > { %v3908_v32 = vsub.f32 %v3630_v52, %v624_v10 }
 0x1cb   : > { %v3901_v11 = vsub.f32 %v3710_v36, %v639_v39  ;;  %v605_v13 = vpop.xlane.xlu1 %604  ;;  %v733_v14 = vsel %vm515_vm1, %v685_v63, 0.0  ;;  %v790_v12 = vsel %vm515_vm1, %v704_v8, 0.0 }
 0x1cc   : > { %v548_v15 = vpop.xlane.xlu0 %547  ;;  %734 = vadd.xlane.f32.xlu0 %v733_v14  ;;  %785 = vadd.xlane.f32.xlu1 %v784_v48  ;;  %v642_v34 = vmul.f32 0.03125, %v605_v13  ;;  %v688_v20 = vmul.f32 %v3908_v32, %v3908_v32 }
 0x1cd   : > { %v623_v7 = vmul.f32 0.03125, %v548_v15  ;;  %v703_v18 = vmul.f32 %v3901_v11, %v3901_v11 }
 0x1ce   : > { %v3919_v41 = vsub.f32 %v3722_v43, %v642_v34  ;;  %v742_v21 = vsel %vm515_vm1, %v688_v20, 0.0 }
 0x1cf   : > { %v3911_v23 = vsub.f32 %v3633_v54, %v623_v7  ;;  %v557_v36 = vpop.xlane.xlu1 %556  ;;  %v787_v25 = vsel %vm515_vm1, %v703_v18, 0.0 }
 0x1d0   : > { %v602_v28 = vpop.xlane.xlu0 %601  ;;  %788 = vadd.xlane.f32.xlu0 %v787_v25  ;;  %737 = vadd.xlane.f32.xlu1 %v736_v22  ;;  %v626_v52 = vmul.f32 0.03125, %v557_v36 }
 0x1d1   : > { %v641_v37 = vmul.f32 0.03125, %v602_v28  ;;  %v687_v40 = vmul.f32 %v3911_v23, %v3911_v23 }
 0x1d2   : > { %v3931_v1 = vsub.f32 %v3636_v56, %v626_v52 }
 0x1d3   : > { %v3922_v54 = vsub.f32 %v3727_v49, %v641_v37  ;;  %v611_v44 = vpop.xlane.xlu1 %610  ;;  %v739_v45 = vsel %vm515_vm1, %v687_v40, 0.0  ;;  %v706_v49 = vmul.f32 %v3919_v41, %v3919_v41 }
 0x1d4   : > { %v554_v42 = vpop.xlane.xlu0 %553  ;;  %740 = vadd.xlane.f32.xlu0 %v739_v45  ;;  %791 = vadd.xlane.f32.xlu1 %v790_v12  ;;  %v644_v0 = vmul.f32 0.03125, %v611_v44  ;;  %v690_v10 = vmul.f32 %v3931_v1, %v3931_v1 }
 0x1d5   : > { %v625_v27 = vmul.f32 0.03125, %v554_v42  ;;  %v705_v43 = vmul.f32 %v3922_v54, %v3922_v54  ;;  %v796_v6 = vsel %vm515_vm1, %v706_v49, 0.0 }
 0x1d6   : > { %v748_v22 = vsel %vm515_vm1, %v690_v10, 0.0 }
 0x1d7   : > { %v3936_v3 = vsub.f32 %v3639_v58, %v625_v27  ;;  %v793_v4 = vsel %vm515_vm1, %v705_v43, 0.0  ;;  %v563_v39 = vpop.xlane.xlu1 %562  ;;  %v3946_v58 = vsub.f32 %v3738_v57, %v644_v0 }
 0x1d8   : > { %v608_v63 = vpop.xlane.xlu0 %607  ;;  %794 = vadd.xlane.f32.xlu0 %v793_v4  ;;  %743 = vadd.xlane.f32.xlu1 %v742_v21  ;;  %v628_v13 = vmul.f32 0.03125, %v563_v39 }
 0x1d9   : > { %v643_v48 = vmul.f32 0.03125, %v608_v63  ;;  %v689_v56 = vmul.f32 %v3936_v3, %v3936_v3  ;;  %v708_v25 = vmul.f32 %v3946_v58, %v3946_v58 }
 0x1da   : > { %v3956_v36 = vsub.f32 %v3642_v60, %v628_v13 }
 0x1db   : > { %v3949_v14 = vsub.f32 %v3741_v61, %v643_v48  ;;  %v745_v15 = vsel %vm515_vm1, %v689_v56, 0.0  ;;  %v802_v37 = vsel %vm515_vm1, %v708_v25, 0.0 }
 0x1dc   : > { %v560_v7 = vpop.xlane.xlu0 %559  ;;  %746 = vadd.xlane.f32.xlu0 %v745_v15  ;;  %797 = vadd.xlane.f32.xlu1 %v796_v6  ;;  %v692_v60 = vmul.f32 %v3956_v36, %v3956_v36 }
 0x1dd   : > { %v627_v18 = vmul.f32 0.03125, %v560_v7  ;;  %v707_v34 = vmul.f32 %v3949_v14, %v3949_v14 }
 0x1df   : > { %v3959_v57 = vsub.f32 %v3645_v62, %v627_v18  ;;  %v799_v61 = vsel %vm515_vm1, %v707_v34, 0.0  ;;  %v754_v62 = vsel %vm515_vm1, %v692_v60, 0.0  ;;  %v3974_v18 = vld [vmem:[%s4943_s1 + $0x11] ss:$0 sm:$0xff] }
 0x1e0   : > { %800 = vadd.xlane.f32.xlu0 %v799_v61  ;;  %749 = vadd.xlane.f32.xlu1 %v748_v22 }
 0x1e1   : > { %v691_v8 = vmul.f32 %v3959_v57, %v3959_v57 }
 0x1e3   : > { %v751_v28 = vsel %vm515_vm1, %v691_v8, 0.0  ;;  %v3980_v8 = vld [vmem:[%s4943_s1 + $0x12] ss:$0 sm:$0xff] }
 0x1e4   : > { %752 = vadd.xlane.f32.xlu0 %v751_v28  ;;  %803 = vadd.xlane.f32.xlu1 %v802_v37 }
 0x1e8   : > { %755 = vadd.xlane.f32.xlu1 %v754_v62 }
 0x235   : > { %v759_v40 = vpop.xlane.xlu0 %758 }
 0x236   : > { %v821_v52 = vmul.f32 0.03125, %v759_v40 }
 0x238   : > { %v853_v44 = vadd.f32 1e-05, %v821_v52 }
 0x239   : > { %v711_v45 = vpop.xlane.xlu0 %710  ;;  %v762_v12 = vpop.xlane.xlu1 %761 }
 0x23a   : > { %3012 = vrsqrt.f32 %v853_v44  ;;  %v805_v20 = vmul.f32 0.03125, %v711_v45  ;;  %v822_v42 = vmul.f32 0.03125, %v762_v12 }
 0x23c   : > { %v837_v27 = vadd.f32 1e-05, %v805_v20  ;;  %v854_v43 = vadd.f32 1e-05, %v822_v42 }
 0x23d   : > { %v765_v49 = vpop.xlane.xlu0 %764  ;;  %v714_v0 = vpop.xlane.xlu1 %713 }
 0x23e   : > { %3014 = vrsqrt.f32 %v837_v27  ;;  %v823_v4 = vmul.f32 0.03125, %v765_v49  ;;  %v806_v21 = vmul.f32 0.03125, %v714_v0 }
 0x23f   : > { %3016 = vrsqrt.f32 %v854_v43 }
 0x240   : > { %v855_v39 = vadd.f32 1e-05, %v823_v4  ;;  %v838_v63 = vadd.f32 1e-05, %v806_v21 }
 0x241   : > { %v717_v48 = vpop.xlane.xlu0 %716  ;;  %v768_v56 = vpop.xlane.xlu1 %767 }
 0x242   : > { %3018 = vrsqrt.f32 %v855_v39  ;;  %v807_v6 = vmul.f32 0.03125, %v717_v48  ;;  %v824_v10 = vmul.f32 0.03125, %v768_v56 }
 0x243   : > { %3020 = vrsqrt.f32 %v838_v63 }
 0x244   : > { %v3013_v13 = vpop.eup %3012  ;;  %v839_v15 = vadd.f32 1e-05, %v807_v6  ;;  %v856_v7 = vadd.f32 1e-05, %v824_v10 }
 0x245   : > { %v771_v34 = vpop.xlane.xlu0 %770  ;;  %v720_v22 = vpop.xlane.xlu1 %719  ;;  %v917_v61 = vmul.f32 %v3013_v13, %v3783_v33 }
 0x246   : > { %3022 = vrsqrt.f32 %v839_v15  ;;  %v808_v25 = vmul.f32 0.03125, %v720_v22  ;;  %v825_v60 = vmul.f32 0.03125, %v771_v34 }
 0x247   : > { %3024 = vrsqrt.f32 %v856_v7  ;;  %v953_v28 = vmul.f32 %v3974_v18, %v917_v61 }
 0x248   : > { %v3015_v37 = vpop.eup %3014  ;;  %v840_v62 = vadd.f32 1e-05, %v808_v25  ;;  %v857_v0 = vadd.f32 1e-05, %v825_v60 }
 0x249   : > { %v3017_v40 = vpop.eup %3016  ;;  %v723_v52 = vpop.xlane.xlu0 %722  ;;  %v901_v45 = vmul.f32 %v3015_v37, %v3780_v30  ;;  %v989_v33 = vadd.f32 %v3980_v8, %v953_v28 }
 0x24a   : > { %v774_v44 = vpop.xlane.xlu1 %773  ;;  %v809_v12 = vmul.f32 0.03125, %v723_v52  ;;  %v918_v42 = vmul.f32 %v3017_v40, %v3793_v38  ;;  %3026 = vrsqrt.f32 %v840_v62 }
 0x24b   : > { %v826_v20 = vmul.f32 0.03125, %v774_v44  ;;  %v937_v27 = vmul.f32 %v3974_v18, %v901_v45  ;;  %v1053_v43 = vmul.f32 0.70710677, %v989_v33  ;;  %v1021_v62 = vmul.f32 0.5, %v989_v33 }
 0x24c   : > { %v3019_v49 = vpop.eup %3018  ;;  %v841_v4 = vadd.f32 1e-05, %v809_v12  ;;  %v954_v21 = vmul.f32 %v3974_v18, %v918_v42 }
 0x24d   : > { %v3021_v39 = vpop.eup %3020  ;;  %v858_v63 = vadd.f32 1e-05, %v826_v20  ;;  %v777_v48 = vpop.xlane.xlu0 %776  ;;  %v973_v30 = vadd.f32 %v3980_v8, %v937_v27  ;;  %3028 = verf.f32 %v1053_v43  ;;  %v919_v6 = vmul.f32 %v3019_v49, %v3805_v2 }
 0x24e   : > { %v726_v56 = vpop.xlane.xlu1 %725  ;;  %3030 = vrsqrt.f32 %v841_v4  ;;  %v827_v38 = vmul.f32 0.03125, %v777_v48  ;;  %v902_v13 = vmul.f32 %v3021_v39, %v3788_v46  ;;  %v990_v7 = vadd.f32 %v3980_v8, %v954_v21 }
 0x24f   : > { %v810_v10 = vmul.f32 0.03125, %v726_v56  ;;  %v1037_v15 = vmul.f32 0.70710677, %v973_v30  ;;  %3032 = vrsqrt.f32 %v857_v0  ;;  %v955_v40 = vmul.f32 %v3974_v18, %v919_v6 }
 0x250   : > { %v3023_v34 = vpop.eup %3022  ;;  %v859_v22 = vadd.f32 1e-05, %v827_v38  ;;  %v938_v25 = vmul.f32 %v3974_v18, %v902_v13  ;;  %v1054_v12 = vmul.f32 0.70710677, %v990_v7  ;;  %v1005_v27 = vmul.f32 0.5, %v973_v30 }
 0x251   : > { %v842_v61 = vadd.f32 1e-05, %v810_v10  ;;  %v3025_v28 = vpop.eup %3024  ;;  %v729_v37 = vpop.xlane.xlu0 %728  ;;  %3034 = verf.f32 %v1037_v15  ;;  %v903_v2 = vmul.f32 %v3023_v34, %v3815_v17  ;;  %v3998_v43 = vmul.f32 0.5, %v990_v7 }
 0x252   : > { %v780_v60 = vpop.xlane.xlu1 %779  ;;  %3036 = vrsqrt.f32 %v858_v63  ;;  %v811_v46 = vmul.f32 0.03125, %v729_v37  ;;  %v974_v44 = vadd.f32 %v3980_v8, %v938_v25  ;;  %v920_v20 = vmul.f32 %v3025_v28, %v3802_v35 }
 0x253   : > { %v828_v52 = vmul.f32 0.03125, %v780_v60  ;;  %3038 = vrsqrt.f32 %v842_v61  ;;  %v939_v45 = vmul.f32 %v3974_v18, %v903_v2  ;;  %v991_v39 = vadd.f32 %v3980_v8, %v955_v40 }
 0x254   : > { %3040 = vrsqrt.f32 %v859_v22  ;;  %v843_v42 = vadd.f32 1e-05, %v811_v46  ;;  %v3027_v17 = vpop.eup %3026  ;;  %v1038_v4 = vmul.f32 0.70710677, %v974_v44  ;;  %v4003_v6 = vmul.f32 0.5, %v974_v44 }
 0x255   : > { %v860_v33 = vadd.f32 1e-05, %v828_v52  ;;  %v783_v49 = vpop.xlane.xlu0 %782  ;;  %v975_v21 = vadd.f32 %v3980_v8, %v939_v45  ;;  %v904_v56 = vmul.f32 %v3027_v17, %v3812_v5  ;;  %v956_v38 = vmul.f32 %v3974_v18, %v920_v20 }
 0x256   : > { %v732_v0 = vpop.xlane.xlu1 %731  ;;  %3042 = vrsqrt.f32 %v843_v42  ;;  %v829_v63 = vmul.f32 0.03125, %v783_v49  ;;  %v4014_v2 = vmul.f32 0.5, %v991_v39  ;;  %v1055_v40 = vmul.f32 0.70710677, %v991_v39 }
 0x257   : > { %v812_v48 = vmul.f32 0.03125, %v732_v0  ;;  %v3029_v35 = vpop.eup %3028  ;;  %v1039_v30 = vmul.f32 0.70710677, %v975_v21  ;;  %3044 = verf.f32 %v1054_v12  ;;  %v940_v7 = vmul.f32 %v3974_v18, %v904_v56 }
 0x258   : > { %v3031_v10 = vpop.eup %3030  ;;  %v861_v13 = vadd.f32 1e-05, %v829_v63  ;;  %3046 = verf.f32 %v1038_v4  ;;  %v1117_v25 = vadd.f32 1.0, %v3029_v35  ;;  %v4009_v5 = vadd.f32 %v3980_v8, %v956_v38  ;;  %v4022_v4 = vld [vmem:[%s4943_s1 + $0x13] ss:$0 sm:$0xff] }
 0x259   : > { %v844_v15 = vadd.f32 1e-05, %v812_v48  ;;  %v735_v34 = vpop.xlane.xlu0 %734  ;;  %3048 = verf.f32 %v1039_v30  ;;  %v905_v61 = vmul.f32 %v3031_v10, %v3840_v59  ;;  %v4011_v28 = vpop.eup %3032  ;;  %v976_v60 = vadd.f32 %v3980_v8, %v940_v7 }
 0x25a   : > { %v786_v22 = vpop.xlane.xlu1 %785  ;;  %v813_v37 = vmul.f32 0.03125, %v735_v34  ;;  %3050 = vrsqrt.f32 %v860_v33  ;;  %v1007_v44 = vmul.f32 0.5, %v975_v21  ;;  %v1149_v42 = vmul.f32 %v1117_v25, %v1021_v62 }
 0x25b   : > { %v3035_v46 = vpop.eup %3034  ;;  %v830_v52 = vmul.f32 0.03125, %v786_v22  ;;  %v941_v45 = vmul.f32 %v3974_v18, %v905_v61  ;;  %3052 = vrsqrt.f32 %v844_v15  ;;  %v1040_v33 = vmul.f32 0.70710677, %v976_v60 }
 0x25c   : > { %v4017_v12 = vpop.eup %3036  ;;  %v845_v59 = vadd.f32 1e-05, %v813_v37  ;;  %v1101_v20 = vadd.f32 1.0, %v3035_v46  ;;  %3054 = vrsqrt.f32 %v861_v13  ;;  %v4026_v39 = vmul.f32 0.5, %v4009_v5 }
 0x25d   : > { %v3039_v17 = vpop.eup %3038  ;;  %v789_v49 = vpop.xlane.xlu0 %788  ;;  %v977_v21 = vadd.f32 %v3980_v8, %v941_v45  ;;  %v862_v35 = vadd.f32 1e-05, %v830_v52  ;;  %v4032_v15 = vmul.f32 0.5, %v976_v60  ;;  %v1185_v7 = vmul.f32 %v4022_v4, %v1149_v42 }
 0x25e   : > { %v738_v0 = vpop.xlane.xlu1 %737  ;;  %v4028_v63 = vpop.eup %3040  ;;  %3056 = vrsqrt.f32 %v845_v59  ;;  %v831_v48 = vmul.f32 0.03125, %v789_v49  ;;  %v1133_v56 = vmul.f32 %v1101_v20, %v1005_v27  ;;  %v906_v38 = vmul.f32 %v3039_v17, %v3835_v53 }
 0x25f   : > { %v814_v62 = vmul.f32 0.03125, %v738_v0  ;;  %v1041_v30 = vmul.f32 0.70710677, %v977_v21  ;;  %3058 = verf.f32 %v1055_v40  ;;  %v1009_v0 = vmul.f32 0.5, %v977_v21 }
 0x260   : > { %v3043_v10 = vpop.eup %3042  ;;  %v1169_v13 = vmul.f32 %v4022_v4, %v1133_v56  ;;  %3060 = verf.f32 %v1040_v33  ;;  %v863_v22 = vadd.f32 1e-05, %v831_v48  ;;  %v942_v27 = vmul.f32 %v3974_v18, %v906_v38 }
 0x261   : > { %v3045_v34 = vpop.eup %3044  ;;  %v741_v61 = vpop.xlane.xlu0 %740  ;;  %3062 = verf.f32 %v1041_v30  ;;  %v907_v37 = vmul.f32 %v3043_v10, %v3863_v19  ;;  %v846_v53 = vadd.f32 1e-05, %v814_v62  ;;  %v4041_v33 = vsel %vm515_vm1, %v1185_v7, 0.0 }
 0x262   : > { %v792_v25 = vpop.xlane.xlu1 %791  ;;  %v3047_v46 = vpop.eup %3046  ;;  %v815_v40 = vmul.f32 0.03125, %v741_v61  ;;  %v1201_v45 = vsel %vm515_vm1, %v1169_v13, 0.0  ;;  %3064 = vrsqrt.f32 %v862_v35  ;;  %v978_v20 = vadd.f32 %v3980_v8, %v942_v27 }
 0x263   : > { %v832_v52 = vmul.f32 0.03125, %v792_v25  ;;  %v3049_v60 = vpop.eup %3048  ;;  %1202 = vadd.xlane.f32.xlu0 %v1201_v45  ;;  %v1102_v59 = vadd.f32 1.0, %v3047_v46  ;;  %v943_v42 = vmul.f32 %v3974_v18, %v907_v37  ;;  %3066 = vrsqrt.f32 %v863_v22 }
 0x264   : > { %v847_v17 = vadd.f32 1e-05, %v815_v40  ;;  %v1103_v49 = vadd.f32 1.0, %v3049_v60  ;;  %v4043_v19 = vpop.eup %3050  ;;  %v1042_v35 = vmul.f32 0.70710677, %v978_v20  ;;  %3068 = vrsqrt.f32 %v846_v53 }
 0x265   : > { %v795_v48 = vpop.xlane.xlu0 %794  ;;  %v1134_v56 = vmul.f32 %v1102_v59, %v4003_v6  ;;  %v979_v30 = vadd.f32 %v3980_v8, %v943_v42  ;;  %v3053_v38 = vpop.eup %3052  ;;  %v864_v10 = vadd.f32 1e-05, %v832_v52  ;;  %v1118_v27 = vadd.f32 1.0, %v3045_v34 }
 0x266   : > { %v744_v62 = vpop.xlane.xlu1 %743  ;;  %v1135_v61 = vmul.f32 %v1103_v49, %v1007_v44  ;;  %v4047_v25 = vpop.eup %3054  ;;  %3070 = vrsqrt.f32 %v847_v17  ;;  %v833_v37 = vmul.f32 0.03125, %v795_v48  ;;  %v908_v44 = vmul.f32 %v3053_v38, %v3860_v24 }
 0x267   : > { %v816_v13 = vmul.f32 0.03125, %v744_v62  ;;  %v1170_v21 = vmul.f32 %v4022_v4, %v1134_v56  ;;  %v1043_v7 = vmul.f32 0.70710677, %v979_v30  ;;  %3072 = verf.f32 %v1042_v35 }
 0x268   : > { %v3057_v22 = vpop.eup %3056  ;;  %v1171_v6 = vmul.f32 %v4022_v4, %v1135_v61  ;;  %v1010_v49 = vmul.f32 0.5, %v978_v20  ;;  %v944_v56 = vmul.f32 %v3974_v18, %v908_v44 }
 0x269   : > { %v848_v46 = vadd.f32 1e-05, %v816_v13  ;;  %v3059_v40 = vpop.eup %3058  ;;  %v1204_v45 = vsel %vm515_vm1, %v1170_v21, 0.0  ;;  %v747_v53 = vpop.xlane.xlu0 %746  ;;  %3074 = verf.f32 %v1043_v7  ;;  %v909_v60 = vmul.f32 %v3057_v22, %v3888_v47 }
 0x26a   : > { %v798_v52 = vpop.xlane.xlu1 %797  ;;  %v3061_v59 = vpop.eup %3060  ;;  %1205 = vadd.xlane.f32.xlu1 %v1204_v45  ;;  %v817_v42 = vmul.f32 0.03125, %v747_v53  ;;  %v1207_v17 = vsel %vm515_vm1, %v1171_v6, 0.0  ;;  %3076 = vrsqrt.f32 %v864_v10  ;;  %v865_v13 = vadd.f32 1e-05, %v833_v37 }
 0x26b   : > { %v834_v34 = vmul.f32 0.03125, %v798_v52  ;;  %v3063_v48 = vpop.eup %3062  ;;  %1208 = vadd.xlane.f32.xlu0 %v1207_v17  ;;  %v1104_v62 = vadd.f32 1.0, %v3061_v59  ;;  %v945_v35 = vmul.f32 %v3974_v18, %v909_v60  ;;  %3078 = vrsqrt.f32 %v848_v46 }
 0x26c   : > { %v849_v24 = vadd.f32 1e-05, %v817_v42  ;;  %v1105_v38 = vadd.f32 1.0, %v3063_v48  ;;  %v4057_v47 = vpop.eup %3064  ;;  %v980_v20 = vadd.f32 %v3980_v8, %v944_v56  ;;  %v1011_v46 = vmul.f32 0.5, %v979_v30 }
 0x26d   : > { %v866_v61 = vadd.f32 1e-05, %v834_v34  ;;  %v801_v21 = vpop.xlane.xlu0 %800  ;;  %v1136_v22 = vmul.f32 %v1104_v62, %v4032_v15  ;;  %v981_v10 = vadd.f32 %v3980_v8, %v945_v35  ;;  %v4062_v52 = vpop.eup %3066  ;;  %v1150_v60 = vmul.f32 %v1118_v27, %v3998_v43 }
 0x26e   : > { %v750_v7 = vpop.xlane.xlu1 %749  ;;  %3080 = vrsqrt.f32 %v849_v24  ;;  %v835_v6 = vmul.f32 0.03125, %v801_v21  ;;  %v1137_v53 = vmul.f32 %v1105_v38, %v1009_v0  ;;  %v1044_v44 = vmul.f32 0.70710677, %v980_v20  ;;  %v3069_v59 = vpop.eup %3068 }
 0x26f   : > { %v818_v45 = vmul.f32 0.03125, %v750_v7  ;;  %v1172_v37 = vmul.f32 %v4022_v4, %v1136_v22  ;;  %3082 = vrsqrt.f32 %v865_v13  ;;  %v1119_v34 = vadd.f32 1.0, %v3059_v40 }
 0x270   : > { %v867_v42 = vadd.f32 1e-05, %v835_v6  ;;  %v1173_v15 = vmul.f32 %v4022_v4, %v1137_v53  ;;  %v3071_v17 = vpop.eup %3070  ;;  %3084 = verf.f32 %v1044_v44  ;;  %v1045_v35 = vmul.f32 0.70710677, %v981_v10 }
 0x271   : > { %v850_v48 = vadd.f32 1e-05, %v818_v45  ;;  %v1210_v62 = vsel %vm515_vm1, %v1172_v37, 0.0  ;;  %v753_v56 = vpop.xlane.xlu0 %752  ;;  %v3073_v24 = vpop.eup %3072  ;;  %3086 = vrsqrt.f32 %v866_v61  ;;  %v1012_v27 = vmul.f32 0.5, %v980_v20 }
 0x272   : > { %v804_v0 = vpop.xlane.xlu1 %803  ;;  %1211 = vadd.xlane.f32.xlu1 %v1210_v62  ;;  %v819_v30 = vmul.f32 0.03125, %v753_v56  ;;  %v1213_v43 = vsel %vm515_vm1, %v1173_v15, 0.0  ;;  %3088 = vrsqrt.f32 %v867_v42  ;;  %v1106_v38 = vadd.f32 1.0, %v3073_v24 }
 0x273   : > { %v3075_v13 = vpop.eup %3074  ;;  %1214 = vadd.xlane.f32.xlu0 %v1213_v43  ;;  %v4069_v40 = vmul.f32 0.5, %v981_v10  ;;  %v1186_v21 = vmul.f32 %v4022_v4, %v1150_v60  ;;  %v836_v22 = vmul.f32 0.03125, %v804_v0  ;;  %3090 = verf.f32 %v1045_v35 }
 0x274   : > { %v851_v7 = vadd.f32 1e-05, %v819_v30  ;;  %v1107_v6 = vadd.f32 1.0, %v3075_v13  ;;  %v4072_v45 = vpop.eup %3076  ;;  %3092 = vrsqrt.f32 %v850_v48  ;;  %v1138_v53 = vmul.f32 %v1106_v38, %v1010_v49 }
 0x275   : > { %v910_v37 = vmul.f32 %v3069_v59, %v3883_v55  ;;  %v911_v20 = vmul.f32 %v3071_v17, %v3911_v23  ;;  %v3079_v44 = vpop.eup %3078  ;;  %v1056_v15 = vmul.f32 0.70710677, %v4009_v5  ;;  %v4079_v62 = vsel %vm515_vm1, %v1186_v21, 0.0 }
 0x276   : > { %v756_v61 = vpop.xlane.xlu1 %755  ;;  %3094 = vrsqrt.f32 %v851_v7  ;;  %v1139_v10 = vmul.f32 %v1107_v6, %v1011_v46  ;;  %v1174_v60 = vmul.f32 %v4022_v4, %v1138_v53  ;;  %v1151_v56 = vmul.f32 %v1119_v34, %v4014_v2 }
 0x277   : > { %v820_v42 = vmul.f32 0.03125, %v756_v61  ;;  %v946_v48 = vmul.f32 %v3974_v18, %v910_v37  ;;  %v947_v23 = vmul.f32 %v3974_v18, %v911_v20  ;;  %3096 = verf.f32 %v1056_v15 }
 0x278   : > { %v3081_v49 = vpop.eup %3080  ;;  %v1175_v55 = vmul.f32 %v4022_v4, %v1139_v10  ;;  %v1216_v46 = vsel %vm515_vm1, %v1174_v60, 0.0  ;;  %v921_v59 = vmul.f32 %v4011_v28, %v3826_v16  ;;  %v912_v17 = vmul.f32 %v3079_v44, %v3908_v32 }
 0x279   : > { %v852_v0 = vadd.f32 1e-05, %v820_v42  ;;  %v982_v5 = vadd.f32 %v3980_v8, %v946_v48  ;;  %v4090_v35 = vpop.eup %3082  ;;  %v868_v2 = vadd.f32 1e-05, %v836_v22  ;;  %1217 = vadd.xlane.f32.xlu1 %v1216_v46  ;;  %v983_v24 = vadd.f32 %v3980_v8, %v947_v23 }
 0x27a   : > { %v1219_v34 = vsel %vm515_vm1, %v1175_v55, 0.0  ;;  %v913_v30 = vmul.f32 %v3081_v49, %v3936_v3  ;;  %v3085_v43 = vpop.eup %3084  ;;  %v1187_v13 = vmul.f32 %v4022_v4, %v1151_v56  ;;  %v957_v21 = vmul.f32 %v3974_v18, %v921_v59 }
 0x27b   : > { %1220 = vadd.xlane.f32.xlu0 %v1219_v34  ;;  %v1046_v38 = vmul.f32 0.70710677, %v982_v5  ;;  %v948_v16 = vmul.f32 %v3974_v18, %v912_v17  ;;  %v4098_v32 = vpop.eup %3086  ;;  %3098 = vrsqrt.f32 %v852_v0  ;;  %v1108_v28 = vadd.f32 1.0, %v3085_v43 }
 0x27c   : > { %v1047_v7 = vmul.f32 0.70710677, %v983_v24  ;;  %v949_v22 = vmul.f32 %v3974_v18, %v913_v30  ;;  %v4101_v6 = vpop.eup %3088  ;;  %v993_v3 = vadd.f32 %v3980_v8, %v957_v21  ;;  %v922_v53 = vmul.f32 %v4017_v12, %v3823_v26 }
 0x27d   : > { %3100 = verf.f32 %v1046_v38  ;;  %v984_v61 = vadd.f32 %v3980_v8, %v948_v16  ;;  %v3091_v37 = vpop.eup %3090  ;;  %v1140_v20 = vmul.f32 %v1108_v28, %v1012_v27  ;;  %v923_v42 = vmul.f32 %v4028_v63, %v3853_v9 }
 0x27e   : > { %3102 = verf.f32 %v1047_v7  ;;  %v985_v44 = vadd.f32 %v3980_v8, %v949_v22  ;;  %v3093_v10 = vpop.eup %3092  ;;  %v1109_v15 = vadd.f32 1.0, %v3091_v37  ;;  %v1255_v60 = vsel %vm515_vm1, %v1187_v13, 0.0 }
 0x27f   : > { %3104 = vrsqrt.f32 %v868_v2  ;;  %1250 = vadd.xlane.f32.xlu0 %v4041_v33  ;;  %v1057_v56 = vmul.f32 0.70710677, %v993_v3  ;;  %v1176_v49 = vmul.f32 %v4022_v4, %v1140_v20  ;;  %v1014_v26 = vmul.f32 0.5, %v982_v5 }
 0x280   : > { %v3095_v48 = vpop.eup %3094  ;;  %v1048_v12 = vmul.f32 0.70710677, %v984_v61  ;;  %v1049_v27 = vmul.f32 0.70710677, %v985_v44  ;;  %v1141_v0 = vmul.f32 %v1109_v15, %v4069_v40  ;;  %v958_v55 = vmul.f32 %v3974_v18, %v922_v53 }
 0x281   : > { %3106 = verf.f32 %v1057_v56  ;;  %v959_v9 = vmul.f32 %v3974_v18, %v923_v42  ;;  %v3097_v63 = vpop.eup %3096  ;;  %v1222_v33 = vsel %vm515_vm1, %v1176_v49, 0.0  ;;  %v914_v23 = vmul.f32 %v3093_v10, %v3931_v1 }
 0x282   : > { %3108 = verf.f32 %v1048_v12  ;;  %v915_v46 = vmul.f32 %v3095_v48, %v3959_v57  ;;  %1223 = vadd.xlane.f32.xlu1 %v1222_v33  ;;  %v1177_v5 = vmul.f32 %v4022_v4, %v1141_v0  ;;  %v1120_v59 = vadd.f32 1.0, %v3097_v63 }
 0x283   : > { %3110 = verf.f32 %v1049_v27  ;;  %v994_v40 = vadd.f32 %v3980_v8, %v958_v55  ;;  %v995_v17 = vadd.f32 %v3980_v8, %v959_v9  ;;  %v950_v2 = vmul.f32 %v3974_v18, %v914_v23 }
 0x284   : > { %v951_v34 = vmul.f32 %v3974_v18, %v915_v46  ;;  %v924_v30 = vmul.f32 %v4043_v19, %v3850_v29  ;;  %v1225_v1 = vsel %vm515_vm1, %v1177_v5, 0.0  ;;  %v1015_v43 = vmul.f32 0.5, %v983_v24 }
 0x285   : > { %v1025_v57 = vmul.f32 0.5, %v993_v3  ;;  %v1058_v13 = vmul.f32 0.70710677, %v994_v40  ;;  %v3099_v38 = vpop.eup %3098  ;;  %1226 = vadd.xlane.f32.xlu0 %v1225_v1  ;;  %v1016_v21 = vmul.f32 0.5, %v984_v61  ;;  %v1059_v16 = vmul.f32 0.70710677, %v995_v17 }
 0x286   : > { %v986_v28 = vadd.f32 %v3980_v8, %v950_v2  ;;  %v987_v7 = vadd.f32 %v3980_v8, %v951_v34  ;;  %1253 = vadd.xlane.f32.xlu1 %v4079_v62  ;;  %v1152_v53 = vmul.f32 %v1120_v59, %v4026_v39  ;;  %v960_v29 = vmul.f32 %v3974_v18, %v924_v30 }
 0x287   : > { %v3101_v22 = vpop.eup %3100  ;;  %3112 = verf.f32 %v1058_v13  ;;  %v925_v19 = vmul.f32 %v4047_v25, %v3874_v51  ;;  %v1017_v37 = vmul.f32 0.5, %v985_v44  ;;  %v1026_v10 = vmul.f32 0.5, %v994_v40 }
 0x288   : > { %v3103_v24 = vpop.eup %3102  ;;  %v1110_v3 = vadd.f32 1.0, %v3101_v22  ;;  %3114 = verf.f32 %v1059_v16  ;;  %v1050_v61 = vmul.f32 0.70710677, %v986_v28  ;;  %v1027_v15 = vmul.f32 0.5, %v995_v17 }
 0x289   : > { %v4134_v20 = vpop.eup %3104  ;;  %v1111_v42 = vadd.f32 1.0, %v3103_v24  ;;  %v1051_v56 = vmul.f32 0.70710677, %v987_v7  ;;  %1256 = vadd.xlane.f32.xlu0 %v1255_v60  ;;  %v4137_v39 = vadd.f32 %v3980_v8, %v960_v29  ;;  %v961_v48 = vmul.f32 %v3974_v18, %v925_v19 }
 0x28a   : > { %v1142_v62 = vmul.f32 %v1110_v3, %v1014_v26  ;;  %3116 = verf.f32 %v1050_v61  ;;  %v1188_v44 = vmul.f32 %v4022_v4, %v1152_v53  ;;  %v916_v49 = vmul.f32 %v3099_v38, %v3956_v36 }
 0x28b   : > { %v3107_v51 = vpop.eup %3106  ;;  %v1143_v25 = vmul.f32 %v1111_v42, %v1015_v43  ;;  %3118 = verf.f32 %v1051_v56  ;;  %v1060_v60 = vmul.f32 0.70710677, %v4137_v39  ;;  %v927_v26 = vmul.f32 %v4062_v52, %v3901_v11 }
 0x28c   : > { %v3109_v12 = vpop.eup %3108  ;;  %v1178_v27 = vmul.f32 %v4022_v4, %v1142_v62  ;;  %v1121_v0 = vadd.f32 1.0, %v3107_v51  ;;  %v997_v33 = vadd.f32 %v3980_v8, %v961_v48  ;;  %v952_v23 = vmul.f32 %v3974_v18, %v916_v49 }
 0x28d   : > { %v3111_v55 = vpop.eup %3110  ;;  %v1179_v9 = vmul.f32 %v4022_v4, %v1143_v25  ;;  %v1112_v63 = vadd.f32 1.0, %v3109_v12  ;;  %3120 = verf.f32 %v1060_v60  ;;  %v1018_v17 = vmul.f32 0.5, %v986_v28 }
 0x28e   : > { %v1228_v46 = vsel %vm515_vm1, %v1178_v27, 0.0  ;;  %v1153_v36 = vmul.f32 %v1121_v0, %v1025_v57  ;;  %v1113_v5 = vadd.f32 1.0, %v3111_v55  ;;  %v1061_v2 = vmul.f32 0.70710677, %v997_v33 }
 0x28f   : > { %1229 = vadd.xlane.f32.xlu1 %v1228_v46  ;;  %v1231_v59 = vsel %vm515_vm1, %v1179_v9, 0.0  ;;  %v1144_v40 = vmul.f32 %v1112_v63, %v1016_v21  ;;  %v4153_v34 = vadd.f32 %v3980_v8, %v952_v23  ;;  %v963_v30 = vmul.f32 %v3974_v18, %v927_v26 }
 0x290   : > { %1232 = vadd.xlane.f32.xlu0 %v1231_v59  ;;  %v1189_v11 = vmul.f32 %v4022_v4, %v1153_v36  ;;  %v1145_v52 = vmul.f32 %v1113_v5, %v1017_v37  ;;  %3122 = verf.f32 %v1061_v2  ;;  %v926_v57 = vmul.f32 %v4057_v47, %v3871_v31 }
 0x291   : > { %v3113_v1 = vpop.eup %3112  ;;  %v1180_v43 = vmul.f32 %v4022_v4, %v1144_v40  ;;  %v929_v13 = vmul.f32 %v4090_v35, %v3922_v54  ;;  %v1258_v21 = vsel %vm515_vm1, %v1188_v44, 0.0  ;;  %v1019_v22 = vmul.f32 0.5, %v987_v7 }
 0x292   : > { %v3115_v38 = vpop.eup %3114  ;;  %v1181_v16 = vmul.f32 %v4022_v4, %v1145_v52  ;;  %v1122_v28 = vadd.f32 1.0, %v3113_v1  ;;  %v1261_v53 = vsel %vm515_vm1, %v1189_v11, 0.0  ;;  %v1052_v19 = vmul.f32 0.70710677, %v4153_v34 }
 0x293   : > { %1259 = vadd.xlane.f32.xlu1 %v1258_v21  ;;  %v1123_v29 = vadd.f32 1.0, %v3115_v38  ;;  %v4166_v24 = vadd.f32 %v3980_v8, %v963_v30  ;;  %v1234_v54 = vsel %vm515_vm1, %v1180_v43, 0.0  ;;  %v962_v35 = vmul.f32 %v3974_v18, %v926_v57 }
 0x294   : > { %v3117_v31 = vpop.eup %3116  ;;  %1262 = vadd.xlane.f32.xlu0 %v1261_v53  ;;  %v1154_v47 = vmul.f32 %v1122_v28, %v1026_v10  ;;  %v965_v3 = vmul.f32 %v3974_v18, %v929_v13  ;;  %v1237_v7 = vsel %vm515_vm1, %v1181_v16, 0.0  ;;  %3124 = verf.f32 %v1052_v19 }
 0x295   : > { %v3119_v37 = vpop.eup %3118  ;;  %v1155_v61 = vmul.f32 %v1123_v29, %v1027_v15  ;;  %v1114_v42 = vadd.f32 1.0, %v3117_v31  ;;  %v1063_v48 = vmul.f32 0.70710677, %v4166_v24  ;;  %v4175_v51 = vadd.f32 %v3980_v8, %v962_v35 }
 0x296   : > { %v1190_v56 = vmul.f32 %v4022_v4, %v1154_v47  ;;  %v1115_v62 = vadd.f32 1.0, %v3119_v37  ;;  %v4179_v44 = vadd.f32 %v3980_v8, %v965_v3  ;;  %v928_v15 = vmul.f32 %v4072_v45, %v3898_v50 }
 0x297   : > { %1235 = vadd.xlane.f32.xlu1 %v1234_v54  ;;  %v1191_v10 = vmul.f32 %v4022_v4, %v1155_v61  ;;  %v1146_v25 = vmul.f32 %v1114_v42, %v1018_v17  ;;  %v3121_v49 = vpop.eup %3120  ;;  %v1028_v27 = vmul.f32 0.5, %v4137_v39  ;;  %3126 = verf.f32 %v1063_v48 }
 0x298   : > { %1238 = vadd.xlane.f32.xlu0 %v1237_v7  ;;  %v1147_v12 = vmul.f32 %v1115_v62, %v1019_v22  ;;  %v1124_v60 = vadd.f32 1.0, %v3121_v49  ;;  %v1029_v26 = vmul.f32 0.5, %v997_v33  ;;  %v1062_v55 = vmul.f32 0.70710677, %v4175_v51 }
 0x299   : > { %v1182_v0 = vmul.f32 %v4022_v4, %v1146_v25  ;;  %v1264_v9 = vsel %vm515_vm1, %v1190_v56, 0.0  ;;  %v1065_v23 = vmul.f32 0.70710677, %v4179_v44  ;;  %v964_v50 = vmul.f32 %v3974_v18, %v928_v15 }
 0x29a   : > { %v1183_v63 = vmul.f32 %v4022_v4, %v1147_v12  ;;  %v3123_v45 = vpop.eup %3122  ;;  %v1267_v46 = vsel %vm515_vm1, %v1191_v10, 0.0  ;;  %v1156_v39 = vmul.f32 %v1124_v60, %v1028_v27  ;;  %3128 = verf.f32 %v1062_v55 }
 0x29b   : > { %1265 = vadd.xlane.f32.xlu1 %v1264_v9  ;;  %v931_v36 = vmul.f32 %v4101_v6, %v3949_v14  ;;  %v1240_v33 = vsel %vm515_vm1, %v1182_v0, 0.0  ;;  %v1125_v5 = vadd.f32 1.0, %v3123_v45  ;;  %3130 = verf.f32 %v1065_v23 }
 0x29c   : > { %1268 = vadd.xlane.f32.xlu0 %v1267_v46  ;;  %v1000_v59 = vadd.f32 %v3980_v8, %v964_v50  ;;  %v1243_v40 = vsel %vm515_vm1, %v1183_v63, 0.0  ;;  %v930_v2 = vmul.f32 %v4098_v32, %v3919_v41  ;;  %v932_v11 = vmul.f32 %v4134_v20, %v3946_v58 }
 0x29d   : > { %v967_v17 = vmul.f32 %v3974_v18, %v931_v36  ;;  %v1192_v52 = vmul.f32 %v4022_v4, %v1156_v39  ;;  %v1157_v14 = vmul.f32 %v1125_v5, %v1029_v26  ;;  %v1020_v41 = vmul.f32 0.5, %v4153_v34 }
 0x29e   : > { %v1064_v6 = vmul.f32 0.70710677, %v1000_v59  ;;  %v3125_v30 = vpop.eup %3124  ;;  %v966_v43 = vmul.f32 %v3974_v18, %v930_v2  ;;  %v968_v57 = vmul.f32 %v3974_v18, %v932_v11  ;;  %v1031_v22 = vmul.f32 0.5, %v4166_v24 }
 0x29f   : > { %1241 = vadd.xlane.f32.xlu1 %v1240_v33  ;;  %v1003_v1 = vadd.f32 %v3980_v8, %v967_v17  ;;  %v1193_v13 = vmul.f32 %v4022_v4, %v1157_v14  ;;  %v1116_v32 = vadd.f32 1.0, %v3125_v30  ;;  %v1270_v16 = vsel %vm515_vm1, %v1192_v52, 0.0 }
 0x2a0   : > { %1244 = vadd.xlane.f32.xlu0 %v1243_v40  ;;  %3132 = verf.f32 %v1064_v6  ;;  %v1002_v20 = vadd.f32 %v3980_v8, %v966_v43  ;;  %v1004_v38 = vadd.f32 %v3980_v8, %v968_v57  ;;  %v3462_v34 = vmov 0   ;;  %v4236_v6 = vld [vmem:[%s4943_s1 + $0x19] ss:$0 sm:$0xff] }
 0x2a1   : > { %v1067_v58 = vmul.f32 0.70710677, %v1003_v1  ;;  %v3127_v21 = vpop.eup %3126  ;;  %v1148_v28 = vmul.f32 %v1116_v32, %v1020_v41  ;;  %v1273_v18 = vsel %vm515_vm1, %v1193_v13, 0.0  ;;  %3010 = vset.pattern.permute.xlu0 %v3462_v34  ;;  %3009 = vset.pattern.permute.xlu1 %v3462_v34  ;;  %v1030_v24 = vmul.f32 0.5, %v4175_v51 }
 0x2a2   : > { %v1127_v53 = vadd.f32 1.0, %v3127_v21  ;;  %v1066_v29 = vmul.f32 0.70710677, %v1002_v20  ;;  %v1068_v31 = vmul.f32 0.70710677, %v1004_v38  ;;  %v1033_v7 = vmul.f32 0.5, %v4179_v44 }
 0x2a3   : > { %1271 = vadd.xlane.f32.xlu1 %v1270_v16  ;;  %3134 = verf.f32 %v1067_v58  ;;  %v1184_v19 = vmul.f32 %v4022_v4, %v1148_v28  ;;  %v1032_v15 = vmul.f32 0.5, %v1000_v59  ;;  %v1035_v0 = vmul.f32 0.5, %v1003_v1 }
 0x2a4   : > { %1274 = vadd.xlane.f32.xlu0 %v1273_v18  ;;  %v3129_v8 = vpop.eup %3128  ;;  %v1159_v54 = vmul.f32 %v1127_v53, %v1031_v22  ;;  %3136 = verf.f32 %v1066_v29  ;;  %v1034_v23 = vmul.f32 0.5, %v1002_v20  ;;  %v1036_v46 = vmul.f32 0.5, %v1004_v38 }
 0x2a5   : > { %v3131_v47 = vpop.eup %3130  ;;  %v1246_v35 = vsel %vm515_vm1, %v1184_v19, 0.0  ;;  %v1126_v3 = vadd.f32 1.0, %v3129_v8  ;;  %3138 = verf.f32 %v1068_v31  ;;  %v1297_v52 = vlaneseq }
 0x2a6   : > { %v1195_v37 = vmul.f32 %v4022_v4, %v1159_v54  ;;  %v1129_v61 = vadd.f32 1.0, %v3131_v47 }
 0x2a7   : > { %1247 = vadd.xlane.f32.xlu1 %v1246_v35  ;;  %v1158_v42 = vmul.f32 %v1126_v3, %v1030_v24  ;;  %v4231_v14 = vshrl.u32 %v1297_v52, 7  ;;  %vm2600_vm3 = vcmp.lt.s32.totalorder %v1297_v52, 256 }
 0x2a8   : > { %v1279_v56 = vsel %vm515_vm1, %v1195_v37, 0.0  ;;  %v1161_v62 = vmul.f32 %v1129_v61, %v1033_v7 }
 0x2a9   : > { %1280 = vadd.xlane.f32.xlu0 %v1279_v56  ;;  %v1194_v10 = vmul.f32 %v4022_v4, %v1158_v42 }
 0x2aa   : > { %v3133_v48 = vpop.eup %3132  ;;  %v1197_v25 = vmul.f32 %v4022_v4, %v1161_v62 }
 0x2ab   : > { %v1128_v51 = vadd.f32 1.0, %v3133_v48  ;;  %v1276_v49 = vsel %vm515_vm1, %v1194_v10, 0.0 }
 0x2ac   : > { %1277 = vadd.xlane.f32.xlu1 %v1276_v49  ;;  %v1285_v27 = vsel %vm515_vm1, %v1197_v25, 0.0 }
 0x2ad   : > { %v3135_v12 = vpop.eup %3134  ;;  %v1160_v44 = vmul.f32 %v1128_v51, %v1032_v15  ;;  %1286 = vadd.xlane.f32.xlu0 %v1285_v27 }
 0x2ae   : > { %v1131_v60 = vadd.f32 1.0, %v3135_v12  ;;  %v3137_v26 = vpop.eup %3136 }
 0x2af   : > { %v1196_v55 = vmul.f32 %v4022_v4, %v1160_v44  ;;  %v3139_v9 = vpop.eup %3138  ;;  %v1130_v50 = vadd.f32 1.0, %v3137_v26 }
 0x2b0   : > { %v1163_v63 = vmul.f32 %v1131_v60, %v1035_v0  ;;  %v1132_v39 = vadd.f32 1.0, %v3139_v9 }
 0x2b1   : > { %v1282_v45 = vsel %vm515_vm1, %v1196_v55, 0.0  ;;  %v1162_v33 = vmul.f32 %v1130_v50, %v1034_v23 }
 0x2b2   : > { %1283 = vadd.xlane.f32.xlu1 %v1282_v45  ;;  %v1199_v36 = vmul.f32 %v4022_v4, %v1163_v63  ;;  %v1164_v5 = vmul.f32 %v1132_v39, %v1036_v46 }
 0x2b3   : > { %v1198_v40 = vmul.f32 %v4022_v4, %v1162_v33 }
 0x2b4   : > { %v1291_v59 = vsel %vm515_vm1, %v1199_v36, 0.0  ;;  %v1200_v2 = vmul.f32 %v4022_v4, %v1164_v5 }
 0x2b5   : > { %1292 = vadd.xlane.f32.xlu0 %v1291_v59  ;;  %v1288_v17 = vsel %vm515_vm1, %v1198_v40, 0.0 }
 0x2b6   : > { %1289 = vadd.xlane.f32.xlu1 %v1288_v17  ;;  %v1294_v11 = vsel %vm515_vm1, %v1200_v2, 0.0 }
 0x2ba   : > { %1295 = vadd.xlane.f32.xlu1 %v1294_v11 }
 0x2f0   : > { %v1203_v30 = vpop.xlane.xlu0 %1202 }
 0x2f1   : > { %v1301_v1 = vadd.f32 %v4236_v6, %v1203_v30 }
 0x2f3   : > { %v2720_v43 = vmul.f32 -1.442695, %v1301_v1 }
 0x2f5   : > { %3140 = vpow2.f32 %v2720_v43 }
 0x2f7   : > { %v1206_v57 = vpop.xlane.xlu1 %1205 }
 0x2f8   : > { %v1302_v4 = vadd.f32 %v4236_v6, %v1206_v57  ;;  %v1209_v13 = vpop.xlane.xlu0 %1208 }
 0x2f9   : > { %v1303_v32 = vadd.f32 %v4236_v6, %v1209_v13 }
 0x2fa   : > { %v2721_v41 = vmul.f32 -1.442695, %v1302_v4 }
 0x2fb   : > { %v2722_v58 = vmul.f32 -1.442695, %v1303_v32 }
 0x2fc   : > { %3142 = vpow2.f32 %v2721_v41 }
 0x2fd   : > { %3144 = vpow2.f32 %v2722_v58 }
 0x2ff   : > { %v1212_v20 = vpop.xlane.xlu1 %1211  ;;  %v3141_v18 = vpop.eup %3140 }
 0x300   : > { %v1304_v38 = vadd.f32 %v4236_v6, %v1212_v20  ;;  %v1215_v21 = vpop.xlane.xlu0 %1214  ;;  %v1429_v8 = vadd.f32 1.0, %v3141_v18 }
 0x301   : > { %v1305_v16 = vadd.f32 %v4236_v6, %v1215_v21 }
 0x302   : > { %v2723_v28 = vmul.f32 -1.442695, %v1304_v38 }
 0x303   : > { %v2724_v22 = vmul.f32 -1.442695, %v1305_v16 }
 0x304   : > { %3146 = vpow2.f32 %v2723_v28 }
 0x305   : > { %3148 = vpow2.f32 %v2724_v22 }
 0x306   : > { %v3143_v53 = vpop.eup %3142  ;;  %v1218_v34 = vpop.xlane.xlu1 %1217 }
 0x307   : > { %v1430_v29 = vadd.f32 1.0, %v3143_v53  ;;  %v1306_v19 = vadd.f32 %v4236_v6, %v1218_v34  ;;  %v3145_v35 = vpop.eup %3144 }
 0x308   : > { %v1221_v31 = vpop.xlane.xlu0 %1220  ;;  %v1431_v61 = vadd.f32 1.0, %v3145_v35 }
 0x309   : > { %3150 = vrcp.f32 %v1430_v29  ;;  %v2725_v54 = vmul.f32 -1.442695, %v1306_v19  ;;  %v1307_v17 = vadd.f32 %v4236_v6, %v1221_v31 }
 0x30b   : > { %3152 = vpow2.f32 %v2725_v54  ;;  %v2726_v4 = vmul.f32 -1.442695, %v1307_v17 }
 0x30c   : > { %v1251_v47 = vpop.xlane.xlu0 %1250  ;;  %3154 = vrcp.f32 %v1429_v8 }
 0x30d   : > { %v1317_v24 = vadd.f32 %v4236_v6, %v1251_v47 }
 0x30e   : > { %v3147_v3 = vpop.eup %3146 }
 0x30f   : > { %v1432_v37 = vadd.f32 1.0, %v3147_v3  ;;  %v2736_v7 = vmul.f32 -1.442695, %v1317_v24  ;;  %v1224_v42 = vpop.xlane.xlu1 %1223  ;;  %v3149_v56 = vpop.eup %3148 }
 0x310   : > { %v1308_v62 = vadd.f32 %v4236_v6, %v1224_v42  ;;  %v1433_v15 = vadd.f32 1.0, %v3149_v56 }
 0x311   : > { %3156 = vrcp.f32 %v1432_v37 }
 0x312   : > { %3158 = vpow2.f32 %v2736_v7  ;;  %v2727_v10 = vmul.f32 -1.442695, %v1308_v62  ;;  %v1227_v25 = vpop.xlane.xlu0 %1226 }
 0x313   : > { %v3151_v48 = vpop.eup %3150  ;;  %3160 = vrcp.f32 %v1431_v61  ;;  %v1254_v51 = vpop.xlane.xlu1 %1253  ;;  %v1309_v16 = vadd.f32 %v4236_v6, %v1227_v25 }
 0x314   : > { %1532 = vperm.xlu1 %3009, %v3151_v48   ;;  %3162 = vpow2.f32 %v2727_v10  ;;  %v1318_v49 = vadd.f32 %v4236_v6, %v1254_v51 }
 0x315   : > { %v3153_v12 = vpop.eup %3152  ;;  %3164 = vrcp.f32 %v1433_v15  ;;  %v2728_v19 = vmul.f32 -1.442695, %v1309_v16 }
 0x316   : > { %v3155_v27 = vpop.eup %3154  ;;  %v1434_v44 = vadd.f32 1.0, %v3153_v12  ;;  %v2737_v0 = vmul.f32 -1.442695, %v1318_v49  ;;  %v1257_v60 = vpop.xlane.xlu0 %1256 }
 0x317   : > { %v1319_v63 = vadd.f32 %v4236_v6, %v1257_v60 }
 0x318   : > { %1527 = vperm.xlu1 %3009, %v3155_v27   ;;  %3166 = vrcp.f32 %v1434_v44 }
 0x319   : > { %3168 = vpow2.f32 %v2737_v0  ;;  %v2738_v33 = vmul.f32 -1.442695, %v1319_v63 }
 0x31b   : > { %v3157_v26 = vpop.eup %3156 }
 0x31c   : > { %v1230_v55 = vpop.xlane.xlu1 %1229  ;;  %1542 = vperm.xlu1 %3009, %v3157_v26   ;;  %v3159_v9 = vpop.eup %3158 }
 0x31d   : > { %v1233_v23 = vpop.xlane.xlu0 %1232  ;;  %v3161_v50 = vpop.eup %3160  ;;  %v1445_v45 = vadd.f32 1.0, %v3159_v9  ;;  %v1310_v11 = vadd.f32 %v4236_v6, %v1230_v55 }
 0x31e   : > { %v3163_v46 = vpop.eup %3162  ;;  %v1311_v24 = vadd.f32 %v4236_v6, %v1233_v23 }
 0x31f   : > { %3170 = vrcp.f32 %v1445_v45  ;;  %v1436_v39 = vadd.f32 1.0, %v3163_v46  ;;  %v3165_v40 = vpop.eup %3164  ;;  %v2729_v32 = vmul.f32 -1.442695, %v1310_v11 }
 0x320   : > { %v1260_v36 = vpop.xlane.xlu1 %1259  ;;  %1537 = vperm.xlu1 %3009, %v3161_v50   ;;  %v2730_v15 = vmul.f32 -1.442695, %v1311_v24 }
 0x321   : > { %v1320_v5 = vadd.f32 %v4236_v6, %v1260_v36  ;;  %v1263_v59 = vpop.xlane.xlu0 %1262  ;;  %3172 = vrcp.f32 %v1436_v39 }
 0x322   : > { %v3167_v2 = vpop.eup %3166  ;;  %3174 = vpow2.f32 %v2738_v33  ;;  %v1321_v41 = vadd.f32 %v4236_v6, %v1263_v59 }
 0x323   : > { %v2739_v30 = vmul.f32 -1.442695, %v1320_v5  ;;  %1552 = vperm.xlu0 %3010, %v3167_v2   ;;  %v3169_v43 = vpop.eup %3168 }
 0x324   : > { %v1236_v1 = vpop.xlane.xlu1 %1235  ;;  %1547 = vperm.xlu1 %3009, %v3165_v40   ;;  %v1446_v13 = vadd.f32 1.0, %v3169_v43  ;;  %v2740_v28 = vmul.f32 -1.442695, %v1321_v41 }
 0x325   : > { %v1239_v57 = vpop.xlane.xlu0 %1238  ;;  %3176 = vpow2.f32 %v2739_v30  ;;  %v1312_v18 = vadd.f32 %v4236_v6, %v1236_v1 }
 0x326   : > { %3178 = vrcp.f32 %v1446_v13  ;;  %v1313_v26 = vadd.f32 %v4236_v6, %v1239_v57 }
 0x327   : > { %3180 = vpow2.f32 %v2726_v4  ;;  %v2731_v47 = vmul.f32 -1.442695, %v1312_v18 }
 0x328   : > { %v1266_v58 = vpop.xlane.xlu1 %1265  ;;  %3182 = vpow2.f32 %v2729_v32  ;;  %v2732_v36 = vmul.f32 -1.442695, %v1313_v26 }
 0x329   : > { %v1322_v20 = vadd.f32 %v4236_v6, %v1266_v58  ;;  %v1269_v38 = vpop.xlane.xlu0 %1268  ;;  %v3171_v21 = vpop.eup %3170 }
 0x32a   : > { %1607 = vperm.xlu0 %3010, %v3171_v21   ;;  %v1323_v31 = vadd.f32 %v4236_v6, %v1269_v38 }
 0x32b   : > { %v2741_v22 = vmul.f32 -1.442695, %v1322_v20  ;;  %v3173_v34 = vpop.eup %3172 }
 0x32c   : > { %v1242_v53 = vpop.xlane.xlu1 %1241  ;;  %v3175_v8 = vpop.eup %3174  ;;  %v2742_v61 = vmul.f32 -1.442695, %v1323_v31 }
 0x32d   : > { %3184 = vpow2.f32 %v2741_v22  ;;  %v4255_v29 = vpop.xlane.xlu0 %1244  ;;  %v1447_v42 = vadd.f32 1.0, %v3175_v8  ;;  %v1314_v51 = vadd.f32 %v4236_v6, %v1242_v53 }
 0x32e   : > { %3186 = vpow2.f32 %v2740_v28  ;;  %1562 = vperm.xlu0 %3010, %v3173_v34   ;;  %v1315_v41 = vadd.f32 %v4236_v6, %v4255_v29 }
 0x32f   : > { %v3177_v54 = vpop.eup %3176  ;;  %3188 = vpow2.f32 %v2728_v19  ;;  %v2733_v55 = vmul.f32 -1.442695, %v1314_v51 }
 0x330   : > { %v1272_v35 = vpop.xlane.xlu1 %1271  ;;  %v1448_v3 = vadd.f32 1.0, %v3177_v54  ;;  %v3179_v7 = vpop.eup %3178  ;;  %v2734_v34 = vmul.f32 -1.442695, %v1315_v41 }
 0x331   : > { %v1324_v37 = vadd.f32 %v4236_v6, %v1272_v35  ;;  %v1275_v62 = vpop.xlane.xlu0 %1274  ;;  %1612 = vperm.xlu1 %3009, %v3179_v7   ;;  %v3181_v48 = vpop.eup %3180 }
 0x332   : > { %3190 = vrcp.f32 %v1448_v3  ;;  %v3183_v25 = vpop.eup %3182  ;;  %v1325_v49 = vadd.f32 %v4236_v6, %v1275_v62  ;;  %v1435_v27 = vadd.f32 1.0, %v3181_v48 }
 0x333   : > { %v2743_v56 = vmul.f32 -1.442695, %v1324_v37  ;;  %3192 = vpow2.f32 %v2731_v47  ;;  %v1438_v0 = vadd.f32 1.0, %v3183_v25 }
 0x334   : > { %v1248_v10 = vpop.xlane.xlu1 %1247  ;;  %v2744_v9 = vmul.f32 -1.442695, %v1325_v49 }
 0x335   : > { %3194 = vpow2.f32 %v2743_v56  ;;  %v1316_v1 = vadd.f32 %v4236_v6, %v1248_v10 }
 0x336   : > { %3196 = vpow2.f32 %v2742_v61  ;;  %v1281_v50 = vpop.xlane.xlu0 %1280 }
 0x337   : > { %v3185_v12 = vpop.eup %3184  ;;  %3198 = vrcp.f32 %v1447_v42  ;;  %v1327_v59 = vadd.f32 %v4236_v6, %v1281_v50  ;;  %v2735_v16 = vmul.f32 -1.442695, %v1316_v1 }
 0x338   : > { %v3187_v44 = vpop.eup %3186  ;;  %v1450_v60 = vadd.f32 1.0, %v3185_v12  ;;  %3200 = vpow2.f32 %v2730_v15 }
 0x339   : > { %v1278_v63 = vpop.xlane.xlu1 %1277  ;;  %v1449_v23 = vadd.f32 1.0, %v3187_v44  ;;  %v3189_v46 = vpop.eup %3188  ;;  %v2746_v32 = vmul.f32 -1.442695, %v1327_v59 }
 0x33a   : > { %3202 = vrcp.f32 %v1450_v60  ;;  %v1326_v45 = vadd.f32 %v4236_v6, %v1278_v63  ;;  %v1437_v17 = vadd.f32 1.0, %v3189_v46  ;;  %v1287_v13 = vpop.xlane.xlu0 %1286 }
 0x33b   : > { %3204 = vrcp.f32 %v1435_v27  ;;  %v1329_v29 = vadd.f32 %v4236_v6, %v1287_v13 }
 0x33c   : > { %3206 = vrcp.f32 %v1438_v0  ;;  %v3191_v39 = vpop.eup %3190  ;;  %v2745_v33 = vmul.f32 -1.442695, %v1326_v45 }
 0x33d   : > { %3208 = vpow2.f32 %v2733_v55  ;;  %v3193_v5 = vpop.eup %3192  ;;  %1622 = vperm.xlu1 %3009, %v3191_v39   ;;  %v2748_v7 = vmul.f32 -1.442695, %v1329_v29 }
 0x33e   : > { %3210 = vpow2.f32 %v2744_v9  ;;  %v1440_v4 = vadd.f32 1.0, %v3193_v5 }
 0x33f   : > { %v3195_v40 = vpop.eup %3194  ;;  %3212 = vrcp.f32 %v1449_v23  ;;  %v1284_v2 = vpop.xlane.xlu1 %1283 }
 0x340   : > { %v3197_v11 = vpop.eup %3196  ;;  %v1452_v30 = vadd.f32 1.0, %v3195_v40  ;;  %3214 = vpow2.f32 %v2745_v33  ;;  %v1328_v43 = vadd.f32 %v4236_v6, %v1284_v2 }
 0x341   : > { %v3199_v57 = vpop.eup %3198  ;;  %3216 = vpow2.f32 %v2732_v36  ;;  %v1451_v38 = vadd.f32 1.0, %v3197_v11 }
 0x342   : > { %3218 = vrcp.f32 %v1452_v30  ;;  %v2747_v58 = vmul.f32 -1.442695, %v1328_v43  ;;  %1617 = vperm.xlu1 %3009, %v3199_v57   ;;  %v3201_v20 = vpop.eup %3200  ;;  %v1293_v8 = vpop.xlane.xlu0 %1292 }
 0x343   : > { %3220 = vrcp.f32 %v1437_v17  ;;  %v1290_v28 = vpop.xlane.xlu1 %1289  ;;  %v1439_v31 = vadd.f32 1.0, %v3201_v20  ;;  %v1331_v61 = vadd.f32 %v4236_v6, %v1293_v8 }
 0x344   : > { %v3203_v21 = vpop.eup %3202  ;;  %3222 = vpow2.f32 %v2747_v58  ;;  %v1330_v18 = vadd.f32 %v4236_v6, %v1290_v28 }
 0x345   : > { %v3205_v22 = vpop.eup %3204  ;;  %3224 = vrcp.f32 %v1440_v4  ;;  %1632 = vperm.xlu0 %3010, %v3203_v21   ;;  %v2750_v49 = vmul.f32 -1.442695, %v1331_v61 }
 0x346   : > { %v3207_v53 = vpop.eup %3206  ;;  %3226 = vpow2.f32 %v2746_v32  ;;  %1557 = vperm.xlu1 %3009, %v3205_v22   ;;  %v2749_v47 = vmul.f32 -1.442695, %v1330_v18 }
 0x347   : > { %v3209_v19 = vpop.eup %3208  ;;  %3228 = vrcp.f32 %v1451_v38  ;;  %v1296_v35 = vpop.xlane.xlu1 %1295 }
 0x348   : > { %v3211_v54 = vpop.eup %3210  ;;  %3230 = vpow2.f32 %v2735_v16  ;;  %v1332_v3 = vadd.f32 %v4236_v6, %v1296_v35  ;;  %v1442_v15 = vadd.f32 1.0, %v3209_v19  ;;  %v4276_v16 = vld [vmem:[%s4943_s1 + $0x14] ss:$0 sm:$0xff] }
 0x349   : > { %v3213_v24 = vpop.eup %3212  ;;  %1572 = vperm.xlu0 %3010, %v3207_v53   ;;  %3232 = vpow2.f32 %v2734_v34  ;;  %v1453_v56 = vadd.f32 1.0, %v3211_v54  ;;  %v4283_v34 = vld [vmem:[%s4943_s1 + $0x15] ss:$0 sm:$0xff] }
 0x34a   : > { %v3215_v37 = vpop.eup %3214  ;;  %1627 = vperm.xlu1 %3009, %v3213_v24   ;;  %3234 = vrcp.f32 %v1439_v31  ;;  %v2751_v10 = vmul.f32 -1.442695, %v1332_v3 }
 0x34b   : > { %v3217_v42 = vpop.eup %3216  ;;  %v1454_v62 = vadd.f32 1.0, %v3215_v37  ;;  %3236 = vpow2.f32 %v2749_v47 }
 0x34c   : > { %v3219_v48 = vpop.eup %3218  ;;  %v1441_v27 = vadd.f32 1.0, %v3217_v42 }
 0x34d   : > { %v3221_v25 = vpop.eup %3220  ;;  %3238 = vrcp.f32 %v1454_v62  ;;  %1642 = vperm.xlu0 %3010, %v3219_v48  }
 0x34e   : > { %v3223_v51 = vpop.eup %3222  ;;  %3240 = vpow2.f32 %v2748_v7  ;;  %1567 = vperm.xlu1 %3009, %v3221_v25  }
 0x34f   : > { %v3225_v12 = vpop.eup %3224  ;;  %3242 = vrcp.f32 %v1453_v56  ;;  %v1456_v0 = vadd.f32 1.0, %v3223_v51 }
 0x350   : > { %v3227_v6 = vpop.eup %3226  ;;  %3244 = vpow2.f32 %v2751_v10 }
 0x351   : > { %v3229_v44 = vpop.eup %3228  ;;  %3246 = vrcp.f32 %v1442_v15  ;;  %1582 = vperm.xlu0 %3010, %v3225_v12   ;;  %v1455_v26 = vadd.f32 1.0, %v3227_v6 }
 0x352   : > { %v3231_v60 = vpop.eup %3230  ;;  %3248 = vpow2.f32 %v2750_v49  ;;  %1637 = vperm.xlu1 %3009, %v3229_v44  }
 0x353   : > { %3250 = vrcp.f32 %v1441_v27  ;;  %v3233_v55 = vpop.eup %3232  ;;  %v1444_v63 = vadd.f32 1.0, %v3231_v60 }
 0x354   : > { %v3235_v9 = vpop.eup %3234  ;;  %3252 = vrcp.f32 %v1456_v0  ;;  %v1443_v45 = vadd.f32 1.0, %v3233_v55 }
 0x355   : > { %v3237_v23 = vpop.eup %3236  ;;  %3254 = vrcp.f32 %v1455_v26 }
 0x356   : > { %1577 = vperm.xlu1 %3009, %v3235_v9   ;;  %3256 = vrcp.f32 %v1444_v63  ;;  %v1458_v36 = vadd.f32 1.0, %v3237_v23 }
 0x357   : > { %v3239_v50 = vpop.eup %3238  ;;  %3258 = vrcp.f32 %v1443_v45 }
 0x358   : > { %v3241_v46 = vpop.eup %3240  ;;  %1652 = vperm.xlu0 %3010, %v3239_v50   ;;  %3260 = vrcp.f32 %v1458_v36 }
 0x359   : > { %v3243_v39 = vpop.eup %3242  ;;  %v1457_v59 = vadd.f32 1.0, %v3241_v46 }
 0x35a   : > { %v3245_v33 = vpop.eup %3244  ;;  %1647 = vperm.xlu1 %3009, %v3243_v39  }
 0x35b   : > { %v3247_v5 = vpop.eup %3246  ;;  %v1460_v2 = vadd.f32 1.0, %v3245_v33  ;;  %3262 = vrcp.f32 %v1457_v59 }
 0x35c   : > { %v3249_v40 = vpop.eup %3248  ;;  %1592 = vperm.xlu0 %3010, %v3247_v5  }
 0x35d   : > { %v3251_v17 = vpop.eup %3250  ;;  %v1459_v30 = vadd.f32 1.0, %v3249_v40  ;;  %3264 = vrcp.f32 %v1460_v2 }
 0x35e   : > { %1587 = vperm.xlu1 %3009, %v3251_v17   ;;  %v3253_v11 = vpop.eup %3252 }
 0x35f   : > { %v3255_v1 = vpop.eup %3254  ;;  %3266 = vrcp.f32 %v1459_v30 }
 0x360   : > { %1662 = vperm.xlu0 %3010, %v3253_v11   ;;  %v3257_v43 = vpop.eup %3256 }
 0x361   : > { %v3259_v57 = vpop.eup %3258 }
 0x362   : > { %1657 = vperm.xlu1 %3009, %v3255_v1   ;;  %v3261_v4 = vpop.eup %3260 }
 0x364   : > { %1602 = vperm.xlu0 %3010, %v3257_v43  }
 0x365   : > { %v3263_v13 = vpop.eup %3262 }
 0x366   : > { %1597 = vperm.xlu1 %3009, %v3259_v57  }
 0x367   : > { %v3265_v41 = vpop.eup %3264 }
 0x368   : > { %1672 = vperm.xlu0 %3010, %v3261_v4  }
 0x369   : > { %v3267_v32 = vpop.eup %3266 }
 0x36a   : > { %1667 = vperm.xlu1 %3009, %v3263_v13  }
 0x36c   : > { %1682 = vperm.xlu0 %3010, %v3265_v41  }
 0x36e   : > { %1677 = vperm.xlu1 %3009, %v3267_v32  }
 0x393   : > { %v1533_v58 = vpop.permute.xlu1 %1532 }
 0x394   : > { %v1690_v18 = vmul.f32 %v4276_v16, %v1533_v58 }
 0x396   : > { %v4291_v8 = vadd.f32 %v4283_v34, %v1690_v18 }
 0x397   : > { %v1528_v20 = vpop.permute.xlu1 %1527 }
 0x398   : > { %v1689_v47 = vmul.f32 %v4276_v16, %v1528_v20  ;;  %v1760_v24 = vsel %vm515_vm1, %v4291_v8, 0.0 }
 0x39a   : > { %v4303_v7 = vadd.f32 %v4283_v34, %v1689_v47 }
 0x39b   : > { %v1543_v38 = vpop.permute.xlu1 %1542 }
 0x39c   : > { %v1757_v61 = vsel %vm515_vm1, %v4303_v7, 0.0  ;;  %v1692_v56 = vmul.f32 %v4276_v16, %v1543_v38 }
 0x39e   : > { %v4313_v15 = vadd.f32 %v4283_v34, %v1692_v56 }
 0x39f   : > { %v1538_v28 = vpop.permute.xlu1 %1537 }
 0x3a0   : > { %v1691_v51 = vmul.f32 %v4276_v16, %v1538_v28  ;;  %v1766_v55 = vsel %vm515_vm1, %v4313_v15, 0.0 }
 0x3a2   : > { %v1553_v21 = vpop.permute.xlu0 %1552  ;;  %v4324_v60 = vadd.f32 %v4283_v34, %v1691_v51 }
 0x3a3   : > { %v1548_v19 = vpop.permute.xlu1 %1547  ;;  %v1694_v26 = vmul.f32 %v4276_v16, %v1553_v21 }
 0x3a4   : > { %v1693_v39 = vmul.f32 %v4276_v16, %v1548_v19  ;;  %v1763_v33 = vsel %vm515_vm1, %v4324_v60, 0.0 }
 0x3a5   : > { %v4337_v46 = vadd.f32 %v4283_v34, %v1694_v26 }
 0x3a6   : > { %v4348_v2 = vadd.f32 %v4283_v34, %v1693_v39 }
 0x3a7   : > { %v1772_v30 = vsel %vm515_vm1, %v4337_v46, 0.0 }
 0x3a8   : > { %v1769_v20 = vsel %vm515_vm1, %v4348_v2, 0.0 }
 0x3a9   : > { %v1608_v22 = vpop.permute.xlu0 %1607 }
 0x3aa   : > { %v1705_v53 = vmul.f32 %v4276_v16, %v1608_v22 }
 0x3ac   : > { %v4286_v29 = vadd.f32 %v4283_v34, %v1705_v53 }
 0x3ad   : > { %v1563_v48 = vpop.permute.xlu0 %1562 }
 0x3ae   : > { %v1805_v31 = vsel %vm515_vm1, %v4286_v29, 0.0  ;;  %v1696_v11 = vmul.f32 %v4276_v16, %v1563_v48 }
 0x3af   : > { %1806 = vadd.xlane.f32.xlu1 %v1805_v31 }
 0x3b0   : > { %v1613_v54 = vpop.permute.xlu1 %1612  ;;  %v4361_v41 = vadd.f32 %v4283_v34, %v1696_v11 }
 0x3b1   : > { %v1706_v35 = vmul.f32 %v4276_v16, %v1613_v54 }
 0x3b2   : > { %v1778_v22 = vsel %vm515_vm1, %v4361_v41, 0.0 }
 0x3b3   : > { %1761 = vadd.xlane.f32.xlu1 %v1760_v24  ;;  %v4298_v3 = vadd.f32 %v4283_v34, %v1706_v35 }
 0x3b5   : > { %v1808_v37 = vsel %vm515_vm1, %v4298_v3, 0.0 }
 0x3b6   : > { %1809 = vadd.xlane.f32.xlu0 %v1808_v37 }
 0x3ba   : > { %1758 = vadd.xlane.f32.xlu0 %v1757_v61 }
 0x3bc   : > { %v1623_v42 = vpop.permute.xlu1 %1622 }
 0x3bd   : > { %v1708_v62 = vmul.f32 %v4276_v16, %v1623_v42 }
 0x3bf   : > { %v4310_v10 = vadd.f32 %v4283_v34, %v1708_v62 }
 0x3c1   : > { %v1618_v25 = vpop.permute.xlu1 %1617  ;;  %v1814_v12 = vsel %vm515_vm1, %v4310_v10, 0.0 }
 0x3c2   : > { %v1707_v49 = vmul.f32 %v4276_v16, %v1618_v25  ;;  %1815 = vadd.xlane.f32.xlu1 %v1814_v12 }
 0x3c4   : > { %v4320_v27 = vadd.f32 %v4283_v34, %v1707_v49  ;;  %v1633_v6 = vpop.permute.xlu0 %1632 }
 0x3c5   : > { %v1710_v44 = vmul.f32 %v4276_v16, %v1633_v6  ;;  %v1558_v0 = vpop.permute.xlu1 %1557 }
 0x3c6   : > { %v1811_v9 = vsel %vm515_vm1, %v4320_v27, 0.0  ;;  %1767 = vadd.xlane.f32.xlu1 %v1766_v55  ;;  %v1695_v32 = vmul.f32 %v4276_v16, %v1558_v0 }
 0x3c7   : > { %v4332_v63 = vadd.f32 %v4283_v34, %v1710_v44  ;;  %1812 = vadd.xlane.f32.xlu0 %v1811_v9 }
 0x3c8   : > { %v1573_v23 = vpop.permute.xlu0 %1572  ;;  %v4371_v28 = vadd.f32 %v4283_v34, %v1695_v32 }
 0x3c9   : > { %v1628_v50 = vpop.permute.xlu1 %1627  ;;  %v1820_v45 = vsel %vm515_vm1, %v4332_v63, 0.0  ;;  %v1698_v19 = vmul.f32 %v4276_v16, %v1573_v23 }
 0x3ca   : > { %v1709_v36 = vmul.f32 %v4276_v16, %v1628_v50  ;;  %1821 = vadd.xlane.f32.xlu1 %v1820_v45  ;;  %v1775_v37 = vsel %vm515_vm1, %v4371_v28, 0.0 }
 0x3cb   : > { %1764 = vadd.xlane.f32.xlu0 %v1763_v33  ;;  %v4387_v42 = vadd.f32 %v4283_v34, %v1698_v19 }
 0x3cc   : > { %v4344_v5 = vadd.f32 %v4283_v34, %v1709_v36  ;;  %v1643_v59 = vpop.permute.xlu0 %1642 }
 0x3cd   : > { %v1712_v40 = vmul.f32 %v4276_v16, %v1643_v59  ;;  %v1568_v17 = vpop.permute.xlu1 %1567  ;;  %v1784_v44 = vsel %vm515_vm1, %v4387_v42, 0.0 }
 0x3ce   : > { %v1817_v1 = vsel %vm515_vm1, %v4344_v5, 0.0  ;;  %1773 = vadd.xlane.f32.xlu1 %v1772_v30  ;;  %v1697_v47 = vmul.f32 %v4276_v16, %v1568_v17 }
 0x3cf   : > { %v4356_v43 = vadd.f32 %v4283_v34, %v1712_v40  ;;  %1818 = vadd.xlane.f32.xlu0 %v1817_v1 }
 0x3d0   : > { %v1583_v57 = vpop.permute.xlu0 %1582  ;;  %v4395_v25 = vadd.f32 %v4283_v34, %v1697_v47 }
 0x3d1   : > { %v1638_v4 = vpop.permute.xlu1 %1637  ;;  %v1826_v13 = vsel %vm515_vm1, %v4356_v43, 0.0  ;;  %v1700_v12 = vmul.f32 %v4276_v16, %v1583_v57 }
 0x3d2   : > { %v1711_v58 = vmul.f32 %v4276_v16, %v1638_v4  ;;  %1827 = vadd.xlane.f32.xlu1 %v1826_v13  ;;  %v1781_v23 = vsel %vm515_vm1, %v4395_v25, 0.0 }
 0x3d3   : > { %1770 = vadd.xlane.f32.xlu0 %v1769_v20  ;;  %v4411_v45 = vadd.f32 %v4283_v34, %v1700_v12 }
 0x3d4   : > { %v4368_v38 = vadd.f32 %v4283_v34, %v1711_v58 }
 0x3d5   : > { %v1578_v21 = vpop.permute.xlu1 %1577  ;;  %v1790_v1 = vsel %vm515_vm1, %v4411_v45, 0.0 }
 0x3d6   : > { %v1823_v18 = vsel %vm515_vm1, %v4368_v38, 0.0  ;;  %1779 = vadd.xlane.f32.xlu1 %v1778_v22  ;;  %v1699_v26 = vmul.f32 %v4276_v16, %v1578_v21 }
 0x3d7   : > { %v1653_v53 = vpop.permute.xlu0 %1652  ;;  %1824 = vadd.xlane.f32.xlu0 %v1823_v18 }
 0x3d8   : > { %v1714_v31 = vmul.f32 %v4276_v16, %v1653_v53  ;;  %v4419_v59 = vadd.f32 %v4283_v34, %v1699_v26 }
 0x3d9   : > { %v1648_v54 = vpop.permute.xlu1 %1647 }
 0x3da   : > { %v4381_v35 = vadd.f32 %v4283_v34, %v1714_v31  ;;  %v1713_v24 = vmul.f32 %v4276_v16, %v1648_v54  ;;  %v1787_v58 = vsel %vm515_vm1, %v4419_v59, 0.0 }
 0x3db   : > { %v1593_v61 = vpop.permute.xlu0 %1592  ;;  %1776 = vadd.xlane.f32.xlu0 %v1775_v37 }
 0x3dc   : > { %v4390_v56 = vadd.f32 %v4283_v34, %v1713_v24  ;;  %v1832_v62 = vsel %vm515_vm1, %v4381_v35, 0.0  ;;  %v1702_v11 = vmul.f32 %v4276_v16, %v1593_v61 }
 0x3dd   : > { %1833 = vadd.xlane.f32.xlu1 %v1832_v62  ;;  %v1588_v48 = vpop.permute.xlu1 %1587 }
 0x3de   : > { %v1829_v51 = vsel %vm515_vm1, %v4390_v56, 0.0  ;;  %v1701_v4 = vmul.f32 %v4276_v16, %v1588_v48  ;;  %v4435_v21 = vadd.f32 %v4283_v34, %v1702_v11 }
 0x3df   : > { %v1663_v49 = vpop.permute.xlu0 %1662  ;;  %1830 = vadd.xlane.f32.xlu0 %v1829_v51 }
 0x3e0   : > { %v1716_v6 = vmul.f32 %v4276_v16, %v1663_v49  ;;  %v4444_v31 = vadd.f32 %v4283_v34, %v1701_v4  ;;  %v1796_v61 = vsel %vm515_vm1, %v4435_v21, 0.0 }
 0x3e1   : > { %1785 = vadd.xlane.f32.xlu1 %v1784_v44  ;;  %v1658_v0 = vpop.permute.xlu1 %1657 }
 0x3e2   : > { %v4405_v55 = vadd.f32 %v4283_v34, %v1716_v6  ;;  %v1715_v9 = vmul.f32 %v4276_v16, %v1658_v0  ;;  %v1793_v51 = vsel %vm515_vm1, %v4444_v31, 0.0 }
 0x3e3   : > { %v1603_v50 = vpop.permute.xlu0 %1602  ;;  %1782 = vadd.xlane.f32.xlu0 %v1781_v23 }
 0x3e4   : > { %v4414_v39 = vadd.f32 %v4283_v34, %v1715_v9  ;;  %v1838_v36 = vsel %vm515_vm1, %v4405_v55, 0.0  ;;  %v1704_v24 = vmul.f32 %v4276_v16, %v1603_v50 }
 0x3e5   : > { %1839 = vadd.xlane.f32.xlu1 %v1838_v36  ;;  %v1598_v33 = vpop.permute.xlu1 %1597 }
 0x3e6   : > { %v1835_v40 = vsel %vm515_vm1, %v4414_v39, 0.0  ;;  %v1703_v62 = vmul.f32 %v4276_v16, %v1598_v33  ;;  %v4462_v49 = vadd.f32 %v4283_v34, %v1704_v24 }
 0x3e7   : > { %v1673_v17 = vpop.permute.xlu0 %1672  ;;  %1836 = vadd.xlane.f32.xlu0 %v1835_v40 }
 0x3e8   : > { %v1718_v30 = vmul.f32 %v4276_v16, %v1673_v17  ;;  %v4467_v6 = vadd.f32 %v4283_v34, %v1703_v62  ;;  %v1802_v44 = vsel %vm515_vm1, %v4462_v49, 0.0 }
 0x3e9   : > { %1791 = vadd.xlane.f32.xlu1 %v1790_v1  ;;  %v1668_v57 = vpop.permute.xlu1 %1667 }
 0x3ea   : > { %v4429_v13 = vadd.f32 %v4283_v34, %v1718_v30  ;;  %v1717_v32 = vmul.f32 %v4276_v16, %v1668_v57  ;;  %v1799_v0 = vsel %vm515_vm1, %v4467_v6, 0.0 }
 0x3eb   : > { %v1683_v20 = vpop.permute.xlu0 %1682  ;;  %1788 = vadd.xlane.f32.xlu0 %v1787_v58 }
 0x3ec   : > { %v1720_v22 = vmul.f32 %v4276_v16, %v1683_v20  ;;  %v4439_v18 = vadd.f32 %v4283_v34, %v1717_v32  ;;  %v1844_v53 = vsel %vm515_vm1, %v4429_v13, 0.0 }
 0x3ed   : > { %1845 = vadd.xlane.f32.xlu1 %v1844_v53  ;;  %v1678_v19 = vpop.permute.xlu1 %1677 }
 0x3ee   : > { %v1719_v54 = vmul.f32 %v4276_v16, %v1678_v19  ;;  %v1841_v47 = vsel %vm515_vm1, %v4439_v18, 0.0  ;;  %v4451_v37 = vadd.f32 %v4283_v34, %v1720_v22 }
 0x3ef   : > { %1842 = vadd.xlane.f32.xlu0 %v1841_v47 }
 0x3f0   : > { %v4457_v48 = vadd.f32 %v4283_v34, %v1719_v54  ;;  %v1850_v12 = vsel %vm515_vm1, %v4451_v37, 0.0 }
 0x3f1   : > { %1797 = vadd.xlane.f32.xlu1 %v1796_v61 }
 0x3f2   : > { %v1847_v16 = vsel %vm515_vm1, %v4457_v48, 0.0 }
 0x3f3   : > { %1794 = vadd.xlane.f32.xlu0 %v1793_v51 }
 0x3f5   : > { %1851 = vadd.xlane.f32.xlu1 %v1850_v12 }
 0x3f7   : > { %1848 = vadd.xlane.f32.xlu0 %v1847_v16 }
 0x3f9   : > { %1803 = vadd.xlane.f32.xlu1 %v1802_v44 }
 0x3fb   : > { %1800 = vadd.xlane.f32.xlu0 %v1799_v0 }
 0x43c   : > { %v1807_v26 = vpop.xlane.xlu1 %1806 }
 0x43d   : > { %v1869_v9 = vmul.f32 0.03125, %v1807_v26 }
 0x43f   : > { %v4476_v23 = vsub.f32 %v4286_v29, %v1869_v9 }
 0x440   : > { %v1762_v50 = vpop.xlane.xlu1 %1761 }
 0x441   : > { %v1933_v34 = vmul.f32 %v4476_v23, %v4476_v23  ;;  %v1854_v36 = vmul.f32 0.03125, %v1762_v50 }
 0x443   : > { %v1997_v33 = vsel %vm515_vm1, %v1933_v34, 0.0  ;;  %v1810_v40 = vpop.xlane.xlu0 %1809  ;;  %v4485_v30 = vsub.f32 %v4291_v8, %v1854_v36 }
 0x444   : > { %1998 = vadd.xlane.f32.xlu0 %v1997_v33  ;;  %v1870_v17 = vmul.f32 0.03125, %v1810_v40 }
 0x445   : > { %v1918_v58 = vmul.f32 %v4485_v30, %v4485_v30 }
 0x446   : > { %v4482_v11 = vsub.f32 %v4298_v3, %v1870_v17 }
 0x447   : > { %v1759_v1 = vpop.xlane.xlu0 %1758  ;;  %v1952_v22 = vsel %vm515_vm1, %v1918_v58, 0.0 }
 0x448   : > { %v1853_v57 = vmul.f32 0.03125, %v1759_v1  ;;  %v1934_v29 = vmul.f32 %v4482_v11, %v4482_v11 }
 0x44a   : > { %v4490_v4 = vsub.f32 %v4303_v7, %v1853_v57  ;;  %v2000_v32 = vsel %vm515_vm1, %v1934_v29, 0.0 }
 0x44b   : > { %2001 = vadd.xlane.f32.xlu1 %v2000_v32 }
 0x44c   : > { %v1917_v3 = vmul.f32 %v4490_v4, %v4490_v4 }
 0x44e   : > { %v1949_v8 = vsel %vm515_vm1, %v1917_v3, 0.0 }
 0x44f   : > { %v1816_v20 = vpop.xlane.xlu1 %1815  ;;  %1950 = vadd.xlane.f32.xlu0 %v1949_v8  ;;  %1953 = vadd.xlane.f32.xlu1 %v1952_v22 }
 0x450   : > { %v1872_v53 = vmul.f32 0.03125, %v1816_v20 }
 0x452   : > { %v4500_v7 = vsub.f32 %v4310_v10, %v1872_v53 }
 0x453   : > { %v1768_v54 = vpop.xlane.xlu1 %1767 }
 0x454   : > { %v1813_v19 = vpop.xlane.xlu0 %1812  ;;  %v1856_v24 = vmul.f32 0.03125, %v1768_v54  ;;  %v1936_v61 = vmul.f32 %v4500_v7, %v4500_v7 }
 0x455   : > { %v1871_v47 = vmul.f32 0.03125, %v1813_v19 }
 0x456   : > { %v4508_v51 = vsub.f32 %v4313_v15, %v1856_v24  ;;  %v2006_v12 = vsel %vm515_vm1, %v1936_v61, 0.0 }
 0x457   : > { %v4505_v62 = vsub.f32 %v4320_v27, %v1871_v47  ;;  %2007 = vadd.xlane.f32.xlu1 %v2006_v12  ;;  %v1822_v44 = vpop.xlane.xlu1 %1821 }
 0x458   : > { %v1765_v16 = vpop.xlane.xlu0 %1764  ;;  %v1874_v0 = vmul.f32 0.03125, %v1822_v44  ;;  %v1920_v9 = vmul.f32 %v4508_v51, %v4508_v51 }
 0x459   : > { %v1855_v10 = vmul.f32 0.03125, %v1765_v16  ;;  %v1935_v26 = vmul.f32 %v4505_v62, %v4505_v62 }
 0x45a   : > { %v4519_v27 = vsub.f32 %v4332_v63, %v1874_v0  ;;  %v1958_v34 = vsel %vm515_vm1, %v1920_v9, 0.0 }
 0x45b   : > { %v4516_v50 = vsub.f32 %v4324_v60, %v1855_v10  ;;  %v2003_v15 = vsel %vm515_vm1, %v1935_v26, 0.0  ;;  %1959 = vadd.xlane.f32.xlu1 %v1958_v34  ;;  %v1774_v33 = vpop.xlane.xlu1 %1773 }
 0x45c   : > { %v1819_v36 = vpop.xlane.xlu0 %1818  ;;  %2004 = vadd.xlane.f32.xlu0 %v2003_v15  ;;  %v1858_v17 = vmul.f32 0.03125, %v1774_v33  ;;  %v1938_v60 = vmul.f32 %v4519_v27, %v4519_v27 }
 0x45d   : > { %v1873_v40 = vmul.f32 0.03125, %v1819_v36  ;;  %v1919_v1 = vmul.f32 %v4516_v50, %v4516_v50 }
 0x45e   : > { %v4531_v63 = vsub.f32 %v4337_v46, %v1858_v17  ;;  %v2012_v32 = vsel %vm515_vm1, %v1938_v60, 0.0 }
 0x45f   : > { %v4528_v57 = vsub.f32 %v4344_v5, %v1873_v40  ;;  %v1955_v29 = vsel %vm515_vm1, %v1919_v1, 0.0  ;;  %2013 = vadd.xlane.f32.xlu1 %v2012_v32  ;;  %v1828_v3 = vpop.xlane.xlu1 %1827 }
 0x460   : > { %v1771_v58 = vpop.xlane.xlu0 %1770  ;;  %1956 = vadd.xlane.f32.xlu0 %v1955_v29  ;;  %v1876_v8 = vmul.f32 0.03125, %v1828_v3  ;;  %v1922_v5 = vmul.f32 %v4531_v63, %v4531_v63 }
 0x461   : > { %v1857_v20 = vmul.f32 0.03125, %v1771_v58  ;;  %v1937_v22 = vmul.f32 %v4528_v57, %v4528_v57 }
 0x462   : > { %v4543_v46 = vsub.f32 %v4356_v43, %v1876_v8  ;;  %v1964_v54 = vsel %vm515_vm1, %v1922_v5, 0.0 }
 0x463   : > { %v4540_v53 = vsub.f32 %v4348_v2, %v1857_v20  ;;  %v2009_v19 = vsel %vm515_vm1, %v1937_v22, 0.0  ;;  %1965 = vadd.xlane.f32.xlu1 %v1964_v54  ;;  %v1780_v24 = vpop.xlane.xlu1 %1779 }
 0x464   : > { %v1825_v47 = vpop.xlane.xlu0 %1824  ;;  %2010 = vadd.xlane.f32.xlu0 %v2009_v19  ;;  %v1860_v12 = vmul.f32 0.03125, %v1780_v24  ;;  %v1940_v2 = vmul.f32 %v4543_v46, %v4543_v46 }
 0x465   : > { %v1875_v61 = vmul.f32 0.03125, %v1825_v47  ;;  %v1921_v16 = vmul.f32 %v4540_v53, %v4540_v53 }
 0x466   : > { %v4555_v43 = vsub.f32 %v4361_v41, %v1860_v12  ;;  %v2018_v0 = vsel %vm515_vm1, %v1940_v2, 0.0 }
 0x467   : > { %v4552_v44 = vsub.f32 %v4368_v38, %v1875_v61  ;;  %v1961_v10 = vsel %vm515_vm1, %v1921_v16, 0.0  ;;  %2019 = vadd.xlane.f32.xlu1 %v2018_v0 }
 0x468   : > { %v1777_v26 = vpop.xlane.xlu0 %1776  ;;  %1962 = vadd.xlane.f32.xlu0 %v1961_v10  ;;  %v1924_v34 = vmul.f32 %v4555_v43, %v4555_v43 }
 0x469   : > { %v1859_v9 = vmul.f32 0.03125, %v1777_v26  ;;  %v1939_v15 = vmul.f32 %v4552_v44, %v4552_v44 }
 0x46a   : > { %v1834_v36 = vpop.xlane.xlu1 %1833  ;;  %v1970_v40 = vsel %vm515_vm1, %v1924_v34, 0.0 }
 0x46b   : > { %v4564_v38 = vsub.f32 %v4371_v28, %v1859_v9  ;;  %v1878_v41 = vmul.f32 0.03125, %v1834_v36  ;;  %v2015_v33 = vsel %vm515_vm1, %v1939_v15, 0.0  ;;  %1971 = vadd.xlane.f32.xlu1 %v1970_v40 }
 0x46c   : > { %v1831_v17 = vpop.xlane.xlu0 %1830  ;;  %2016 = vadd.xlane.f32.xlu0 %v2015_v33 }
 0x46d   : > { %v4569_v1 = vsub.f32 %v4381_v35, %v1878_v41  ;;  %v1877_v60 = vmul.f32 0.03125, %v1831_v17  ;;  %v1923_v29 = vmul.f32 %v4564_v38, %v4564_v38 }
 0x46e   : > { %v1786_v32 = vpop.xlane.xlu1 %1785 }
 0x46f   : > { %v4574_v58 = vsub.f32 %v4390_v56, %v1877_v60  ;;  %v1862_v28 = vmul.f32 0.03125, %v1786_v32  ;;  %v1967_v3 = vsel %vm515_vm1, %v1923_v29, 0.0  ;;  %v1942_v20 = vmul.f32 %v4569_v1, %v4569_v1 }
 0x470   : > { %v1783_v8 = vpop.xlane.xlu0 %1782  ;;  %1968 = vadd.xlane.f32.xlu0 %v1967_v3 }
 0x471   : > { %v4580_v22 = vsub.f32 %v4387_v42, %v1862_v28  ;;  %v1861_v35 = vmul.f32 0.03125, %v1783_v8  ;;  %v2024_v5 = vsel %vm515_vm1, %v1942_v20, 0.0  ;;  %v1941_v19 = vmul.f32 %v4574_v58, %v4574_v58 }
 0x472   : > { %2025 = vadd.xlane.f32.xlu1 %v2024_v5  ;;  %v1840_v56 = vpop.xlane.xlu1 %1839 }
 0x473   : > { %v4586_v54 = vsub.f32 %v4395_v25, %v1861_v35  ;;  %v1880_v47 = vmul.f32 0.03125, %v1840_v56  ;;  %v2021_v24 = vsel %vm515_vm1, %v1941_v19, 0.0  ;;  %v1926_v61 = vmul.f32 %v4580_v22, %v4580_v22 }
 0x474   : > { %v1837_v12 = vpop.xlane.xlu0 %1836  ;;  %2022 = vadd.xlane.f32.xlu0 %v2021_v24 }
 0x475   : > { %v4592_v42 = vsub.f32 %v4405_v55, %v1880_v47  ;;  %v1879_v16 = vmul.f32 0.03125, %v1837_v12  ;;  %v1976_v2 = vsel %vm515_vm1, %v1926_v61, 0.0  ;;  %v1925_v10 = vmul.f32 %v4586_v54, %v4586_v54 }
 0x476   : > { %1977 = vadd.xlane.f32.xlu1 %v1976_v2  ;;  %v1792_v25 = vpop.xlane.xlu1 %1791 }
 0x477   : > { %v4598_v0 = vsub.f32 %v4414_v39, %v1879_v16  ;;  %v1864_v26 = vmul.f32 0.03125, %v1792_v25  ;;  %v1973_v9 = vsel %vm515_vm1, %v1925_v10, 0.0  ;;  %v1944_v15 = vmul.f32 %v4592_v42, %v4592_v42 }
 0x478   : > { %v1789_v34 = vpop.xlane.xlu0 %1788  ;;  %1974 = vadd.xlane.f32.xlu0 %v1973_v9 }
 0x479   : > { %v4604_v55 = vsub.f32 %v4411_v45, %v1864_v26  ;;  %v1863_v36 = vmul.f32 0.03125, %v1789_v34  ;;  %v2030_v41 = vsel %vm515_vm1, %v1944_v15, 0.0  ;;  %v1943_v33 = vmul.f32 %v4598_v0, %v4598_v0 }
 0x47a   : > { %2031 = vadd.xlane.f32.xlu1 %v2030_v41  ;;  %v1846_v39 = vpop.xlane.xlu1 %1845 }
 0x47b   : > { %v4610_v40 = vsub.f32 %v4419_v59, %v1863_v36  ;;  %v1882_v17 = vmul.f32 0.03125, %v1846_v39  ;;  %v2027_v60 = vsel %vm515_vm1, %v1943_v33, 0.0  ;;  %v1928_v29 = vmul.f32 %v4604_v55, %v4604_v55 }
 0x47c   : > { %v1843_v32 = vpop.xlane.xlu0 %1842  ;;  %2028 = vadd.xlane.f32.xlu0 %v2027_v60 }
 0x47d   : > { %v4616_v45 = vsub.f32 %v4429_v13, %v1882_v17  ;;  %v1881_v28 = vmul.f32 0.03125, %v1843_v32  ;;  %v1982_v3 = vsel %vm515_vm1, %v1928_v29, 0.0  ;;  %v1927_v20 = vmul.f32 %v4610_v40, %v4610_v40 }
 0x47e   : > { %1983 = vadd.xlane.f32.xlu1 %v1982_v3  ;;  %v1798_v59 = vpop.xlane.xlu1 %1797 }
 0x47f   : > { %v4622_v8 = vsub.f32 %v4439_v18, %v1881_v28  ;;  %v1866_v35 = vmul.f32 0.03125, %v1798_v59  ;;  %v1979_v5 = vsel %vm515_vm1, %v1927_v20, 0.0  ;;  %v1946_v19 = vmul.f32 %v4616_v45, %v4616_v45 }
 0x480   : > { %v1795_v56 = vpop.xlane.xlu0 %1794  ;;  %1980 = vadd.xlane.f32.xlu0 %v1979_v5 }
 0x481   : > { %v4628_v13 = vsub.f32 %v4435_v21, %v1866_v35  ;;  %v1865_v47 = vmul.f32 0.03125, %v1795_v56  ;;  %v2036_v24 = vsel %vm515_vm1, %v1946_v19, 0.0  ;;  %v1945_v61 = vmul.f32 %v4622_v8, %v4622_v8 }
 0x482   : > { %2037 = vadd.xlane.f32.xlu1 %v2036_v24  ;;  %v1852_v18 = vpop.xlane.xlu1 %1851 }
 0x483   : > { %v4634_v12 = vsub.f32 %v4444_v31, %v1865_v47  ;;  %v1884_v16 = vmul.f32 0.03125, %v1852_v18  ;;  %v2033_v2 = vsel %vm515_vm1, %v1945_v61, 0.0  ;;  %v1930_v10 = vmul.f32 %v4628_v13, %v4628_v13 }
 0x484   : > { %v1849_v25 = vpop.xlane.xlu0 %1848  ;;  %2034 = vadd.xlane.f32.xlu0 %v2033_v2  ;;  %v3463_v2 = vmov 1  }
 0x485   : > { %v4640_v21 = vsub.f32 %v4451_v37, %v1884_v16  ;;  %v1883_v26 = vmul.f32 0.03125, %v1849_v25  ;;  %v1988_v9 = vsel %vm515_vm1, %v1930_v10, 0.0  ;;  %v1929_v15 = vmul.f32 %v4634_v12, %v4634_v12  ;;  %3011 = vset.pattern.permute.xlu0 %v3463_v2 }
 0x486   : > { %1989 = vadd.xlane.f32.xlu1 %v1988_v9  ;;  %v1804_v31 = vpop.xlane.xlu1 %1803  ;;  %v4677_v9 = vld [vmem:[%s4943_s1 + $0x16] ss:$0 sm:$0xff] }
 0x487   : > { %v4646_v34 = vsub.f32 %v4457_v48, %v1883_v26  ;;  %v1868_v36 = vmul.f32 0.03125, %v1804_v31  ;;  %v1985_v41 = vsel %vm515_vm1, %v1929_v15, 0.0  ;;  %v1948_v33 = vmul.f32 %v4640_v21, %v4640_v21  ;;  %v3396_v15 = vld [vmem:[%s4943_s1 + $0x19] sm:$0x1] }
 0x488   : > { %v1801_v39 = vpop.xlane.xlu0 %1800  ;;  %1986 = vadd.xlane.f32.xlu0 %v1985_v41 }
 0x489   : > { %v4652_v37 = vsub.f32 %v4462_v49, %v1868_v36  ;;  %v1867_v17 = vmul.f32 0.03125, %v1801_v39  ;;  %v2042_v60 = vsel %vm515_vm1, %v1948_v33, 0.0  ;;  %v1947_v29 = vmul.f32 %v4646_v34, %v4646_v34  ;;  %v4686_v36 = vld [vmem:[%s4943_s1 + $0x17] ss:$0 sm:$0xff] }
 0x48a   : > { %2043 = vadd.xlane.f32.xlu1 %v2042_v60 }
 0x48b   : > { %v4658_v48 = vsub.f32 %v4467_v6, %v1867_v17  ;;  %v2039_v32 = vsel %vm515_vm1, %v1947_v29, 0.0  ;;  %v1932_v28 = vmul.f32 %v4652_v37, %v4652_v37  ;;  %v4670_v6 = vld [vmem:[%s4943_s1 + $0x18] sm:$0x1] }
 0x48c   : > { %2040 = vadd.xlane.f32.xlu0 %v2039_v32  ;;  %2861 = vmatprep.mubr.msk.f32.mxu1 %vm515_vm1, %v4670_v6 }
 0x48d   : > { %v1994_v3 = vsel %vm515_vm1, %v1932_v28, 0.0  ;;  %v1931_v49 = vmul.f32 %v4658_v48, %v4658_v48 }
 0x48e   : > { %1995 = vadd.xlane.f32.xlu1 %v1994_v3 }
 0x48f   : > { %v1991_v20 = vsel %vm515_vm1, %v1931_v49, 0.0 }
 0x490   : > { %1992 = vadd.xlane.f32.xlu0 %v1991_v20 }
 0x4a6   : > { %2407 = vperm.xlu0 %3011, %v3396_v15  }
 0x4d1   : > { %v1999_v59 = vpop.xlane.xlu0 %1998 }
 0x4d2   : > { %v2061_v35 = vmul.f32 0.03125, %v1999_v59 }
 0x4d4   : > { %v2093_v5 = vadd.f32 1e-05, %v2061_v35 }
 0x4d6   : > { %3268 = vrsqrt.f32 %v2093_v5 }
 0x4d8   : > { %v2002_v19 = vpop.xlane.xlu1 %2001 }
 0x4d9   : > { %v2062_v56 = vmul.f32 0.03125, %v2002_v19 }
 0x4db   : > { %v2094_v47 = vadd.f32 1e-05, %v2062_v56 }
 0x4dc   : > { %v1951_v24 = vpop.xlane.xlu0 %1950  ;;  %v1954_v61 = vpop.xlane.xlu1 %1953 }
 0x4dd   : > { %3270 = vrsqrt.f32 %v2094_v47  ;;  %v2045_v18 = vmul.f32 0.03125, %v1951_v24  ;;  %v2046_v16 = vmul.f32 0.03125, %v1954_v61 }
 0x4df   : > { %v2077_v25 = vadd.f32 1e-05, %v2045_v18  ;;  %v2078_v26 = vadd.f32 1e-05, %v2046_v16 }
 0x4e0   : > { %v3269_v10 = vpop.eup %3268 }
 0x4e1   : > { %v2157_v31 = vmul.f32 %v3269_v10, %v4476_v23  ;;  %3272 = vrsqrt.f32 %v2077_v25 }
 0x4e2   : > { %3274 = vrsqrt.f32 %v2078_v26 }
 0x4e3   : > { %v2193_v41 = vmul.f32 %v4677_v9, %v2157_v31 }
 0x4e4   : > { %v2008_v33 = vpop.xlane.xlu1 %2007 }
 0x4e5   : > { %v2064_v39 = vmul.f32 0.03125, %v2008_v33  ;;  %v4690_v17 = vadd.f32 %v4686_v36, %v2193_v41 }
 0x4e7   : > { %v2096_v60 = vadd.f32 1e-05, %v2064_v39  ;;  %v3271_v29 = vpop.eup %3270  ;;  %v2293_v23 = vmul.f32 0.70710677, %v4690_v17 }
 0x4e8   : > { %v1960_v28 = vpop.xlane.xlu1 %1959  ;;  %v2158_v20 = vmul.f32 %v3271_v29, %v4482_v11 }
 0x4e9   : > { %v2005_v32 = vpop.xlane.xlu0 %2004  ;;  %3276 = vrsqrt.f32 %v2096_v60  ;;  %v2048_v49 = vmul.f32 0.03125, %v1960_v28 }
 0x4ea   : > { %v2063_v3 = vmul.f32 0.03125, %v2005_v32  ;;  %v2194_v5 = vmul.f32 %v4677_v9, %v2158_v20  ;;  %3278 = verf.f32 %v2293_v23 }
 0x4eb   : > { %v2080_v35 = vadd.f32 1e-05, %v2048_v49  ;;  %v3273_v19 = vpop.eup %3272 }
 0x4ec   : > { %v2095_v59 = vadd.f32 1e-05, %v2063_v3  ;;  %v2014_v47 = vpop.xlane.xlu1 %2013  ;;  %v3275_v24 = vpop.eup %3274  ;;  %v2141_v61 = vmul.f32 %v3273_v19, %v4490_v4  ;;  %v2230_v10 = vadd.f32 %v4686_v36, %v2194_v5 }
 0x4ed   : > { %v1957_v56 = vpop.xlane.xlu0 %1956  ;;  %v2066_v16 = vmul.f32 0.03125, %v2014_v47  ;;  %v2142_v2 = vmul.f32 %v3275_v24, %v4485_v30 }
 0x4ee   : > { %3280 = vrsqrt.f32 %v2095_v59  ;;  %v2047_v18 = vmul.f32 0.03125, %v1957_v56  ;;  %v2177_v25 = vmul.f32 %v4677_v9, %v2141_v61  ;;  %v2294_v41 = vmul.f32 0.70710677, %v2230_v10 }
 0x4ef   : > { %3282 = vrsqrt.f32 %v2080_v35  ;;  %v2098_v26 = vadd.f32 1e-05, %v2066_v16  ;;  %v2178_v33 = vmul.f32 %v4677_v9, %v2142_v2 }
 0x4f0   : > { %v2079_v11 = vadd.f32 1e-05, %v2047_v18  ;;  %v1966_v31 = vpop.xlane.xlu1 %1965  ;;  %v2213_v60 = vadd.f32 %v4686_v36, %v2177_v25 }
 0x4f1   : > { %v2011_v15 = vpop.xlane.xlu0 %2010  ;;  %v2050_v4 = vmul.f32 0.03125, %v1966_v31  ;;  %v4702_v29 = vadd.f32 %v4686_v36, %v2178_v33 }
 0x4f2   : > { %3284 = vrsqrt.f32 %v2079_v11  ;;  %v2065_v39 = vmul.f32 0.03125, %v2011_v15  ;;  %v2277_v20 = vmul.f32 0.70710677, %v2213_v60 }
 0x4f3   : > { %v3277_v30 = vpop.eup %3276  ;;  %v2082_v28 = vadd.f32 1e-05, %v2050_v4  ;;  %3286 = verf.f32 %v2294_v41  ;;  %v2278_v59 = vmul.f32 0.70710677, %v4702_v29 }
 0x4f4   : > { %v2097_v32 = vadd.f32 1e-05, %v2065_v39  ;;  %v2160_v23 = vmul.f32 %v3277_v30, %v4500_v7  ;;  %3288 = vrsqrt.f32 %v2098_v26  ;;  %v2020_v49 = vpop.xlane.xlu1 %2019  ;;  %v3279_v19 = vpop.eup %3278 }
 0x4f5   : > { %v1963_v3 = vpop.xlane.xlu0 %1962  ;;  %v2068_v5 = vmul.f32 0.03125, %v2020_v49  ;;  %v2357_v30 = vadd.f32 1.0, %v3279_v19  ;;  %v2261_v49 = vmul.f32 0.5, %v4690_v17 }
 0x4f6   : > { %3290 = vrsqrt.f32 %v2097_v32  ;;  %v2049_v35 = vmul.f32 0.03125, %v1963_v3  ;;  %v2196_v56 = vmul.f32 %v4677_v9, %v2160_v23 }
 0x4f7   : > { %3292 = vrsqrt.f32 %v2082_v28  ;;  %v2100_v7 = vadd.f32 1e-05, %v2068_v5  ;;  %v2262_v5 = vmul.f32 0.5, %v2230_v10 }
 0x4f8   : > { %v3281_v47 = vpop.eup %3280  ;;  %v2081_v24 = vadd.f32 1e-05, %v2049_v35  ;;  %3294 = verf.f32 %v2277_v20  ;;  %v1972_v2 = vpop.xlane.xlu1 %1971  ;;  %v2232_v11 = vadd.f32 %v4686_v36, %v2196_v56 }
 0x4f9   : > { %v3283_v61 = vpop.eup %3282  ;;  %v2159_v18 = vmul.f32 %v3281_v47, %v4505_v62  ;;  %v2017_v16 = vpop.xlane.xlu0 %2016  ;;  %3296 = verf.f32 %v2278_v59  ;;  %v2052_v15 = vmul.f32 0.03125, %v1972_v2  ;;  %v2245_v2 = vmul.f32 0.5, %v2213_v60 }
 0x4fa   : > { %v2144_v25 = vmul.f32 %v3283_v61, %v4508_v51  ;;  %v2067_v26 = vmul.f32 0.03125, %v2017_v16  ;;  %v2296_v41 = vmul.f32 0.70710677, %v2232_v11  ;;  %3298 = vrsqrt.f32 %v2081_v24 }
 0x4fb   : > { %v2195_v31 = vmul.f32 %v4677_v9, %v2159_v18  ;;  %v2084_v4 = vadd.f32 1e-05, %v2052_v15  ;;  %3300 = vrsqrt.f32 %v2100_v7  ;;  %v2389_v7 = vmul.f32 %v2357_v30, %v2261_v49 }
 0x4fc   : > { %v3285_v33 = vpop.eup %3284  ;;  %v2099_v39 = vadd.f32 1e-05, %v2067_v26  ;;  %v2180_v62 = vmul.f32 %v4677_v9, %v2144_v25  ;;  %3302 = verf.f32 %v2296_v41 }
 0x4fd   : > { %v2143_v32 = vmul.f32 %v3285_v33, %v4516_v50  ;;  %v1969_v28 = vpop.xlane.xlu0 %1968  ;;  %v2231_v23 = vadd.f32 %v4686_v36, %v2195_v31  ;;  %v3287_v3 = vpop.eup %3286 }
 0x4fe   : > { %v2051_v51 = vmul.f32 0.03125, %v1969_v28  ;;  %v3289_v20 = vpop.eup %3288  ;;  %3304 = vrsqrt.f32 %v2099_v39  ;;  %v2358_v19 = vadd.f32 1.0, %v3287_v3  ;;  %v2216_v17 = vadd.f32 %v4686_v36, %v2180_v62 }
 0x4ff   : > { %v2179_v59 = vmul.f32 %v4677_v9, %v2143_v32  ;;  %v2026_v35 = vpop.xlane.xlu1 %2025  ;;  %3306 = vrsqrt.f32 %v2084_v4  ;;  %v2295_v24 = vmul.f32 0.70710677, %v2231_v23  ;;  %v2162_v30 = vmul.f32 %v3289_v20, %v4519_v27 }
 0x500   : > { %v3291_v56 = vpop.eup %3290  ;;  %v2083_v47 = vadd.f32 1e-05, %v2051_v51  ;;  %v2070_v50 = vmul.f32 0.03125, %v2026_v35  ;;  %v2390_v16 = vmul.f32 %v2358_v19, %v2262_v5  ;;  %v2246_v32 = vmul.f32 0.5, %v4702_v29 }
 0x501   : > { %v3293_v61 = vpop.eup %3292  ;;  %v2023_v18 = vpop.xlane.xlu0 %2022  ;;  %v2161_v26 = vmul.f32 %v3291_v56, %v4528_v57  ;;  %v2215_v31 = vadd.f32 %v4686_v36, %v2179_v59  ;;  %v2264_v59 = vmul.f32 0.5, %v2232_v11 }
 0x502   : > { %v3295_v25 = vpop.eup %3294  ;;  %3308 = vrsqrt.f32 %v2083_v47  ;;  %v2069_v15 = vmul.f32 0.03125, %v2023_v18  ;;  %v2102_v33 = vadd.f32 1e-05, %v2070_v50  ;;  %v2919_v4 = vpack.c.bf16 %v2390_v16, %v2389_v7 }
 0x503   : > { %v3297_v41 = vpop.eup %3296  ;;  %v1978_v39 = vpop.xlane.xlu1 %1977  ;;  %v2341_v60 = vadd.f32 1.0, %v3295_v25  ;;  %3310 = verf.f32 %v2295_v24  ;;  %v2146_v28 = vmul.f32 %v3293_v61, %v4531_v63  ;;  %v2197_v5 = vmul.f32 %v4677_v9, %v2161_v26 }
 0x504   : > { %v2101_v62 = vadd.f32 1e-05, %v2069_v15  ;;  %v2054_v57 = vmul.f32 0.03125, %v1978_v39  ;;  %2921 = vmatprep.subr.msk.bf16.mxu1 %vm4720_vm2, %v2919_v4  ;;  %v2342_v51 = vadd.f32 1.0, %v3297_v41  ;;  %v3299_v35 = vpop.eup %3298  ;;  %v2263_v47 = vmul.f32 0.5, %v2231_v23 }
 0x505   : > { %v1975_v3 = vpop.xlane.xlu0 %1974  ;;  %v2373_v49 = vmul.f32 %v2341_v60, %v2245_v2  ;;  %v3301_v27 = vpop.eup %3300  ;;  %3312 = vrsqrt.f32 %v2102_v33  ;;  %v2279_v29 = vmul.f32 0.70710677, %v2215_v31  ;;  %v2280_v24 = vmul.f32 0.70710677, %v2216_v17 }
 0x506   : > { %v2086_v19 = vadd.f32 1e-05, %v2054_v57  ;;  %v2053_v56 = vmul.f32 0.03125, %v1975_v3  ;;  %v2374_v50 = vmul.f32 %v2342_v51, %v2246_v32  ;;  %v3303_v63 = vpop.eup %3302  ;;  %v2198_v61 = vmul.f32 %v4677_v9, %v2162_v30 }
 0x507   : > { %v2032_v20 = vpop.xlane.xlu1 %2031  ;;  %3314 = vrsqrt.f32 %v2101_v62  ;;  %v4732_v7 = vmul.f32 0.5, %v2216_v17  ;;  %v4735_v16 = vmul.f32 %v4677_v9, %v2146_v28  ;;  %v2145_v15 = vmul.f32 %v3299_v35, %v4540_v53 }
 0x508   : > { %v2072_v18 = vmul.f32 0.03125, %v2032_v20  ;;  %v3305_v11 = vpop.eup %3304  ;;  %v2085_v2 = vadd.f32 1e-05, %v2053_v56  ;;  %v2922_v23 = vpack.c.bf16 %v2374_v50, %v2373_v49  ;;  %3316 = verf.f32 %v2279_v29 }
 0x509   : > { %v2029_v25 = vpop.xlane.xlu0 %2028  ;;  %v3307_v26 = vpop.eup %3306  ;;  %3318 = vrsqrt.f32 %v2086_v19  ;;  %v2360_v17 = vadd.f32 1.0, %v3303_v63  ;;  %v4740_v4 = vmul.f32 0.5, %v2215_v31  ;;  %v2233_v60 = vadd.f32 %v4686_v36, %v2197_v5 }
 0x50a   : > { %v2104_v41 = vadd.f32 1e-05, %v2072_v18  ;;  %v2071_v33 = vmul.f32 0.03125, %v2029_v25  ;;  %2924 = vmatpush3.bf16.xpose.msk.msra.mxu1 %vm4720_vm2, %v2922_v23  ;;  %3320 = verf.f32 %v2280_v24  ;;  %v2164_v62 = vmul.f32 %v3301_v27, %v4543_v46 }
 0x50b   : > { %v1984_v39 = vpop.xlane.xlu1 %1983  ;;  %v2163_v57 = vmul.f32 %v3305_v11, %v4552_v44  ;;  %v2148_v3 = vmul.f32 %v3307_v26, %v4555_v43  ;;  %3322 = vrsqrt.f32 %v2085_v2  ;;  %v2234_v49 = vadd.f32 %v4686_v36, %v2198_v61 }
 0x50c   : > { %v3309_v30 = vpop.eup %3308  ;;  %v2103_v32 = vadd.f32 1e-05, %v2071_v33  ;;  %v2056_v53 = vmul.f32 0.03125, %v1984_v39  ;;  %v2297_v35 = vmul.f32 0.70710677, %v2233_v60  ;;  %3324 = vrsqrt.f32 %v2104_v41 }
 0x50d   : > { %v3311_v28 = vpop.eup %3310  ;;  %v1981_v51 = vpop.xlane.xlu0 %1980  ;;  %v2181_v5 = vmul.f32 %v4677_v9, %v2145_v15  ;;  %v2147_v46 = vmul.f32 %v3309_v30, %v4564_v38  ;;  %v2392_v44 = vmul.f32 %v2360_v17, %v2264_v59  ;;  %v2298_v20 = vmul.f32 0.70710677, %v2234_v49 }
 0x50e   : > { %v2088_v31 = vadd.f32 1e-05, %v2056_v53  ;;  %v2055_v19 = vmul.f32 0.03125, %v1981_v51  ;;  %v2359_v56 = vadd.f32 1.0, %v3311_v28  ;;  %3326 = vrsqrt.f32 %v2103_v32 }
 0x50f   : > { %v2038_v27 = vpop.xlane.xlu1 %2037  ;;  %v3313_v24 = vpop.eup %3312  ;;  %v4750_v63 = vmul.f32 %v4677_v9, %v2164_v62  ;;  %v4753_v61 = vmul.f32 %v4677_v9, %v2163_v57  ;;  %v4756_v18 = vmul.f32 %v4677_v9, %v2148_v3  ;;  %3328 = verf.f32 %v2297_v35 }
 0x510   : > { %v2087_v50 = vadd.f32 1e-05, %v2055_v19  ;;  %v2074_v29 = vmul.f32 0.03125, %v2038_v27  ;;  %v2391_v43 = vmul.f32 %v2359_v56, %v2263_v47  ;;  %3330 = vrsqrt.f32 %v2088_v31 }
 0x511   : > { %v2035_v11 = vpop.xlane.xlu0 %2034  ;;  %v3315_v38 = vpop.eup %3314  ;;  %v4759_v47 = vmul.f32 %v4677_v9, %v2147_v46  ;;  %v2265_v15 = vmul.f32 0.5, %v2233_v60  ;;  %3332 = verf.f32 %v2298_v20  ;;  %v2217_v41 = vadd.f32 %v4686_v36, %v2181_v5 }
 0x512   : > { %v2106_v59 = vadd.f32 1e-05, %v2074_v29  ;;  %v2073_v2 = vmul.f32 0.03125, %v2035_v11  ;;  %v2925_v25 = vpack.c.bf16 %v2392_v44, %v2391_v43  ;;  %v3317_v23 = vpop.eup %3316  ;;  %3334 = vrsqrt.f32 %v2087_v50 }
 0x513   : > { %v1990_v26 = vpop.xlane.xlu1 %1989  ;;  %v3319_v33 = vpop.eup %3318  ;;  %v2343_v30 = vadd.f32 1.0, %v3317_v23  ;;  %v2166_v57 = vmul.f32 %v3313_v24, %v4569_v1  ;;  %v2165_v32 = vmul.f32 %v3315_v38, %v4574_v58  ;;  %v2266_v28 = vmul.f32 0.5, %v2234_v49 }
 0x514   : > { %v2105_v39 = vadd.f32 1e-05, %v2073_v2  ;;  %v2058_v17 = vmul.f32 0.03125, %v1990_v26  ;;  %2927 = vmatprep.subr.msk.bf16.mxu1 %vm4720_vm2, %v2925_v25  ;;  %v3321_v62 = vpop.eup %3320  ;;  %v2218_v60 = vadd.f32 %v4686_v36, %v4735_v16  ;;  %3336 = vrsqrt.f32 %v2106_v59 }
 0x515   : > { %v1987_v53 = vpop.xlane.xlu0 %1986  ;;  %v2344_v35 = vadd.f32 1.0, %v3321_v62  ;;  %v3323_v31 = vpop.eup %3322  ;;  %v2150_v19 = vmul.f32 %v3319_v33, %v4580_v22  ;;  %v2375_v5 = vmul.f32 %v2343_v30, %v4740_v4  ;;  %v2281_v46 = vmul.f32 0.70710677, %v2217_v41 }
 0x516   : > { %v2090_v3 = vadd.f32 1e-05, %v2058_v17  ;;  %v2057_v51 = vmul.f32 0.03125, %v1987_v53  ;;  %3338 = vrsqrt.f32 %v2105_v39  ;;  %v3325_v1 = vpop.eup %3324  ;;  %v4772_v16 = vmul.f32 %v4677_v9, %v2166_v57 }
 0x517   : > { %v2044_v56 = vpop.xlane.xlu1 %2043  ;;  %v2376_v49 = vmul.f32 %v2344_v35, %v4732_v7  ;;  %v2201_v44 = vmul.f32 %v4677_v9, %v2165_v32  ;;  %v2282_v50 = vmul.f32 0.70710677, %v2218_v60  ;;  %v4776_v11 = vmul.f32 %v4677_v9, %v2150_v19 }
 0x518   : > { %3340 = vrsqrt.f32 %v2090_v3  ;;  %v2089_v58 = vadd.f32 1e-05, %v2057_v51  ;;  %v2076_v27 = vmul.f32 0.03125, %v2044_v56  ;;  %v3327_v22 = vpop.eup %3326  ;;  %v2149_v38 = vmul.f32 %v3323_v31, %v4586_v54 }
 0x519   : > { %v2041_v20 = vpop.xlane.xlu0 %2040  ;;  %3342 = verf.f32 %v2281_v46  ;;  %v2928_v43 = vpack.c.bf16 %v2376_v49, %v2375_v5  ;;  %v3329_v24 = vpop.eup %3328  ;;  %v2168_v7 = vmul.f32 %v3325_v1, %v4592_v42  ;;  %v2235_v33 = vadd.f32 %v4686_v36, %v4753_v61 }
 0x51a   : > { %3344 = vrsqrt.f32 %v2089_v58  ;;  %v2108_v29 = vadd.f32 1e-05, %v2076_v27  ;;  %v2075_v4 = vmul.f32 0.03125, %v2041_v20  ;;  %v3331_v2 = vpop.eup %3330  ;;  %v2361_v26 = vadd.f32 1.0, %v3329_v24 }
 0x51b   : > { %v1996_v59 = vpop.xlane.xlu1 %1995  ;;  %3346 = verf.f32 %v2282_v50  ;;  %2930 = vmatpush3.bf16.xpose.msk.msra.mxu1 %vm4720_vm2, %v2928_v43  ;;  %v3333_v39 = vpop.eup %3332  ;;  %v2249_v30 = vmul.f32 0.5, %v2217_v41  ;;  %v2250_v62 = vmul.f32 0.5, %v2218_v60  ;;  %v2236_v54 = vadd.f32 %v4686_v36, %v4750_v63 }
 0x51c   : > { %v2107_v25 = vadd.f32 1e-05, %v2075_v4  ;;  %v2060_v23 = vmul.f32 0.03125, %v1996_v59  ;;  %3348 = vrsqrt.f32 %v2108_v29  ;;  %v3335_v42 = vpop.eup %3334  ;;  %v2167_v57 = vmul.f32 %v3327_v22, %v4598_v0 }
 0x51d   : > { %v1993_v17 = vpop.xlane.xlu0 %1992  ;;  %v2362_v53 = vadd.f32 1.0, %v3333_v39  ;;  %v2393_v3 = vmul.f32 %v2361_v26, %v2265_v15  ;;  %v2185_v51 = vmul.f32 %v4677_v9, %v2149_v38  ;;  %v4789_v35 = vmul.f32 %v4677_v9, %v2168_v7 }
 0x51e   : > { %v2092_v32 = vadd.f32 1e-05, %v2060_v23  ;;  %v2152_v61 = vmul.f32 %v3331_v2, %v4604_v55  ;;  %v2059_v31 = vmul.f32 0.03125, %v1993_v17  ;;  %v3337_v19 = vpop.eup %3336  ;;  %3350 = vrsqrt.f32 %v2107_v25 }
 0x51f   : > { %v2394_v41 = vmul.f32 %v2362_v53, %v2266_v28  ;;  %v2299_v60 = vmul.f32 0.70710677, %v2235_v33  ;;  %v2300_v56 = vmul.f32 0.70710677, %v2236_v54  ;;  %v2151_v5 = vmul.f32 %v3335_v42, %v4610_v40 }
 0x520   : > { %v3339_v63 = vpop.eup %3338  ;;  %3352 = vrsqrt.f32 %v2092_v32  ;;  %v2091_v0 = vadd.f32 1e-05, %v2059_v31  ;;  %v2219_v15 = vadd.f32 %v4686_v36, %v4759_v47  ;;  %v2203_v1 = vmul.f32 %v4677_v9, %v2167_v57 }
 0x521   : > { %v2931_v58 = vpack.c.bf16 %v2394_v41, %v2393_v3  ;;  %3354 = verf.f32 %v2299_v60  ;;  %v2220_v55 = vadd.f32 %v4686_v36, %v4756_v18  ;;  %v2188_v28 = vmul.f32 %v4677_v9, %v2152_v61 }
 0x522   : > { %v3341_v46 = vpop.eup %3340  ;;  %v2170_v49 = vmul.f32 %v3337_v19, %v4616_v45  ;;  %3356 = vrsqrt.f32 %v2091_v0  ;;  %v2267_v40 = vmul.f32 0.5, %v2235_v33  ;;  %v2283_v50 = vmul.f32 0.70710677, %v2219_v15 }
 0x523   : > { %v3343_v27 = vpop.eup %3342  ;;  %2933 = vmatprep.subr.msk.bf16.mxu1 %vm4720_vm2, %v2931_v58  ;;  %3358 = verf.f32 %v2300_v56  ;;  %v2237_v22 = vadd.f32 %v4686_v36, %v2201_v44  ;;  %v2187_v43 = vmul.f32 %v4677_v9, %v2151_v5  ;;  %v2169_v18 = vmul.f32 %v3339_v63, %v4622_v8 }
 0x524   : > { %v3345_v20 = vpop.eup %3344  ;;  %v2345_v47 = vadd.f32 1.0, %v3343_v27  ;;  %v2284_v4 = vmul.f32 0.70710677, %v2220_v55  ;;  %v2238_v45 = vadd.f32 %v4686_v36, %v4772_v16  ;;  %v2268_v7 = vmul.f32 0.5, %v2236_v54 }
 0x525   : > { %v3347_v29 = vpop.eup %3346  ;;  %3360 = verf.f32 %v2283_v50  ;;  %v2206_v2 = vmul.f32 %v4677_v9, %v2170_v49  ;;  %v2154_v25 = vmul.f32 %v3341_v46, %v4628_v13  ;;  %v2153_v44 = vmul.f32 %v3345_v20, %v4634_v12 }
 0x526   : > { %v2346_v24 = vadd.f32 1.0, %v3347_v29  ;;  %v2377_v38 = vmul.f32 %v2345_v47, %v2249_v30  ;;  %v3349_v59 = vpop.eup %3348  ;;  %3362 = verf.f32 %v2284_v4  ;;  %v2301_v26 = vmul.f32 0.70710677, %v2237_v22 }
 0x527   : > { %v2302_v33 = vmul.f32 0.70710677, %v2238_v45  ;;  %v2221_v8 = vadd.f32 %v4686_v36, %v2185_v51  ;;  %v2205_v39 = vmul.f32 %v4677_v9, %v2169_v18  ;;  %v2251_v16 = vmul.f32 0.5, %v2219_v15 }
 0x528   : > { %v2378_v23 = vmul.f32 %v2346_v24, %v2250_v62  ;;  %v2222_v17 = vadd.f32 %v4686_v36, %v4776_v11  ;;  %v4815_v30 = vadd.f32 %v4686_v36, %v2203_v1  ;;  %v3351_v54 = vpop.eup %3350  ;;  %v2172_v13 = vmul.f32 %v3349_v59, %v4640_v21 }
 0x529   : > { %3364 = verf.f32 %v2301_v26  ;;  %v2285_v12 = vmul.f32 0.70710677, %v2221_v8  ;;  %v2190_v57 = vmul.f32 %v4677_v9, %v2154_v25  ;;  %v2252_v32 = vmul.f32 0.5, %v2220_v55 }
 0x52a   : > { %v2934_v42 = vpack.c.bf16 %v2378_v23, %v2377_v38  ;;  %v3353_v62 = vpop.eup %3352  ;;  %v2269_v53 = vmul.f32 0.5, %v2237_v22  ;;  %3366 = verf.f32 %v2302_v33  ;;  %v2189_v51 = vmul.f32 %v4677_v9, %v2153_v44 }
 0x52b   : > { %v3355_v3 = vpop.eup %3354  ;;  %v2286_v11 = vmul.f32 0.70710677, %v2222_v17  ;;  %3368 = verf.f32 %v2285_v12  ;;  %v4824_v21 = vadd.f32 %v4686_v36, %v4789_v35  ;;  %v2270_v19 = vmul.f32 0.5, %v2238_v45 }
 0x52c   : > { %2936 = vmatpush3.bf16.xpose.msk.msra.mxu1 %vm4720_vm2, %v2934_v42  ;;  %v3357_v61 = vpop.eup %3356  ;;  %v2363_v31 = vadd.f32 1.0, %v3355_v3  ;;  %v2303_v41 = vmul.f32 0.70710677, %v4815_v30  ;;  %v4828_v60 = vadd.f32 %v4686_v36, %v2187_v43  ;;  %v2208_v63 = vmul.f32 %v4677_v9, %v2172_v13 }
 0x52d   : > { %v3359_v56 = vpop.eup %3358  ;;  %v2171_v5 = vmul.f32 %v3351_v54, %v4646_v34  ;;  %3370 = verf.f32 %v2286_v11  ;;  %v2304_v0 = vmul.f32 0.70710677, %v4824_v21  ;;  %v4834_v35 = vadd.f32 %v4686_v36, %v2188_v28 }
 0x52e   : > { %v2364_v15 = vadd.f32 1.0, %v3359_v56  ;;  %v2395_v46 = vmul.f32 %v2363_v31, %v2267_v40  ;;  %3372 = verf.f32 %v2303_v41  ;;  %v2156_v58 = vmul.f32 %v3353_v62, %v4652_v37 }
 0x52f   : > { %v3361_v1 = vpop.eup %3360  ;;  %v2253_v55 = vmul.f32 0.5, %v2221_v8  ;;  %3374 = verf.f32 %v2304_v0  ;;  %v2287_v27 = vmul.f32 0.70710677, %v4828_v60  ;;  %v2155_v20 = vmul.f32 %v3357_v61, %v4658_v48 }
 0x530   : > { %v3363_v49 = vpop.eup %3362  ;;  %v2396_v34 = vmul.f32 %v2364_v15, %v2268_v7  ;;  %v2347_v47 = vadd.f32 1.0, %v3361_v1  ;;  %v2288_v50 = vmul.f32 0.70710677, %v4834_v35  ;;  %v4841_v40 = vadd.f32 %v4686_v36, %v2205_v39 }
 0x531   : > { %v2348_v22 = vadd.f32 1.0, %v3363_v49  ;;  %3376 = verf.f32 %v2287_v27  ;;  %v4844_v28 = vadd.f32 %v4686_v36, %v2206_v2  ;;  %v4847_v43 = vadd.f32 %v4686_v36, %v2189_v51 }
 0x532   : > { %v2937_v37 = vpack.c.bf16 %v2396_v34, %v2395_v46  ;;  %v2379_v29 = vmul.f32 %v2347_v47, %v2251_v16  ;;  %3378 = verf.f32 %v2288_v50  ;;  %v2207_v48 = vmul.f32 %v4677_v9, %v2171_v5 }
 0x533   : > { %v3365_v18 = vpop.eup %3364  ;;  %v2380_v4 = vmul.f32 %v2348_v22, %v2252_v32  ;;  %v2254_v45 = vmul.f32 0.5, %v2222_v17  ;;  %v2305_v24 = vmul.f32 0.70710677, %v4841_v40  ;;  %v2191_v7 = vmul.f32 %v4677_v9, %v2155_v20 }
 0x534   : > { %v3367_v38 = vpop.eup %3366  ;;  %2939 = vmatprep.subr.msk.bf16.mxu1 %vm4720_vm2, %v2937_v37  ;;  %v2365_v59 = vadd.f32 1.0, %v3365_v18  ;;  %v2306_v2 = vmul.f32 0.70710677, %v4844_v28  ;;  %v4856_v25 = vadd.f32 %v4686_v36, %v2190_v57  ;;  %v2289_v33 = vmul.f32 0.70710677, %v4847_v43 }
 0x535   : > { %v3369_v44 = vpop.eup %3368  ;;  %v2940_v23 = vpack.c.bf16 %v2380_v4, %v2379_v29  ;;  %v2366_v26 = vadd.f32 1.0, %v3367_v38  ;;  %3380 = verf.f32 %v2305_v24  ;;  %v2192_v8 = vmul.f32 %v4677_v9, %v2156_v58 }
 0x536   : > { %v2397_v39 = vmul.f32 %v2365_v59, %v2269_v53  ;;  %v2349_v16 = vadd.f32 1.0, %v3369_v44  ;;  %3382 = verf.f32 %v2306_v2  ;;  %v2290_v13 = vmul.f32 0.70710677, %v4856_v25 }
 0x537   : > { %v3371_v17 = vpop.eup %3370  ;;  %2942 = vmatpush3.bf16.xpose.msk.msra.mxu1 %vm4720_vm2, %v2940_v23  ;;  %v2398_v54 = vmul.f32 %v2366_v26, %v2270_v19  ;;  %3384 = verf.f32 %v2289_v33  ;;  %v2243_v42 = vadd.f32 %v4686_v36, %v2207_v48  ;;  %v2271_v32 = vmul.f32 0.5, %v4815_v30 }
 0x538   : > { %v3373_v12 = vpop.eup %3372  ;;  %v2350_v62 = vadd.f32 1.0, %v3371_v17  ;;  %v2381_v57 = vmul.f32 %v2349_v16, %v2253_v55  ;;  %v2244_v9 = vadd.f32 %v4686_v36, %v2208_v63  ;;  %3386 = verf.f32 %v2290_v13 }
 0x539   : > { %v3375_v53 = vpop.eup %3374  ;;  %v2943_v3 = vpack.c.bf16 %v2398_v54, %v2397_v39  ;;  %v2367_v51 = vadd.f32 1.0, %v3373_v12  ;;  %v2227_v11 = vadd.f32 %v4686_v36, %v2191_v7  ;;  %v2272_v31 = vmul.f32 0.5, %v4824_v21 }
 0x53a   : > { %v2382_v61 = vmul.f32 %v2350_v62, %v2254_v45  ;;  %v2368_v19 = vadd.f32 1.0, %v3375_v53  ;;  %v2307_v41 = vmul.f32 0.70710677, %v2243_v42  ;;  %v2308_v0 = vmul.f32 0.70710677, %v2244_v9 }
 0x53b   : > { %v3377_v56 = vpop.eup %3376  ;;  %2945 = vmatprep.subr.msk.bf16.mxu1 %vm4720_vm2, %v2943_v3  ;;  %v2399_v5 = vmul.f32 %v2367_v51, %v2271_v32  ;;  %v2228_v30 = vadd.f32 %v4686_v36, %v2192_v8  ;;  %v2255_v58 = vmul.f32 0.5, %v4828_v60  ;;  %v2291_v21 = vmul.f32 0.70710677, %v2227_v11 }
 0x53c   : > { %v3379_v63 = vpop.eup %3378  ;;  %v2946_v15 = vpack.c.bf16 %v2382_v61, %v2381_v57  ;;  %v2400_v46 = vmul.f32 %v2368_v19, %v2272_v31  ;;  %v2351_v1 = vadd.f32 1.0, %v3377_v56  ;;  %3388 = verf.f32 %v2307_v41 }
 0x53d   : > { %v2352_v55 = vadd.f32 1.0, %v3379_v63  ;;  %3390 = verf.f32 %v2308_v0  ;;  %v2292_v49 = vmul.f32 0.70710677, %v2228_v30  ;;  %v2256_v34 = vmul.f32 0.5, %v4834_v35 }
 0x53e   : > { %v2949_v27 = vpack.c.bf16 %v2400_v46, %v2399_v5  ;;  %v2383_v47 = vmul.f32 %v2351_v1, %v2255_v58  ;;  %3392 = verf.f32 %v2291_v21  ;;  %v2273_v50 = vmul.f32 0.5, %v4841_v40 }
 0x53f   : > { %v3381_v20 = vpop.eup %3380  ;;  %2948 = vmatpush3.bf16.xpose.msk.msra.mxu1 %vm4720_vm2, %v2946_v15  ;;  %3394 = verf.f32 %v2292_v49  ;;  %v2384_v37 = vmul.f32 %v2352_v55, %v2256_v34  ;;  %v2274_v29 = vmul.f32 0.5, %v4844_v28  ;;  %v2257_v7 = vmul.f32 0.5, %v4847_v43 }
 0x540   : > { %v3383_v36 = vpop.eup %3382  ;;  %2951 = vmatprep.subr.msk.bf16.mxu1 %vm4720_vm2, %v2949_v27  ;;  %v2369_v60 = vadd.f32 1.0, %v3381_v20  ;;  %v2258_v40 = vmul.f32 0.5, %v4856_v25  ;;  %v2275_v26 = vmul.f32 0.5, %v2243_v42  ;;  %v2276_v33 = vmul.f32 0.5, %v2244_v9 }
 0x541   : > { %v3385_v22 = vpop.eup %3384  ;;  %v2370_v18 = vadd.f32 1.0, %v3383_v36  ;;  %v2952_v45 = vpack.c.bf16 %v2384_v37, %v2383_v47  ;;  %v2259_v57 = vmul.f32 0.5, %v2227_v11  ;;  %v2260_v25 = vmul.f32 0.5, %v2228_v30  ;;  %v2408_v11 = vpop.permute.xlu0 %2407 }
 0x542   : > { %v2401_v48 = vmul.f32 %v2369_v60, %v2273_v50  ;;  %v3387_v4 = vpop.eup %3386  ;;  %v2353_v35 = vadd.f32 1.0, %v3385_v22  ;;  %v3464_v3 = vmov 1966171168  }
 0x543   : > { %v2402_v24 = vmul.f32 %v2370_v18, %v2274_v29  ;;  %v2354_v59 = vadd.f32 1.0, %v3387_v4  ;;  %v2584_v51 = vunpack.c.l.s4 %v3464_v3 }
 0x544   : > { %v2385_v23 = vmul.f32 %v2353_v35, %v2257_v7 }
 0x545   : > { %v2955_v38 = vpack.c.bf16 %v2402_v24, %v2401_v48  ;;  %v2386_v16 = vmul.f32 %v2354_v59, %v2258_v40  ;;  %v2585_v61 = vunpack.c.0.s8 %v2584_v51 }
 0x546   : > { %v3389_v2 = vpop.eup %3388 }
 0x547   : > { %v3391_v44 = vpop.eup %3390  ;;  %2954 = vmatpush3.bf16.xpose.msk.msra.mxu1 %vm4720_vm2, %v2952_v45  ;;  %v2371_v28 = vadd.f32 1.0, %v3389_v2  ;;  %v2958_v13 = vpack.c.bf16 %v2386_v16, %v2385_v23  ;;  %v2588_v5 = vsub.s32 %v2585_v61, %v4231_v14 }
 0x548   : > { %2957 = vmatprep.subr.msk.bf16.mxu1 %vm4720_vm2, %v2955_v38  ;;  %v2372_v8 = vadd.f32 1.0, %v3391_v44  ;;  %v3393_v39 = vpop.eup %3392 }
 0x549   : > { %v2403_v17 = vmul.f32 %v2371_v28, %v2275_v26  ;;  %v3395_v43 = vpop.eup %3394  ;;  %v2355_v12 = vadd.f32 1.0, %v3393_v39 }
 0x54a   : > { %v2404_v54 = vmul.f32 %v2372_v8, %v2276_v33  ;;  %v2356_v32 = vadd.f32 1.0, %v3395_v43 }
 0x54b   : > { %v2387_v42 = vmul.f32 %v2355_v12, %v2259_v57 }
 0x54c   : > { %v2961_v62 = vpack.c.bf16 %v2404_v54, %v2403_v17  ;;  %v2388_v9 = vmul.f32 %v2356_v32, %v2260_v25 }
 0x54e   : > { %v2964_v53 = vpack.c.bf16 %v2388_v9, %v2387_v42 }
 0x54f   : > { %2960 = vmatpush3.bf16.xpose.msk.msra.mxu1 %vm4720_vm2, %v2958_v13 }
 0x550   : > { %2963 = vmatprep.subr.msk.bf16.mxu1 %vm4720_vm2, %v2961_v62 }
 0x557   : > { %2966 = vmatpush3.bf16.xpose.msk.msra.mxu1 %vm4720_vm2, %v2964_v53 }
 0x55e   : > { %2862 = vmatmul.mubr.msk.f32.vlgmr.msra.gmra.mrb[0].mxu1 %vm515_vm1, %v4670_v6 }
 0x631   : > { %v2575_v31 = vpop.f32.mrb[0].mxu1 }
 0x632   : > { %v2576_v19 = vadd.f32 %v2575_v31, %v2408_v11  ;;  %v2577_v41 = vpop.f32.mrb[1].mxu1 }
 0x633   : > { %v2578_v56 = vadd.f32 %v2577_v41, %v2408_v11 }
 0x635   : > { %v2582_v0 = vcombine.low %v2576_v19, %v2578_v56 }
 0x637   : > { %v2589_v10 = vrot.slane %v2582_v0, %v2588_v5 }
 0x639   : > { %v2596_v6 = vrot.slane %v2589_v10, %v2588_v5 }
 0x63b   : > { %2602 = vst.msk [vmem:[%s137_s8] sm:$0x3] %vm2600_vm3, %v2596_v6 }
 0x63c   : > { %3411 = shalt.err (!%p3408_p3)
}
 0x63d   : > { %s3412_s25 = scalar_lea.hbm %s4900_s17, 32  ;;  %s3416_s29 = scalar_lea.hbm %s4944_s2, 128 }
 0x63e   : > { %p3413_p4 = scmp.ne.s32.totalorder %s4900_s17, %s3412_s25  ;;  %p3417_p9 = scmp.lt.u32.totalorder %s4900_s17, %s4944_s2 }
 0x63f   : > { %p3418_p10 = scmp.lt.u32.totalorder %s3416_s29, %s3412_s25  ;;  %p3420_p12 = scmp.lt.u32.totalorder %s3412_s25, %s4900_s17 }
 0x640   : > { %p3414_p7 = pnand %p3413_p4, %p3516_p5 }
 0x641   : > { %p3419_p11 = por %p3418_p10, %p3417_p9 }
 0x642   : > { %p3415_p8 = pneg %p3414_p7 }
 0x643   : > { %p3421_p13 = por %p3420_p12, %p3419_p11 }
 0x645   : > { %p3422_p0 = pnand %p3421_p13, %p3415_p8 }
 0x647   : > { %3425 = shalt.err (!%p3422_p0)
}
 0x648   : > { %2967 = dma.vmem_to_hbm [thread:$0]  (%p3516_p5), %s4902_s13, 32, %s4900_s17, %s2604_s21  }
 0x649 PF: > { %p2973_p1 = scmp.ge.s32.totalorder %s3460_s12, 2  ;;  %s2630_s4 = sand.u32 1, %s3448_s9  }
 0x64a   : > { %s2631_s5 = scalar_lea.sflag [#allocation3], %s2630_s4 }
 0x64b   : > { %p2970_p2 = pnand %p2973_p1, %p3520_p6 }
 0x64d   : > { %3443 = dma.done.wait (!%p2970_p2), %s2631_s5, 32  }
 0x64e   : > { %3445 = vsyncadd (!%p2970_p2), %s2631_s5, 4294967264  ;;  %p12_p3 = scmp.ge.s32.totalorder %s3504_s15, 6   ;;  %s4949_s9 = smov %s3452_s10 }
 0x64f   : > { %s4950_s10 = smov %s3456_s11  ;;  %s4951_s11 = smov %s3514_s18 }
 0x650   : > { %s4952_s12 = smov %s3504_s15  ;;  %14 = sbr.rel (!%p12_p3) target bundleno = 3 (0x3), region = 63 }
 0x657   :  { %2636 = vsyncpa [#allocation3], 1 }
 0x658   :  { %2638 = vsyncpa [#allocation3 + $0x1], 1 }

</bundles_post_ra>
